<compile_context>
chip_gen: v7x
topology: tpu7x:2x2x1
jax: 0.10.0
libtpu: 0.0.40
codegen_flags: <defaults>
</compile_context>

<pallas_src>
import functools

import jax
import jax.numpy as jnp
from jax import lax
from jax.experimental import pallas as pl
from jax.experimental.pallas import tpu as pltpu

EPS = 1e-5  # BatchNorm1d eps


# ----------------------------------------------------------------------------
# Fused decoder kernel
# ----------------------------------------------------------------------------
def _decoder_kernel(x_ref, l1w_ref, l1b_ref, l2w_ref, l2b_ref,
                    wih_ref, whh_ref, lb_ref,
                    aw_ref, ab_ref, ow_ref, ob_ref,
                    d1w_ref, d1b_ref, g1_ref, be1_ref,
                    d2w_ref, d2b_ref, g2_ref, be2_ref,
                    accw_ref, accb_ref,
                    out_ref,
                    seq_ref, gin_ref, hid_ref, pad1_ref, c1_ref, pad2_ref,
                    c2_ref, *, B, T):
    f32 = jnp.float32
    NL, H, _ = wih_ref.shape          # 120 layers, hidden size 12
    K = d1w_ref.shape[0]              # deconv kernel size 5
    C = d1w_ref.shape[2]              # 6 channels
    L1 = NL + K - 1                   # 124
    L2 = L1 + K - 1                   # 128

    # ---- lin1 -> ReLU -> lin2 -> ReLU on time-major rows (T*B, 12) ---------
    h0 = jnp.dot(x_ref[...], l1w_ref[...], preferred_element_type=f32)
    h0 = jnp.maximum(h0 + l1b_ref[...], 0.0)
    h0 = jnp.dot(h0, l2w_ref[...], preferred_element_type=f32)
    seq_ref[...] = jnp.maximum(h0 + l2b_ref[...], 0.0)

    # ---- 120-layer LSTM (input_size == hidden_size == 12) ------------------
    def layer_body(l, carry):
        whh = whh_ref[l]                                        # (H, 4H)
        # Hoisted input projection: one matmul per layer over all (t, b) rows.
        gin_ref[...] = (jnp.dot(seq_ref[...], wih_ref[l],
                                preferred_element_type=f32) + lb_ref[l])
        h = jnp.zeros((B, H), f32)
        c = jnp.zeros((B, H), f32)
        for t in range(T):                                      # unrolled (T static)
            g = gin_ref[t * B:(t + 1) * B, :] + jnp.dot(
                h, whh, preferred_element_type=f32)             # (B, 4H)
            sig = jax.nn.sigmoid(g[:, :3 * H])                  # [i | f | o] gates
            gg = jnp.tanh(g[:, 3 * H:])                         # g gate
            c = sig[:, H:2 * H] * c + sig[:, :H] * gg
            h = sig[:, 2 * H:3 * H] * jnp.tanh(c)
            seq_ref[t * B:(t + 1) * B, :] = h                   # next layer's input
        # Final hidden state of this layer, stored batch-major: row b*NL + l.
        for b in range(B):
            hid_ref[pl.ds(b * NL + l, 1), :] = h[b:b + 1, :]
        return carry

    lax.fori_loop(0, NL, layer_body, 0)

    # ---- attn -> ReLU -> outputAng -> ReLU (channels-last, zero-padded) ----
    pad1_ref[...] = jnp.zeros_like(pad1_ref)
    for b in range(B):
        hb = hid_ref[b * NL:(b + 1) * NL, :]                    # (NL, H)
        a = jnp.dot(hb, aw_ref[...], preferred_element_type=f32)
        a = jnp.maximum(a + ab_ref[...], 0.0)
        ang = jnp.dot(a, ow_ref[...], preferred_element_type=f32)
        ang = jnp.maximum(ang + ob_ref[...], 0.0)               # (NL, C)
        pad1_ref[b, K - 1:K - 1 + NL, :] = ang

    # ---- deConvAcc (stride 1) + BatchNorm1d (batch stats) + ReLU -----------
    for b in range(B):
        acc = jnp.zeros((L1, C), f32)
        for k in range(K):
            off = K - 1 - k
            acc = acc + jnp.dot(pad1_ref[b, off:off + L1, :], d1w_ref[k],
                                preferred_element_type=f32)
        c1_ref[b] = acc + d1b_ref[...]
    c1 = c1_ref[...]
    m1 = jnp.mean(c1, axis=(0, 1), keepdims=True)
    v1 = jnp.mean((c1 - m1) ** 2, axis=(0, 1), keepdims=True)
    y1 = (c1 - m1) * lax.rsqrt(v1 + EPS) * g1_ref[...][None] + be1_ref[...][None]
    y1 = jnp.maximum(y1, 0.0)                                    # (B, L1, C)

    # ---- deConvAng (stride 1) + BatchNorm1d (batch stats) + ReLU -----------
    pad2_ref[...] = jnp.zeros_like(pad2_ref)
    for b in range(B):
        pad2_ref[b, K - 1:K - 1 + L1, :] = y1[b]
    for b in range(B):
        acc = jnp.zeros((L2, C), f32)
        for k in range(K):
            off = K - 1 - k
            acc = acc + jnp.dot(pad2_ref[b, off:off + L2, :], d2w_ref[k],
                                preferred_element_type=f32)
        c2_ref[b] = acc + d2b_ref[...]
    c2 = c2_ref[...]
    m2 = jnp.mean(c2, axis=(0, 1), keepdims=True)
    v2 = jnp.mean((c2 - m2) ** 2, axis=(0, 1), keepdims=True)
    y2 = (c2 - m2) * lax.rsqrt(v2 + EPS) * g2_ref[...][None] + be2_ref[...][None]
    y2 = jnp.maximum(y2, 0.0)                                    # (B, L2, C)

    # ---- outputAcc Linear(6->6) over channels; lane-dense (B, C, 128) store -
    for b in range(B):
        o = lax.dot_general(accw_ref[...], y2[b],
                            (((1,), (1,)), ((), ())),            # W @ y^T
                            preferred_element_type=f32)          # (C, L2)
        out_ref[b] = o + accb_ref[...]


# ----------------------------------------------------------------------------
# Parameters (deterministic synthetic init; PyTorch shapes), one-time prep
# ----------------------------------------------------------------------------
def init_params(key):
    ks = jax.random.split(key, 16)

    def rn(k, shape, scale=0.2):
        return scale * jax.random.normal(k, shape, dtype=jnp.float32)

    H, NL = 12, 120
    return dict(
        lin1_w=rn(ks[0], (12, 12)), lin1_b=rn(ks[1], (12,), 0.05),
        lin2_w=rn(ks[2], (12, 12)), lin2_b=rn(ks[3], (12,), 0.05),
        lstm_wih=rn(ks[4], (NL, 4 * H, H)),
        lstm_whh=rn(ks[5], (NL, 4 * H, H)),
        lstm_bih=rn(ks[6], (NL, 4 * H), 0.05),
        lstm_bhh=rn(ks[7], (NL, 4 * H), 0.05),
        attn_w=rn(ks[8], (12, 12)), attn_b=rn(ks[9], (12,), 0.05),
        outAng_w=rn(ks[10], (6, 12)), outAng_b=rn(ks[11], (6,), 0.05),
        deconvAcc_w=rn(ks[12], (6, 6, 5)),
        deconvAcc_b=jnp.zeros((6,), jnp.float32),
        deconvAng_w=rn(ks[13], (6, 6, 5)),
        deconvAng_b=jnp.zeros((6,), jnp.float32),
        bn1_g=jnp.ones((6,), jnp.float32), bn1_b=jnp.zeros((6,), jnp.float32),
        bn2_g=jnp.ones((6,), jnp.float32), bn2_b=jnp.zeros((6,), jnp.float32),
        outAcc_w=rn(ks[14], (6, 6)), outAcc_b=rn(ks[15], (6,), 0.05),
    )


def prepare_params(p):
    """One-time weight prep (transposes / gate reorder / bias fusion).

    Runs once, outside the jitted forward, so no per-call XLA transposes of
    the ~0.55 MB LSTM weight stack remain.
    """
    NL, G4, _ = p['lstm_wih'].shape
    H = G4 // 4
    # PyTorch gate order is [i, f, g, o]; reorder to [i, f, o, g] so the kernel
    # applies one sigmoid to the first 3H gate columns and one tanh to the rest.
    perm = jnp.concatenate([jnp.arange(0, H), jnp.arange(H, 2 * H),
                            jnp.arange(3 * H, 4 * H), jnp.arange(2 * H, 3 * H)])
    wih = p['lstm_wih'][:, perm, :]
    whh = p['lstm_whh'][:, perm, :]
    lb = (p['lstm_bih'] + p['lstm_bhh'])[:, perm]
    return dict(
        lin1_wt=p['lin1_w'].T, lin1_b=p['lin1_b'].reshape(1, -1),
        lin2_wt=p['lin2_w'].T, lin2_b=p['lin2_b'].reshape(1, -1),
        wih_t=jnp.transpose(wih, (0, 2, 1)),        # (NL, H, 4H)
        whh_t=jnp.transpose(whh, (0, 2, 1)),        # (NL, H, 4H)
        lstm_b=lb.reshape(NL, 1, 4 * H),            # (NL, 1, 4H), b_ih + b_hh
        attn_wt=p['attn_w'].T, attn_b=p['attn_b'].reshape(1, -1),
        ang_wt=p['outAng_w'].T, ang_b=p['outAng_b'].reshape(1, -1),
        dc1_w=jnp.transpose(p['deconvAcc_w'], (2, 0, 1)),   # (K, Cin, Cout)
        dc1_b=p['deconvAcc_b'].reshape(1, -1),
        bn1_g=p['bn1_g'].reshape(1, -1), bn1_b=p['bn1_b'].reshape(1, -1),
        dc2_w=jnp.transpose(p['deconvAng_w'], (2, 0, 1)),
        dc2_b=p['deconvAng_b'].reshape(1, -1),
        bn2_g=p['bn2_g'].reshape(1, -1), bn2_b=p['bn2_b'].reshape(1, -1),
        acc_w=p['outAcc_w'],                        # (Cout, Cin)
        acc_b=p['outAcc_b'].reshape(-1, 1),         # (Cout, 1) column bias
    )


# ----------------------------------------------------------------------------
# Forward pass: one fused pallas_call
# ----------------------------------------------------------------------------
def vae_decoder_forward(prep, x):
    B, T, F = x.shape                              # (B, T, 12), batch_first
    NL, H, _ = prep['wih_t'].shape                 # 120 layers, hidden 12
    K, _, C = prep['dc1_w'].shape                  # kernel 5, channels 6
    L1 = NL + K - 1                                # 124
    L2 = L1 + K - 1                                # 128

    # time-major rows: row t*B + b == x[b, t]  (tiny XLA reshape, done once)
    x_tm = jnp.transpose(x, (1, 0, 2)).reshape(T * B, F)

    return pl.pallas_call(
        functools.partial(_decoder_kernel, B=B, T=T),
        out_shape=jax.ShapeDtypeStruct((B, C, L2), jnp.float32),
        scratch_shapes=[
            pltpu.VMEM((T * B, H), jnp.float32),                  # layer I/O seq
            pltpu.VMEM((T * B, 4 * H), jnp.float32),              # hoisted gate in
            pltpu.VMEM((B * NL, H), jnp.float32),                 # per-layer hidden
            pltpu.VMEM((B, NL + 2 * (K - 1), C), jnp.float32),    # padded deconv1 in
            pltpu.VMEM((B, L1, C), jnp.float32),                  # deconv1 out
            pltpu.VMEM((B, L1 + 2 * (K - 1), C), jnp.float32),    # padded deconv2 in
            pltpu.VMEM((B, L2, C), jnp.float32),                  # deconv2 out
        ],
    )(x_tm,
      prep['lin1_wt'], prep['lin1_b'], prep['lin2_wt'], prep['lin2_b'],
      prep['wih_t'], prep['whh_t'], prep['lstm_b'],
      prep['attn_wt'], prep['attn_b'], prep['ang_wt'], prep['ang_b'],
      prep['dc1_w'], prep['dc1_b'], prep['bn1_g'], prep['bn1_b'],
      prep['dc2_w'], prep['dc2_b'], prep['bn2_g'], prep['bn2_b'],
      prep['acc_w'], prep['acc_b'])


if __name__ == "__main__":
    key = jax.random.PRNGKey(0)
    pkey, xkey = jax.random.split(key)
    params = init_params(pkey)
    prep = prepare_params(params)                  # one-time weight prep

    B, T = 2, 8
    x = jax.random.normal(xkey, (B, T, 12), dtype=jnp.float32)

    fwd = jax.jit(vae_decoder_forward)
    out = jax.block_until_ready(fwd(prep, x))

    assert out.shape == (B, 6, 128), out.shape
    assert bool(jnp.all(jnp.isfinite(out)))
    print("KERNEL_OK")
</pallas_src>

<mosaic_0001>
module attributes {stable_mosaic.version = 11 : i64} {
  func.func @_decoder_kernel(%arg0: memref<16x12xf32, #tpu.memory_space<vmem>>, %arg1: memref<12x12xf32, #tpu.memory_space<vmem>>, %arg2: memref<1x12xf32, #tpu.memory_space<vmem>>, %arg3: memref<12x12xf32, #tpu.memory_space<vmem>>, %arg4: memref<1x12xf32, #tpu.memory_space<vmem>>, %arg5: memref<120x12x48xf32, #tpu.memory_space<vmem>>, %arg6: memref<120x12x48xf32, #tpu.memory_space<vmem>>, %arg7: memref<120x1x48xf32, #tpu.memory_space<vmem>>, %arg8: memref<12x12xf32, #tpu.memory_space<vmem>>, %arg9: memref<1x12xf32, #tpu.memory_space<vmem>>, %arg10: memref<12x6xf32, #tpu.memory_space<vmem>>, %arg11: memref<1x6xf32, #tpu.memory_space<vmem>>, %arg12: memref<5x6x6xf32, #tpu.memory_space<vmem>>, %arg13: memref<1x6xf32, #tpu.memory_space<vmem>>, %arg14: memref<1x6xf32, #tpu.memory_space<vmem>>, %arg15: memref<1x6xf32, #tpu.memory_space<vmem>>, %arg16: memref<5x6x6xf32, #tpu.memory_space<vmem>>, %arg17: memref<1x6xf32, #tpu.memory_space<vmem>>, %arg18: memref<1x6xf32, #tpu.memory_space<vmem>>, %arg19: memref<1x6xf32, #tpu.memory_space<vmem>>, %arg20: memref<6x6xf32, #tpu.memory_space<vmem>>, %arg21: memref<6x1xf32, #tpu.memory_space<vmem>>, %arg22: memref<2x6x128xf32, #tpu.memory_space<vmem>>, %arg23: memref<16x12xf32, #tpu.memory_space<vmem>>, %arg24: memref<16x48xf32, #tpu.memory_space<vmem>>, %arg25: memref<240x12xf32, #tpu.memory_space<vmem>>, %arg26: memref<2x128x6xf32, #tpu.memory_space<vmem>>, %arg27: memref<2x124x6xf32, #tpu.memory_space<vmem>>, %arg28: memref<2x132x6xf32, #tpu.memory_space<vmem>>, %arg29: memref<2x128x6xf32, #tpu.memory_space<vmem>>) attributes {dimension_semantics = [], scalar_prefetch = 0 : i64, scratch_operands = 7 : i64, tpu.core_type = #tpu.core_type<tc>} {
    %c0 = arith.constant 0 : index
    %c0_0 = arith.constant 0 : index
    %0 = vector.load %arg0[%c0, %c0_0] : memref<16x12xf32, #tpu.memory_space<vmem>>, vector<16x12xf32>
    %c0_1 = arith.constant 0 : index
    %c0_2 = arith.constant 0 : index
    %1 = vector.load %arg1[%c0_1, %c0_2] : memref<12x12xf32, #tpu.memory_space<vmem>>, vector<12x12xf32>
    %cst = arith.constant dense<0.000000e+00> : vector<16x12xf32>
    %2 = tpu.matmul %0, %1, %cst {dimension_numbers = #tpu.dot_dimension_numbers<[1], [0], [0], [1], [0, 0, 1, 1], [], []>} : vector<16x12xf32>, vector<12x12xf32>, vector<16x12xf32> -> vector<16x12xf32>
    %c0_3 = arith.constant 0 : index
    %c0_4 = arith.constant 0 : index
    %3 = vector.load %arg2[%c0_3, %c0_4] : memref<1x12xf32, #tpu.memory_space<vmem>>, vector<1x12xf32>
    %4 = vector.broadcast %3 : vector<1x12xf32> to vector<16x12xf32>
    %5 = arith.addf %2, %4 : vector<16x12xf32>
    %cst_5 = arith.constant 0.000000e+00 : f32
    %6 = vector.broadcast %cst_5 : f32 to vector<16x12xf32>
    %7 = arith.maximumf %5, %6 : vector<16x12xf32>
    %c0_6 = arith.constant 0 : index
    %c0_7 = arith.constant 0 : index
    %8 = vector.load %arg3[%c0_6, %c0_7] : memref<12x12xf32, #tpu.memory_space<vmem>>, vector<12x12xf32>
    %cst_8 = arith.constant dense<0.000000e+00> : vector<16x12xf32>
    %9 = tpu.matmul %7, %8, %cst_8 {dimension_numbers = #tpu.dot_dimension_numbers<[1], [0], [0], [1], [0, 0, 1, 1], [], []>} : vector<16x12xf32>, vector<12x12xf32>, vector<16x12xf32> -> vector<16x12xf32>
    %c0_9 = arith.constant 0 : index
    %c0_10 = arith.constant 0 : index
    %10 = vector.load %arg4[%c0_9, %c0_10] : memref<1x12xf32, #tpu.memory_space<vmem>>, vector<1x12xf32>
    %11 = vector.broadcast %10 : vector<1x12xf32> to vector<16x12xf32>
    %12 = arith.addf %9, %11 : vector<16x12xf32>
    %cst_11 = arith.constant 0.000000e+00 : f32
    %13 = vector.broadcast %cst_11 : f32 to vector<16x12xf32>
    %14 = arith.maximumf %12, %13 : vector<16x12xf32>
    %c0_12 = arith.constant 0 : index
    %c0_13 = arith.constant 0 : index
    %15 = vector.load %arg23[%c0_12, %c0_13] : memref<16x12xf32, #tpu.memory_space<vmem>>, vector<16x12xf32>
    tpu.vector_store %arg23[%c0_12, %c0_13], %14 {strides = array<i32>} : memref<16x12xf32, #tpu.memory_space<vmem>>, vector<16x12xf32>,
    %c0_i32 = arith.constant 0 : i32
    %c120_i32 = arith.constant 120 : i32
    %16 = arith.addi %c0_i32, %c120_i32 : i32
    %c1_i32 = arith.constant 1 : i32
    scf.for %arg30 = %c0_i32 to %16 step %c1_i32  : i32 {
      %293 = arith.index_cast %arg30 : i32 to index
      %c0_264 = arith.constant 0 : index
      %c0_265 = arith.constant 0 : index
      %294 = vector.load %arg6[%293, %c0_264, %c0_265] : memref<120x12x48xf32, #tpu.memory_space<vmem>>, vector<1x12x48xf32>
      %295 = vector.shape_cast %294 : vector<1x12x48xf32> to vector<12x48xf32>
      %c0_266 = arith.constant 0 : index
      %c0_267 = arith.constant 0 : index
      %296 = vector.load %arg23[%c0_266, %c0_267] : memref<16x12xf32, #tpu.memory_space<vmem>>, vector<16x12xf32>
      %297 = arith.index_cast %arg30 : i32 to index
      %c0_268 = arith.constant 0 : index
      %c0_269 = arith.constant 0 : index
      %298 = vector.load %arg5[%297, %c0_268, %c0_269] : memref<120x12x48xf32, #tpu.memory_space<vmem>>, vector<1x12x48xf32>
      %299 = vector.shape_cast %298 : vector<1x12x48xf32> to vector<12x48xf32>
      %cst_270 = arith.constant dense<0.000000e+00> : vector<16x48xf32>
      %300 = tpu.matmul %296, %299, %cst_270 {dimension_numbers = #tpu.dot_dimension_numbers<[1], [0], [0], [1], [0, 0, 1, 1], [], []>} : vector<16x12xf32>, vector<12x48xf32>, vector<16x48xf32> -> vector<16x48xf32>
      %301 = arith.index_cast %arg30 : i32 to index
      %c0_271 = arith.constant 0 : index
      %c0_272 = arith.constant 0 : index
      %302 = vector.load %arg7[%301, %c0_271, %c0_272] : memref<120x1x48xf32, #tpu.memory_space<vmem>>, vector<1x1x48xf32>
      %303 = vector.shape_cast %302 : vector<1x1x48xf32> to vector<1x48xf32>
      %304 = vector.broadcast %303 : vector<1x48xf32> to vector<16x48xf32>
      %305 = arith.addf %300, %304 : vector<16x48xf32>
      %c0_273 = arith.constant 0 : index
      %c0_274 = arith.constant 0 : index
      %306 = vector.load %arg24[%c0_273, %c0_274] : memref<16x48xf32, #tpu.memory_space<vmem>>, vector<16x48xf32>
      tpu.vector_store %arg24[%c0_273, %c0_274], %305 {strides = array<i32>} : memref<16x48xf32, #tpu.memory_space<vmem>>, vector<16x48xf32>,
      %cst_275 = arith.constant 0.000000e+00 : f32
      %307 = vector.broadcast %cst_275 : f32 to vector<2x12xf32>
      %cst_276 = arith.constant 0.000000e+00 : f32
      %308 = vector.broadcast %cst_276 : f32 to vector<2x12xf32>
      %c0_277 = arith.constant 0 : index
      %c0_278 = arith.constant 0 : index
      %309 = vector.load %arg24[%c0_277, %c0_278] : memref<16x48xf32, #tpu.memory_space<vmem>>, vector<2x48xf32>
      %cst_279 = arith.constant dense<0.000000e+00> : vector<2x48xf32>
      %310 = tpu.matmul %307, %295, %cst_279 {dimension_numbers = #tpu.dot_dimension_numbers<[1], [0], [0], [1], [0, 0, 1, 1], [], []>} : vector<2x12xf32>, vector<12x48xf32>, vector<2x48xf32> -> vector<2x48xf32>
      %311 = arith.addf %309, %310 : vector<2x48xf32>
      %312 = vector.extract_strided_slice %311 {offsets = [0, 0], sizes = [2, 36], strides = [1, 1]} : vector<2x48xf32> to vector<2x36xf32>
      %313 = arith.negf %312 : vector<2x36xf32>
      %314 = math.exp %313 : vector<2x36xf32>
      %cst_280 = arith.constant 1.000000e+00 : f32
      %315 = vector.broadcast %cst_280 : f32 to vector<2x36xf32>
      %316 = arith.addf %315, %314 : vector<2x36xf32>
      %317 = arith.divf %315, %316 : vector<2x36xf32>
      %318 = vector.extract_strided_slice %311 {offsets = [0, 36], sizes = [2, 12], strides = [1, 1]} : vector<2x48xf32> to vector<2x12xf32>
      %319 = math.tanh %318 : vector<2x12xf32>
      %320 = vector.extract_strided_slice %317 {offsets = [0, 12], sizes = [2, 12], strides = [1, 1]} : vector<2x36xf32> to vector<2x12xf32>
      %321 = arith.mulf %320, %308 : vector<2x12xf32>
      %322 = vector.extract_strided_slice %317 {offsets = [0, 0], sizes = [2, 12], strides = [1, 1]} : vector<2x36xf32> to vector<2x12xf32>
      %323 = arith.mulf %322, %319 : vector<2x12xf32>
      %324 = arith.addf %321, %323 : vector<2x12xf32>
      %325 = vector.extract_strided_slice %317 {offsets = [0, 24], sizes = [2, 12], strides = [1, 1]} : vector<2x36xf32> to vector<2x12xf32>
      %326 = math.tanh %324 : vector<2x12xf32>
      %327 = arith.mulf %325, %326 : vector<2x12xf32>
      %c0_281 = arith.constant 0 : index
      %c0_282 = arith.constant 0 : index
      %328 = vector.load %arg23[%c0_281, %c0_282] : memref<16x12xf32, #tpu.memory_space<vmem>>, vector<2x12xf32>
      tpu.vector_store %arg23[%c0_281, %c0_282], %327 {strides = array<i32>} : memref<16x12xf32, #tpu.memory_space<vmem>>, vector<2x12xf32>,
      %c2_283 = arith.constant 2 : index
      %c0_284 = arith.constant 0 : index
      %329 = vector.load %arg24[%c2_283, %c0_284] : memref<16x48xf32, #tpu.memory_space<vmem>>, vector<2x48xf32>
      %cst_285 = arith.constant dense<0.000000e+00> : vector<2x48xf32>
      %330 = tpu.matmul %327, %295, %cst_285 {dimension_numbers = #tpu.dot_dimension_numbers<[1], [0], [0], [1], [0, 0, 1, 1], [], []>} : vector<2x12xf32>, vector<12x48xf32>, vector<2x48xf32> -> vector<2x48xf32>
      %331 = arith.addf %329, %330 : vector<2x48xf32>
      %332 = vector.extract_strided_slice %331 {offsets = [0, 0], sizes = [2, 36], strides = [1, 1]} : vector<2x48xf32> to vector<2x36xf32>
      %333 = arith.negf %332 : vector<2x36xf32>
      %334 = math.exp %333 : vector<2x36xf32>
      %cst_286 = arith.constant 1.000000e+00 : f32
      %335 = vector.broadcast %cst_286 : f32 to vector<2x36xf32>
      %336 = arith.addf %335, %334 : vector<2x36xf32>
      %337 = arith.divf %335, %336 : vector<2x36xf32>
      %338 = vector.extract_strided_slice %331 {offsets = [0, 36], sizes = [2, 12], strides = [1, 1]} : vector<2x48xf32> to vector<2x12xf32>
      %339 = math.tanh %338 : vector<2x12xf32>
      %340 = vector.extract_strided_slice %337 {offsets = [0, 12], sizes = [2, 12], strides = [1, 1]} : vector<2x36xf32> to vector<2x12xf32>
      %341 = arith.mulf %340, %324 : vector<2x12xf32>
      %342 = vector.extract_strided_slice %337 {offsets = [0, 0], sizes = [2, 12], strides = [1, 1]} : vector<2x36xf32> to vector<2x12xf32>
      %343 = arith.mulf %342, %339 : vector<2x12xf32>
      %344 = arith.addf %341, %343 : vector<2x12xf32>
      %345 = vector.extract_strided_slice %337 {offsets = [0, 24], sizes = [2, 12], strides = [1, 1]} : vector<2x36xf32> to vector<2x12xf32>
      %346 = math.tanh %344 : vector<2x12xf32>
      %347 = arith.mulf %345, %346 : vector<2x12xf32>
      %c2_287 = arith.constant 2 : index
      %c0_288 = arith.constant 0 : index
      %348 = vector.load %arg23[%c2_287, %c0_288] : memref<16x12xf32, #tpu.memory_space<vmem>>, vector<2x12xf32>
      tpu.vector_store %arg23[%c2_287, %c0_288], %347 {strides = array<i32>} : memref<16x12xf32, #tpu.memory_space<vmem>>, vector<2x12xf32>,
      %c4_289 = arith.constant 4 : index
      %c0_290 = arith.constant 0 : index
      %349 = vector.load %arg24[%c4_289, %c0_290] : memref<16x48xf32, #tpu.memory_space<vmem>>, vector<2x48xf32>
      %cst_291 = arith.constant dense<0.000000e+00> : vector<2x48xf32>
      %350 = tpu.matmul %347, %295, %cst_291 {dimension_numbers = #tpu.dot_dimension_numbers<[1], [0], [0], [1], [0, 0, 1, 1], [], []>} : vector<2x12xf32>, vector<12x48xf32>, vector<2x48xf32> -> vector<2x48xf32>
      %351 = arith.addf %349, %350 : vector<2x48xf32>
      %352 = vector.extract_strided_slice %351 {offsets = [0, 0], sizes = [2, 36], strides = [1, 1]} : vector<2x48xf32> to vector<2x36xf32>
      %353 = arith.negf %352 : vector<2x36xf32>
      %354 = math.exp %353 : vector<2x36xf32>
      %cst_292 = arith.constant 1.000000e+00 : f32
      %355 = vector.broadcast %cst_292 : f32 to vector<2x36xf32>
      %356 = arith.addf %355, %354 : vector<2x36xf32>
      %357 = arith.divf %355, %356 : vector<2x36xf32>
      %358 = vector.extract_strided_slice %351 {offsets = [0, 36], sizes = [2, 12], strides = [1, 1]} : vector<2x48xf32> to vector<2x12xf32>
      %359 = math.tanh %358 : vector<2x12xf32>
      %360 = vector.extract_strided_slice %357 {offsets = [0, 12], sizes = [2, 12], strides = [1, 1]} : vector<2x36xf32> to vector<2x12xf32>
      %361 = arith.mulf %360, %344 : vector<2x12xf32>
      %362 = vector.extract_strided_slice %357 {offsets = [0, 0], sizes = [2, 12], strides = [1, 1]} : vector<2x36xf32> to vector<2x12xf32>
      %363 = arith.mulf %362, %359 : vector<2x12xf32>
      %364 = arith.addf %361, %363 : vector<2x12xf32>
      %365 = vector.extract_strided_slice %357 {offsets = [0, 24], sizes = [2, 12], strides = [1, 1]} : vector<2x36xf32> to vector<2x12xf32>
      %366 = math.tanh %364 : vector<2x12xf32>
      %367 = arith.mulf %365, %366 : vector<2x12xf32>
      %c4_293 = arith.constant 4 : index
      %c0_294 = arith.constant 0 : index
      %368 = vector.load %arg23[%c4_293, %c0_294] : memref<16x12xf32, #tpu.memory_space<vmem>>, vector<2x12xf32>
      tpu.vector_store %arg23[%c4_293, %c0_294], %367 {strides = array<i32>} : memref<16x12xf32, #tpu.memory_space<vmem>>, vector<2x12xf32>,
      %c6 = arith.constant 6 : index
      %c0_295 = arith.constant 0 : index
      %369 = vector.load %arg24[%c6, %c0_295] : memref<16x48xf32, #tpu.memory_space<vmem>>, vector<2x48xf32>
      %cst_296 = arith.constant dense<0.000000e+00> : vector<2x48xf32>
      %370 = tpu.matmul %367, %295, %cst_296 {dimension_numbers = #tpu.dot_dimension_numbers<[1], [0], [0], [1], [0, 0, 1, 1], [], []>} : vector<2x12xf32>, vector<12x48xf32>, vector<2x48xf32> -> vector<2x48xf32>
      %371 = arith.addf %369, %370 : vector<2x48xf32>
      %372 = vector.extract_strided_slice %371 {offsets = [0, 0], sizes = [2, 36], strides = [1, 1]} : vector<2x48xf32> to vector<2x36xf32>
      %373 = arith.negf %372 : vector<2x36xf32>
      %374 = math.exp %373 : vector<2x36xf32>
      %cst_297 = arith.constant 1.000000e+00 : f32
      %375 = vector.broadcast %cst_297 : f32 to vector<2x36xf32>
      %376 = arith.addf %375, %374 : vector<2x36xf32>
      %377 = arith.divf %375, %376 : vector<2x36xf32>
      %378 = vector.extract_strided_slice %371 {offsets = [0, 36], sizes = [2, 12], strides = [1, 1]} : vector<2x48xf32> to vector<2x12xf32>
      %379 = math.tanh %378 : vector<2x12xf32>
      %380 = vector.extract_strided_slice %377 {offsets = [0, 12], sizes = [2, 12], strides = [1, 1]} : vector<2x36xf32> to vector<2x12xf32>
      %381 = arith.mulf %380, %364 : vector<2x12xf32>
      %382 = vector.extract_strided_slice %377 {offsets = [0, 0], sizes = [2, 12], strides = [1, 1]} : vector<2x36xf32> to vector<2x12xf32>
      %383 = arith.mulf %382, %379 : vector<2x12xf32>
      %384 = arith.addf %381, %383 : vector<2x12xf32>
      %385 = vector.extract_strided_slice %377 {offsets = [0, 24], sizes = [2, 12], strides = [1, 1]} : vector<2x36xf32> to vector<2x12xf32>
      %386 = math.tanh %384 : vector<2x12xf32>
      %387 = arith.mulf %385, %386 : vector<2x12xf32>
      %c6_298 = arith.constant 6 : index
      %c0_299 = arith.constant 0 : index
      %388 = vector.load %arg23[%c6_298, %c0_299] : memref<16x12xf32, #tpu.memory_space<vmem>>, vector<2x12xf32>
      tpu.vector_store %arg23[%c6_298, %c0_299], %387 {strides = array<i32>} : memref<16x12xf32, #tpu.memory_space<vmem>>, vector<2x12xf32>,
      %c8 = arith.constant 8 : index
      %c0_300 = arith.constant 0 : index
      %389 = vector.load %arg24[%c8, %c0_300] : memref<16x48xf32, #tpu.memory_space<vmem>>, vector<2x48xf32>
      %cst_301 = arith.constant dense<0.000000e+00> : vector<2x48xf32>
      %390 = tpu.matmul %387, %295, %cst_301 {dimension_numbers = #tpu.dot_dimension_numbers<[1], [0], [0], [1], [0, 0, 1, 1], [], []>} : vector<2x12xf32>, vector<12x48xf32>, vector<2x48xf32> -> vector<2x48xf32>
      %391 = arith.addf %389, %390 : vector<2x48xf32>
      %392 = vector.extract_strided_slice %391 {offsets = [0, 0], sizes = [2, 36], strides = [1, 1]} : vector<2x48xf32> to vector<2x36xf32>
      %393 = arith.negf %392 : vector<2x36xf32>
      %394 = math.exp %393 : vector<2x36xf32>
      %cst_302 = arith.constant 1.000000e+00 : f32
      %395 = vector.broadcast %cst_302 : f32 to vector<2x36xf32>
      %396 = arith.addf %395, %394 : vector<2x36xf32>
      %397 = arith.divf %395, %396 : vector<2x36xf32>
      %398 = vector.extract_strided_slice %391 {offsets = [0, 36], sizes = [2, 12], strides = [1, 1]} : vector<2x48xf32> to vector<2x12xf32>
      %399 = math.tanh %398 : vector<2x12xf32>
      %400 = vector.extract_strided_slice %397 {offsets = [0, 12], sizes = [2, 12], strides = [1, 1]} : vector<2x36xf32> to vector<2x12xf32>
      %401 = arith.mulf %400, %384 : vector<2x12xf32>
      %402 = vector.extract_strided_slice %397 {offsets = [0, 0], sizes = [2, 12], strides = [1, 1]} : vector<2x36xf32> to vector<2x12xf32>
      %403 = arith.mulf %402, %399 : vector<2x12xf32>
      %404 = arith.addf %401, %403 : vector<2x12xf32>
      %405 = vector.extract_strided_slice %397 {offsets = [0, 24], sizes = [2, 12], strides = [1, 1]} : vector<2x36xf32> to vector<2x12xf32>
      %406 = math.tanh %404 : vector<2x12xf32>
      %407 = arith.mulf %405, %406 : vector<2x12xf32>
      %c8_303 = arith.constant 8 : index
      %c0_304 = arith.constant 0 : index
      %408 = vector.load %arg23[%c8_303, %c0_304] : memref<16x12xf32, #tpu.memory_space<vmem>>, vector<2x12xf32>
      tpu.vector_store %arg23[%c8_303, %c0_304], %407 {strides = array<i32>} : memref<16x12xf32, #tpu.memory_space<vmem>>, vector<2x12xf32>,
      %c10 = arith.constant 10 : index
      %c0_305 = arith.constant 0 : index
      %409 = vector.load %arg24[%c10, %c0_305] : memref<16x48xf32, #tpu.memory_space<vmem>>, vector<2x48xf32>
      %cst_306 = arith.constant dense<0.000000e+00> : vector<2x48xf32>
      %410 = tpu.matmul %407, %295, %cst_306 {dimension_numbers = #tpu.dot_dimension_numbers<[1], [0], [0], [1], [0, 0, 1, 1], [], []>} : vector<2x12xf32>, vector<12x48xf32>, vector<2x48xf32> -> vector<2x48xf32>
      %411 = arith.addf %409, %410 : vector<2x48xf32>
      %412 = vector.extract_strided_slice %411 {offsets = [0, 0], sizes = [2, 36], strides = [1, 1]} : vector<2x48xf32> to vector<2x36xf32>
      %413 = arith.negf %412 : vector<2x36xf32>
      %414 = math.exp %413 : vector<2x36xf32>
      %cst_307 = arith.constant 1.000000e+00 : f32
      %415 = vector.broadcast %cst_307 : f32 to vector<2x36xf32>
      %416 = arith.addf %415, %414 : vector<2x36xf32>
      %417 = arith.divf %415, %416 : vector<2x36xf32>
      %418 = vector.extract_strided_slice %411 {offsets = [0, 36], sizes = [2, 12], strides = [1, 1]} : vector<2x48xf32> to vector<2x12xf32>
      %419 = math.tanh %418 : vector<2x12xf32>
      %420 = vector.extract_strided_slice %417 {offsets = [0, 12], sizes = [2, 12], strides = [1, 1]} : vector<2x36xf32> to vector<2x12xf32>
      %421 = arith.mulf %420, %404 : vector<2x12xf32>
      %422 = vector.extract_strided_slice %417 {offsets = [0, 0], sizes = [2, 12], strides = [1, 1]} : vector<2x36xf32> to vector<2x12xf32>
      %423 = arith.mulf %422, %419 : vector<2x12xf32>
      %424 = arith.addf %421, %423 : vector<2x12xf32>
      %425 = vector.extract_strided_slice %417 {offsets = [0, 24], sizes = [2, 12], strides = [1, 1]} : vector<2x36xf32> to vector<2x12xf32>
      %426 = math.tanh %424 : vector<2x12xf32>
      %427 = arith.mulf %425, %426 : vector<2x12xf32>
      %c10_308 = arith.constant 10 : index
      %c0_309 = arith.constant 0 : index
      %428 = vector.load %arg23[%c10_308, %c0_309] : memref<16x12xf32, #tpu.memory_space<vmem>>, vector<2x12xf32>
      tpu.vector_store %arg23[%c10_308, %c0_309], %427 {strides = array<i32>} : memref<16x12xf32, #tpu.memory_space<vmem>>, vector<2x12xf32>,
      %c12 = arith.constant 12 : index
      %c0_310 = arith.constant 0 : index
      %429 = vector.load %arg24[%c12, %c0_310] : memref<16x48xf32, #tpu.memory_space<vmem>>, vector<2x48xf32>
      %cst_311 = arith.constant dense<0.000000e+00> : vector<2x48xf32>
      %430 = tpu.matmul %427, %295, %cst_311 {dimension_numbers = #tpu.dot_dimension_numbers<[1], [0], [0], [1], [0, 0, 1, 1], [], []>} : vector<2x12xf32>, vector<12x48xf32>, vector<2x48xf32> -> vector<2x48xf32>
      %431 = arith.addf %429, %430 : vector<2x48xf32>
      %432 = vector.extract_strided_slice %431 {offsets = [0, 0], sizes = [2, 36], strides = [1, 1]} : vector<2x48xf32> to vector<2x36xf32>
      %433 = arith.negf %432 : vector<2x36xf32>
      %434 = math.exp %433 : vector<2x36xf32>
      %cst_312 = arith.constant 1.000000e+00 : f32
      %435 = vector.broadcast %cst_312 : f32 to vector<2x36xf32>
      %436 = arith.addf %435, %434 : vector<2x36xf32>
      %437 = arith.divf %435, %436 : vector<2x36xf32>
      %438 = vector.extract_strided_slice %431 {offsets = [0, 36], sizes = [2, 12], strides = [1, 1]} : vector<2x48xf32> to vector<2x12xf32>
      %439 = math.tanh %438 : vector<2x12xf32>
      %440 = vector.extract_strided_slice %437 {offsets = [0, 12], sizes = [2, 12], strides = [1, 1]} : vector<2x36xf32> to vector<2x12xf32>
      %441 = arith.mulf %440, %424 : vector<2x12xf32>
      %442 = vector.extract_strided_slice %437 {offsets = [0, 0], sizes = [2, 12], strides = [1, 1]} : vector<2x36xf32> to vector<2x12xf32>
      %443 = arith.mulf %442, %439 : vector<2x12xf32>
      %444 = arith.addf %441, %443 : vector<2x12xf32>
      %445 = vector.extract_strided_slice %437 {offsets = [0, 24], sizes = [2, 12], strides = [1, 1]} : vector<2x36xf32> to vector<2x12xf32>
      %446 = math.tanh %444 : vector<2x12xf32>
      %447 = arith.mulf %445, %446 : vector<2x12xf32>
      %c12_313 = arith.constant 12 : index
      %c0_314 = arith.constant 0 : index
      %448 = vector.load %arg23[%c12_313, %c0_314] : memref<16x12xf32, #tpu.memory_space<vmem>>, vector<2x12xf32>
      tpu.vector_store %arg23[%c12_313, %c0_314], %447 {strides = array<i32>} : memref<16x12xf32, #tpu.memory_space<vmem>>, vector<2x12xf32>,
      %c14 = arith.constant 14 : index
      %c0_315 = arith.constant 0 : index
      %449 = vector.load %arg24[%c14, %c0_315] : memref<16x48xf32, #tpu.memory_space<vmem>>, vector<2x48xf32>
      %cst_316 = arith.constant dense<0.000000e+00> : vector<2x48xf32>
      %450 = tpu.matmul %447, %295, %cst_316 {dimension_numbers = #tpu.dot_dimension_numbers<[1], [0], [0], [1], [0, 0, 1, 1], [], []>} : vector<2x12xf32>, vector<12x48xf32>, vector<2x48xf32> -> vector<2x48xf32>
      %451 = arith.addf %449, %450 : vector<2x48xf32>
      %452 = vector.extract_strided_slice %451 {offsets = [0, 0], sizes = [2, 36], strides = [1, 1]} : vector<2x48xf32> to vector<2x36xf32>
      %453 = arith.negf %452 : vector<2x36xf32>
      %454 = math.exp %453 : vector<2x36xf32>
      %cst_317 = arith.constant 1.000000e+00 : f32
      %455 = vector.broadcast %cst_317 : f32 to vector<2x36xf32>
      %456 = arith.addf %455, %454 : vector<2x36xf32>
      %457 = arith.divf %455, %456 : vector<2x36xf32>
      %458 = vector.extract_strided_slice %451 {offsets = [0, 36], sizes = [2, 12], strides = [1, 1]} : vector<2x48xf32> to vector<2x12xf32>
      %459 = math.tanh %458 : vector<2x12xf32>
      %460 = vector.extract_strided_slice %457 {offsets = [0, 12], sizes = [2, 12], strides = [1, 1]} : vector<2x36xf32> to vector<2x12xf32>
      %461 = arith.mulf %460, %444 : vector<2x12xf32>
      %462 = vector.extract_strided_slice %457 {offsets = [0, 0], sizes = [2, 12], strides = [1, 1]} : vector<2x36xf32> to vector<2x12xf32>
      %463 = arith.mulf %462, %459 : vector<2x12xf32>
      %464 = arith.addf %461, %463 : vector<2x12xf32>
      %465 = vector.extract_strided_slice %457 {offsets = [0, 24], sizes = [2, 12], strides = [1, 1]} : vector<2x36xf32> to vector<2x12xf32>
      %466 = math.tanh %464 : vector<2x12xf32>
      %467 = arith.mulf %465, %466 : vector<2x12xf32>
      %c14_318 = arith.constant 14 : index
      %c0_319 = arith.constant 0 : index
      %468 = vector.load %arg23[%c14_318, %c0_319] : memref<16x12xf32, #tpu.memory_space<vmem>>, vector<2x12xf32>
      tpu.vector_store %arg23[%c14_318, %c0_319], %467 {strides = array<i32>} : memref<16x12xf32, #tpu.memory_space<vmem>>, vector<2x12xf32>,
      %469 = vector.extract_strided_slice %467 {offsets = [0, 0], sizes = [1, 12], strides = [1, 1]} : vector<2x12xf32> to vector<1x12xf32>
      %c0_i32_320 = arith.constant 0 : i32
      %470 = arith.addi %c0_i32_320, %arg30 : i32
      %471 = arith.index_cast %470 : i32 to index
      %c0_321 = arith.constant 0 : index
      %472 = vector.load %arg25[%471, %c0_321] : memref<240x12xf32, #tpu.memory_space<vmem>>, vector<1x12xf32>
      tpu.vector_store %arg25[%471, %c0_321], %469 {strides = array<i32>} : memref<240x12xf32, #tpu.memory_space<vmem>>, vector<1x12xf32>,
      %473 = vector.extract_strided_slice %467 {offsets = [1, 0], sizes = [1, 12], strides = [1, 1]} : vector<2x12xf32> to vector<1x12xf32>
      %c120_i32_322 = arith.constant 120 : i32
      %474 = arith.addi %c120_i32_322, %arg30 : i32
      %475 = arith.index_cast %474 : i32 to index
      %c0_323 = arith.constant 0 : index
      %476 = vector.load %arg25[%475, %c0_323] : memref<240x12xf32, #tpu.memory_space<vmem>>, vector<1x12xf32>
      tpu.vector_store %arg25[%475, %c0_323], %473 {strides = array<i32>} : memref<240x12xf32, #tpu.memory_space<vmem>>, vector<1x12xf32>,
    }
    %c120_i32_14 = arith.constant 120 : i32
    %cst_15 = arith.constant 0.000000e+00 : f32
    %17 = vector.broadcast %cst_15 : f32 to vector<2x128x6xf32>
    %c0_16 = arith.constant 0 : index
    %c0_17 = arith.constant 0 : index
    %c0_18 = arith.constant 0 : index
    %18 = vector.load %arg26[%c0_16, %c0_17, %c0_18] : memref<2x128x6xf32, #tpu.memory_space<vmem>>, vector<2x128x6xf32>
    tpu.vector_store %arg26[%c0_16, %c0_17, %c0_18], %17 {strides = array<i32>} : memref<2x128x6xf32, #tpu.memory_space<vmem>>, vector<2x128x6xf32>,
    %c0_19 = arith.constant 0 : index
    %c0_20 = arith.constant 0 : index
    %19 = vector.load %arg25[%c0_19, %c0_20] : memref<240x12xf32, #tpu.memory_space<vmem>>, vector<120x12xf32>
    %c0_21 = arith.constant 0 : index
    %c0_22 = arith.constant 0 : index
    %20 = vector.load %arg8[%c0_21, %c0_22] : memref<12x12xf32, #tpu.memory_space<vmem>>, vector<12x12xf32>
    %cst_23 = arith.constant dense<0.000000e+00> : vector<120x12xf32>
    %21 = tpu.matmul %19, %20, %cst_23 {dimension_numbers = #tpu.dot_dimension_numbers<[1], [0], [0], [1], [0, 0, 1, 1], [], []>} : vector<120x12xf32>, vector<12x12xf32>, vector<120x12xf32> -> vector<120x12xf32>
    %c0_24 = arith.constant 0 : index
    %c0_25 = arith.constant 0 : index
    %22 = vector.load %arg9[%c0_24, %c0_25] : memref<1x12xf32, #tpu.memory_space<vmem>>, vector<1x12xf32>
    %23 = vector.broadcast %22 : vector<1x12xf32> to vector<120x12xf32>
    %24 = arith.addf %21, %23 : vector<120x12xf32>
    %cst_26 = arith.constant 0.000000e+00 : f32
    %25 = vector.broadcast %cst_26 : f32 to vector<120x12xf32>
    %26 = arith.maximumf %24, %25 : vector<120x12xf32>
    %c0_27 = arith.constant 0 : index
    %c0_28 = arith.constant 0 : index
    %27 = vector.load %arg10[%c0_27, %c0_28] : memref<12x6xf32, #tpu.memory_space<vmem>>, vector<12x6xf32>
    %cst_29 = arith.constant dense<0.000000e+00> : vector<120x6xf32>
    %28 = tpu.matmul %26, %27, %cst_29 {dimension_numbers = #tpu.dot_dimension_numbers<[1], [0], [0], [1], [0, 0, 1, 1], [], []>} : vector<120x12xf32>, vector<12x6xf32>, vector<120x6xf32> -> vector<120x6xf32>
    %c0_30 = arith.constant 0 : index
    %c0_31 = arith.constant 0 : index
    %29 = vector.load %arg11[%c0_30, %c0_31] : memref<1x6xf32, #tpu.memory_space<vmem>>, vector<1x6xf32>
    %30 = vector.broadcast %29 : vector<1x6xf32> to vector<120x6xf32>
    %31 = arith.addf %28, %30 : vector<120x6xf32>
    %cst_32 = arith.constant 0.000000e+00 : f32
    %32 = vector.broadcast %cst_32 : f32 to vector<120x6xf32>
    %33 = arith.maximumf %31, %32 : vector<120x6xf32>
    %c0_33 = arith.constant 0 : index
    %c4 = arith.constant 4 : index
    %c0_34 = arith.constant 0 : index
    %34 = vector.load %arg26[%c0_33, %c4, %c0_34] : memref<2x128x6xf32, #tpu.memory_space<vmem>>, vector<1x120x6xf32>
    %35 = vector.shape_cast %34 : vector<1x120x6xf32> to vector<120x6xf32>
    %36 = vector.shape_cast %33 : vector<120x6xf32> to vector<1x120x6xf32>
    tpu.vector_store %arg26[%c0_33, %c4, %c0_34], %36 {strides = array<i32>} : memref<2x128x6xf32, #tpu.memory_space<vmem>>, vector<1x120x6xf32>,
    %c120 = arith.constant 120 : index
    %c0_35 = arith.constant 0 : index
    %37 = vector.load %arg25[%c120, %c0_35] : memref<240x12xf32, #tpu.memory_space<vmem>>, vector<120x12xf32>
    %c0_36 = arith.constant 0 : index
    %c0_37 = arith.constant 0 : index
    %38 = vector.load %arg8[%c0_36, %c0_37] : memref<12x12xf32, #tpu.memory_space<vmem>>, vector<12x12xf32>
    %cst_38 = arith.constant dense<0.000000e+00> : vector<120x12xf32>
    %39 = tpu.matmul %37, %38, %cst_38 {dimension_numbers = #tpu.dot_dimension_numbers<[1], [0], [0], [1], [0, 0, 1, 1], [], []>} : vector<120x12xf32>, vector<12x12xf32>, vector<120x12xf32> -> vector<120x12xf32>
    %c0_39 = arith.constant 0 : index
    %c0_40 = arith.constant 0 : index
    %40 = vector.load %arg9[%c0_39, %c0_40] : memref<1x12xf32, #tpu.memory_space<vmem>>, vector<1x12xf32>
    %41 = vector.broadcast %40 : vector<1x12xf32> to vector<120x12xf32>
    %42 = arith.addf %39, %41 : vector<120x12xf32>
    %cst_41 = arith.constant 0.000000e+00 : f32
    %43 = vector.broadcast %cst_41 : f32 to vector<120x12xf32>
    %44 = arith.maximumf %42, %43 : vector<120x12xf32>
    %c0_42 = arith.constant 0 : index
    %c0_43 = arith.constant 0 : index
    %45 = vector.load %arg10[%c0_42, %c0_43] : memref<12x6xf32, #tpu.memory_space<vmem>>, vector<12x6xf32>
    %cst_44 = arith.constant dense<0.000000e+00> : vector<120x6xf32>
    %46 = tpu.matmul %44, %45, %cst_44 {dimension_numbers = #tpu.dot_dimension_numbers<[1], [0], [0], [1], [0, 0, 1, 1], [], []>} : vector<120x12xf32>, vector<12x6xf32>, vector<120x6xf32> -> vector<120x6xf32>
    %c0_45 = arith.constant 0 : index
    %c0_46 = arith.constant 0 : index
    %47 = vector.load %arg11[%c0_45, %c0_46] : memref<1x6xf32, #tpu.memory_space<vmem>>, vector<1x6xf32>
    %48 = vector.broadcast %47 : vector<1x6xf32> to vector<120x6xf32>
    %49 = arith.addf %46, %48 : vector<120x6xf32>
    %cst_47 = arith.constant 0.000000e+00 : f32
    %50 = vector.broadcast %cst_47 : f32 to vector<120x6xf32>
    %51 = arith.maximumf %49, %50 : vector<120x6xf32>
    %c1 = arith.constant 1 : index
    %c4_48 = arith.constant 4 : index
    %c0_49 = arith.constant 0 : index
    %52 = vector.load %arg26[%c1, %c4_48, %c0_49] : memref<2x128x6xf32, #tpu.memory_space<vmem>>, vector<1x120x6xf32>
    %53 = vector.shape_cast %52 : vector<1x120x6xf32> to vector<120x6xf32>
    %54 = vector.shape_cast %51 : vector<120x6xf32> to vector<1x120x6xf32>
    tpu.vector_store %arg26[%c1, %c4_48, %c0_49], %54 {strides = array<i32>} : memref<2x128x6xf32, #tpu.memory_space<vmem>>, vector<1x120x6xf32>,
    %cst_50 = arith.constant 0.000000e+00 : f32
    %55 = vector.broadcast %cst_50 : f32 to vector<124x6xf32>
    %c0_51 = arith.constant 0 : index
    %c4_52 = arith.constant 4 : index
    %c0_53 = arith.constant 0 : index
    %56 = vector.load %arg26[%c0_51, %c4_52, %c0_53] : memref<2x128x6xf32, #tpu.memory_space<vmem>>, vector<1x124x6xf32>
    %57 = vector.shape_cast %56 : vector<1x124x6xf32> to vector<124x6xf32>
    %c0_54 = arith.constant 0 : index
    %c0_55 = arith.constant 0 : index
    %c0_56 = arith.constant 0 : index
    %58 = vector.load %arg12[%c0_54, %c0_55, %c0_56] : memref<5x6x6xf32, #tpu.memory_space<vmem>>, vector<1x6x6xf32>
    %59 = vector.shape_cast %58 : vector<1x6x6xf32> to vector<6x6xf32>
    %cst_57 = arith.constant dense<0.000000e+00> : vector<124x6xf32>
    %60 = tpu.matmul %57, %59, %cst_57 {dimension_numbers = #tpu.dot_dimension_numbers<[1], [0], [0], [1], [0, 0, 1, 1], [], []>} : vector<124x6xf32>, vector<6x6xf32>, vector<124x6xf32> -> vector<124x6xf32>
    %61 = arith.addf %55, %60 : vector<124x6xf32>
    %c0_58 = arith.constant 0 : index
    %c3 = arith.constant 3 : index
    %c0_59 = arith.constant 0 : index
    %62 = vector.load %arg26[%c0_58, %c3, %c0_59] : memref<2x128x6xf32, #tpu.memory_space<vmem>>, vector<1x124x6xf32>
    %63 = vector.shape_cast %62 : vector<1x124x6xf32> to vector<124x6xf32>
    %c1_60 = arith.constant 1 : index
    %c0_61 = arith.constant 0 : index
    %c0_62 = arith.constant 0 : index
    %64 = vector.load %arg12[%c1_60, %c0_61, %c0_62] : memref<5x6x6xf32, #tpu.memory_space<vmem>>, vector<1x6x6xf32>
    %65 = vector.shape_cast %64 : vector<1x6x6xf32> to vector<6x6xf32>
    %cst_63 = arith.constant dense<0.000000e+00> : vector<124x6xf32>
    %66 = tpu.matmul %63, %65, %cst_63 {dimension_numbers = #tpu.dot_dimension_numbers<[1], [0], [0], [1], [0, 0, 1, 1], [], []>} : vector<124x6xf32>, vector<6x6xf32>, vector<124x6xf32> -> vector<124x6xf32>
    %67 = arith.addf %61, %66 : vector<124x6xf32>
    %c0_64 = arith.constant 0 : index
    %c2 = arith.constant 2 : index
    %c0_65 = arith.constant 0 : index
    %68 = vector.load %arg26[%c0_64, %c2, %c0_65] : memref<2x128x6xf32, #tpu.memory_space<vmem>>, vector<1x124x6xf32>
    %69 = vector.shape_cast %68 : vector<1x124x6xf32> to vector<124x6xf32>
    %c2_66 = arith.constant 2 : index
    %c0_67 = arith.constant 0 : index
    %c0_68 = arith.constant 0 : index
    %70 = vector.load %arg12[%c2_66, %c0_67, %c0_68] : memref<5x6x6xf32, #tpu.memory_space<vmem>>, vector<1x6x6xf32>
    %71 = vector.shape_cast %70 : vector<1x6x6xf32> to vector<6x6xf32>
    %cst_69 = arith.constant dense<0.000000e+00> : vector<124x6xf32>
    %72 = tpu.matmul %69, %71, %cst_69 {dimension_numbers = #tpu.dot_dimension_numbers<[1], [0], [0], [1], [0, 0, 1, 1], [], []>} : vector<124x6xf32>, vector<6x6xf32>, vector<124x6xf32> -> vector<124x6xf32>
    %73 = arith.addf %67, %72 : vector<124x6xf32>
    %c0_70 = arith.constant 0 : index
    %c1_71 = arith.constant 1 : index
    %c0_72 = arith.constant 0 : index
    %74 = vector.load %arg26[%c0_70, %c1_71, %c0_72] : memref<2x128x6xf32, #tpu.memory_space<vmem>>, vector<1x124x6xf32>
    %75 = vector.shape_cast %74 : vector<1x124x6xf32> to vector<124x6xf32>
    %c3_73 = arith.constant 3 : index
    %c0_74 = arith.constant 0 : index
    %c0_75 = arith.constant 0 : index
    %76 = vector.load %arg12[%c3_73, %c0_74, %c0_75] : memref<5x6x6xf32, #tpu.memory_space<vmem>>, vector<1x6x6xf32>
    %77 = vector.shape_cast %76 : vector<1x6x6xf32> to vector<6x6xf32>
    %cst_76 = arith.constant dense<0.000000e+00> : vector<124x6xf32>
    %78 = tpu.matmul %75, %77, %cst_76 {dimension_numbers = #tpu.dot_dimension_numbers<[1], [0], [0], [1], [0, 0, 1, 1], [], []>} : vector<124x6xf32>, vector<6x6xf32>, vector<124x6xf32> -> vector<124x6xf32>
    %79 = arith.addf %73, %78 : vector<124x6xf32>
    %c0_77 = arith.constant 0 : index
    %c0_78 = arith.constant 0 : index
    %c0_79 = arith.constant 0 : index
    %80 = vector.load %arg26[%c0_77, %c0_78, %c0_79] : memref<2x128x6xf32, #tpu.memory_space<vmem>>, vector<1x124x6xf32>
    %81 = vector.shape_cast %80 : vector<1x124x6xf32> to vector<124x6xf32>
    %c4_80 = arith.constant 4 : index
    %c0_81 = arith.constant 0 : index
    %c0_82 = arith.constant 0 : index
    %82 = vector.load %arg12[%c4_80, %c0_81, %c0_82] : memref<5x6x6xf32, #tpu.memory_space<vmem>>, vector<1x6x6xf32>
    %83 = vector.shape_cast %82 : vector<1x6x6xf32> to vector<6x6xf32>
    %cst_83 = arith.constant dense<0.000000e+00> : vector<124x6xf32>
    %84 = tpu.matmul %81, %83, %cst_83 {dimension_numbers = #tpu.dot_dimension_numbers<[1], [0], [0], [1], [0, 0, 1, 1], [], []>} : vector<124x6xf32>, vector<6x6xf32>, vector<124x6xf32> -> vector<124x6xf32>
    %85 = arith.addf %79, %84 : vector<124x6xf32>
    %c0_84 = arith.constant 0 : index
    %c0_85 = arith.constant 0 : index
    %86 = vector.load %arg13[%c0_84, %c0_85] : memref<1x6xf32, #tpu.memory_space<vmem>>, vector<1x6xf32>
    %87 = vector.broadcast %86 : vector<1x6xf32> to vector<124x6xf32>
    %88 = arith.addf %85, %87 : vector<124x6xf32>
    %c0_86 = arith.constant 0 : index
    %c0_87 = arith.constant 0 : index
    %c0_88 = arith.constant 0 : index
    %89 = vector.load %arg27[%c0_86, %c0_87, %c0_88] : memref<2x124x6xf32, #tpu.memory_space<vmem>>, vector<1x124x6xf32>
    %90 = vector.shape_cast %89 : vector<1x124x6xf32> to vector<124x6xf32>
    %91 = vector.shape_cast %88 : vector<124x6xf32> to vector<1x124x6xf32>
    tpu.vector_store %arg27[%c0_86, %c0_87, %c0_88], %91 {strides = array<i32>} : memref<2x124x6xf32, #tpu.memory_space<vmem>>, vector<1x124x6xf32>,
    %cst_89 = arith.constant 0.000000e+00 : f32
    %92 = vector.broadcast %cst_89 : f32 to vector<124x6xf32>
    %c1_90 = arith.constant 1 : index
    %c4_91 = arith.constant 4 : index
    %c0_92 = arith.constant 0 : index
    %93 = vector.load %arg26[%c1_90, %c4_91, %c0_92] : memref<2x128x6xf32, #tpu.memory_space<vmem>>, vector<1x124x6xf32>
    %94 = vector.shape_cast %93 : vector<1x124x6xf32> to vector<124x6xf32>
    %c0_93 = arith.constant 0 : index
    %c0_94 = arith.constant 0 : index
    %c0_95 = arith.constant 0 : index
    %95 = vector.load %arg12[%c0_93, %c0_94, %c0_95] : memref<5x6x6xf32, #tpu.memory_space<vmem>>, vector<1x6x6xf32>
    %96 = vector.shape_cast %95 : vector<1x6x6xf32> to vector<6x6xf32>
    %cst_96 = arith.constant dense<0.000000e+00> : vector<124x6xf32>
    %97 = tpu.matmul %94, %96, %cst_96 {dimension_numbers = #tpu.dot_dimension_numbers<[1], [0], [0], [1], [0, 0, 1, 1], [], []>} : vector<124x6xf32>, vector<6x6xf32>, vector<124x6xf32> -> vector<124x6xf32>
    %98 = arith.addf %92, %97 : vector<124x6xf32>
    %c1_97 = arith.constant 1 : index
    %c3_98 = arith.constant 3 : index
    %c0_99 = arith.constant 0 : index
    %99 = vector.load %arg26[%c1_97, %c3_98, %c0_99] : memref<2x128x6xf32, #tpu.memory_space<vmem>>, vector<1x124x6xf32>
    %100 = vector.shape_cast %99 : vector<1x124x6xf32> to vector<124x6xf32>
    %c1_100 = arith.constant 1 : index
    %c0_101 = arith.constant 0 : index
    %c0_102 = arith.constant 0 : index
    %101 = vector.load %arg12[%c1_100, %c0_101, %c0_102] : memref<5x6x6xf32, #tpu.memory_space<vmem>>, vector<1x6x6xf32>
    %102 = vector.shape_cast %101 : vector<1x6x6xf32> to vector<6x6xf32>
    %cst_103 = arith.constant dense<0.000000e+00> : vector<124x6xf32>
    %103 = tpu.matmul %100, %102, %cst_103 {dimension_numbers = #tpu.dot_dimension_numbers<[1], [0], [0], [1], [0, 0, 1, 1], [], []>} : vector<124x6xf32>, vector<6x6xf32>, vector<124x6xf32> -> vector<124x6xf32>
    %104 = arith.addf %98, %103 : vector<124x6xf32>
    %c1_104 = arith.constant 1 : index
    %c2_105 = arith.constant 2 : index
    %c0_106 = arith.constant 0 : index
    %105 = vector.load %arg26[%c1_104, %c2_105, %c0_106] : memref<2x128x6xf32, #tpu.memory_space<vmem>>, vector<1x124x6xf32>
    %106 = vector.shape_cast %105 : vector<1x124x6xf32> to vector<124x6xf32>
    %c2_107 = arith.constant 2 : index
    %c0_108 = arith.constant 0 : index
    %c0_109 = arith.constant 0 : index
    %107 = vector.load %arg12[%c2_107, %c0_108, %c0_109] : memref<5x6x6xf32, #tpu.memory_space<vmem>>, vector<1x6x6xf32>
    %108 = vector.shape_cast %107 : vector<1x6x6xf32> to vector<6x6xf32>
    %cst_110 = arith.constant dense<0.000000e+00> : vector<124x6xf32>
    %109 = tpu.matmul %106, %108, %cst_110 {dimension_numbers = #tpu.dot_dimension_numbers<[1], [0], [0], [1], [0, 0, 1, 1], [], []>} : vector<124x6xf32>, vector<6x6xf32>, vector<124x6xf32> -> vector<124x6xf32>
    %110 = arith.addf %104, %109 : vector<124x6xf32>
    %c1_111 = arith.constant 1 : index
    %c1_112 = arith.constant 1 : index
    %c0_113 = arith.constant 0 : index
    %111 = vector.load %arg26[%c1_111, %c1_112, %c0_113] : memref<2x128x6xf32, #tpu.memory_space<vmem>>, vector<1x124x6xf32>
    %112 = vector.shape_cast %111 : vector<1x124x6xf32> to vector<124x6xf32>
    %c3_114 = arith.constant 3 : index
    %c0_115 = arith.constant 0 : index
    %c0_116 = arith.constant 0 : index
    %113 = vector.load %arg12[%c3_114, %c0_115, %c0_116] : memref<5x6x6xf32, #tpu.memory_space<vmem>>, vector<1x6x6xf32>
    %114 = vector.shape_cast %113 : vector<1x6x6xf32> to vector<6x6xf32>
    %cst_117 = arith.constant dense<0.000000e+00> : vector<124x6xf32>
    %115 = tpu.matmul %112, %114, %cst_117 {dimension_numbers = #tpu.dot_dimension_numbers<[1], [0], [0], [1], [0, 0, 1, 1], [], []>} : vector<124x6xf32>, vector<6x6xf32>, vector<124x6xf32> -> vector<124x6xf32>
    %116 = arith.addf %110, %115 : vector<124x6xf32>
    %c1_118 = arith.constant 1 : index
    %c0_119 = arith.constant 0 : index
    %c0_120 = arith.constant 0 : index
    %117 = vector.load %arg26[%c1_118, %c0_119, %c0_120] : memref<2x128x6xf32, #tpu.memory_space<vmem>>, vector<1x124x6xf32>
    %118 = vector.shape_cast %117 : vector<1x124x6xf32> to vector<124x6xf32>
    %c4_121 = arith.constant 4 : index
    %c0_122 = arith.constant 0 : index
    %c0_123 = arith.constant 0 : index
    %119 = vector.load %arg12[%c4_121, %c0_122, %c0_123] : memref<5x6x6xf32, #tpu.memory_space<vmem>>, vector<1x6x6xf32>
    %120 = vector.shape_cast %119 : vector<1x6x6xf32> to vector<6x6xf32>
    %cst_124 = arith.constant dense<0.000000e+00> : vector<124x6xf32>
    %121 = tpu.matmul %118, %120, %cst_124 {dimension_numbers = #tpu.dot_dimension_numbers<[1], [0], [0], [1], [0, 0, 1, 1], [], []>} : vector<124x6xf32>, vector<6x6xf32>, vector<124x6xf32> -> vector<124x6xf32>
    %122 = arith.addf %116, %121 : vector<124x6xf32>
    %c0_125 = arith.constant 0 : index
    %c0_126 = arith.constant 0 : index
    %123 = vector.load %arg13[%c0_125, %c0_126] : memref<1x6xf32, #tpu.memory_space<vmem>>, vector<1x6xf32>
    %124 = vector.broadcast %123 : vector<1x6xf32> to vector<124x6xf32>
    %125 = arith.addf %122, %124 : vector<124x6xf32>
    %c1_127 = arith.constant 1 : index
    %c0_128 = arith.constant 0 : index
    %c0_129 = arith.constant 0 : index
    %126 = vector.load %arg27[%c1_127, %c0_128, %c0_129] : memref<2x124x6xf32, #tpu.memory_space<vmem>>, vector<1x124x6xf32>
    %127 = vector.shape_cast %126 : vector<1x124x6xf32> to vector<124x6xf32>
    %128 = vector.shape_cast %125 : vector<124x6xf32> to vector<1x124x6xf32>
    tpu.vector_store %arg27[%c1_127, %c0_128, %c0_129], %128 {strides = array<i32>} : memref<2x124x6xf32, #tpu.memory_space<vmem>>, vector<1x124x6xf32>,
    %c0_130 = arith.constant 0 : index
    %c0_131 = arith.constant 0 : index
    %c0_132 = arith.constant 0 : index
    %129 = vector.load %arg27[%c0_130, %c0_131, %c0_132] : memref<2x124x6xf32, #tpu.memory_space<vmem>>, vector<2x124x6xf32>
    %cst_133 = arith.constant dense<0.000000e+00> : vector<6xf32>
    %130 = vector.multi_reduction <add>, %129, %cst_133 [0, 1] : vector<2x124x6xf32> to vector<6xf32>
    %131 = vector.shape_cast %130 : vector<6xf32> to vector<1x1x6xf32>
    %cst_134 = arith.constant 2.480000e+02 : f32
    %132 = vector.broadcast %cst_134 : f32 to vector<1x1x6xf32>
    %133 = arith.divf %131, %132 : vector<1x1x6xf32>
    %134 = vector.broadcast %133 : vector<1x1x6xf32> to vector<2x124x6xf32>
    %135 = arith.subf %129, %134 : vector<2x124x6xf32>
    %136 = arith.mulf %135, %135 : vector<2x124x6xf32>
    %cst_135 = arith.constant dense<0.000000e+00> : vector<6xf32>
    %137 = vector.multi_reduction <add>, %136, %cst_135 [0, 1] : vector<2x124x6xf32> to vector<6xf32>
    %138 = vector.shape_cast %137 : vector<6xf32> to vector<1x1x6xf32>
    %cst_136 = arith.constant 2.480000e+02 : f32
    %139 = vector.broadcast %cst_136 : f32 to vector<1x1x6xf32>
    %140 = arith.divf %138, %139 : vector<1x1x6xf32>
    %141 = vector.broadcast %133 : vector<1x1x6xf32> to vector<2x124x6xf32>
    %142 = arith.subf %129, %141 : vector<2x124x6xf32>
    %cst_137 = arith.constant 9.99999974E-6 : f32
    %143 = vector.broadcast %cst_137 : f32 to vector<1x1x6xf32>
    %144 = arith.addf %140, %143 : vector<1x1x6xf32>
    %145 = math.rsqrt %144 : vector<1x1x6xf32>
    %146 = vector.broadcast %145 : vector<1x1x6xf32> to vector<2x124x6xf32>
    %147 = arith.mulf %142, %146 : vector<2x124x6xf32>
    %c0_138 = arith.constant 0 : index
    %c0_139 = arith.constant 0 : index
    %148 = vector.load %arg14[%c0_138, %c0_139] : memref<1x6xf32, #tpu.memory_space<vmem>>, vector<1x6xf32>
    %149 = vector.shape_cast %148 : vector<1x6xf32> to vector<1x1x6xf32>
    %150 = vector.broadcast %149 : vector<1x1x6xf32> to vector<2x124x6xf32>
    %151 = arith.mulf %147, %150 : vector<2x124x6xf32>
    %c0_140 = arith.constant 0 : index
    %c0_141 = arith.constant 0 : index
    %152 = vector.load %arg15[%c0_140, %c0_141] : memref<1x6xf32, #tpu.memory_space<vmem>>, vector<1x6xf32>
    %153 = vector.shape_cast %152 : vector<1x6xf32> to vector<1x1x6xf32>
    %154 = vector.broadcast %153 : vector<1x1x6xf32> to vector<2x124x6xf32>
    %155 = arith.addf %151, %154 : vector<2x124x6xf32>
    %cst_142 = arith.constant 0.000000e+00 : f32
    %156 = vector.broadcast %cst_142 : f32 to vector<2x124x6xf32>
    %157 = arith.maximumf %155, %156 : vector<2x124x6xf32>
    %cst_143 = arith.constant 0.000000e+00 : f32
    %158 = vector.broadcast %cst_143 : f32 to vector<2x132x6xf32>
    %c0_144 = arith.constant 0 : index
    %c0_145 = arith.constant 0 : index
    %c0_146 = arith.constant 0 : index
    %159 = vector.load %arg28[%c0_144, %c0_145, %c0_146] : memref<2x132x6xf32, #tpu.memory_space<vmem>>, vector<2x132x6xf32>
    tpu.vector_store %arg28[%c0_144, %c0_145, %c0_146], %158 {strides = array<i32>} : memref<2x132x6xf32, #tpu.memory_space<vmem>>, vector<2x132x6xf32>,
    %160 = vector.extract_strided_slice %157 {offsets = [0, 0, 0], sizes = [1, 124, 6], strides = [1, 1, 1]} : vector<2x124x6xf32> to vector<1x124x6xf32>
    %161 = vector.shape_cast %160 : vector<1x124x6xf32> to vector<124x6xf32>
    %c0_147 = arith.constant 0 : index
    %c4_148 = arith.constant 4 : index
    %c0_149 = arith.constant 0 : index
    %162 = vector.load %arg28[%c0_147, %c4_148, %c0_149] : memref<2x132x6xf32, #tpu.memory_space<vmem>>, vector<1x124x6xf32>
    %163 = vector.shape_cast %162 : vector<1x124x6xf32> to vector<124x6xf32>
    %164 = vector.shape_cast %161 : vector<124x6xf32> to vector<1x124x6xf32>
    tpu.vector_store %arg28[%c0_147, %c4_148, %c0_149], %164 {strides = array<i32>} : memref<2x132x6xf32, #tpu.memory_space<vmem>>, vector<1x124x6xf32>,
    %165 = vector.extract_strided_slice %157 {offsets = [1, 0, 0], sizes = [1, 124, 6], strides = [1, 1, 1]} : vector<2x124x6xf32> to vector<1x124x6xf32>
    %166 = vector.shape_cast %165 : vector<1x124x6xf32> to vector<124x6xf32>
    %c1_150 = arith.constant 1 : index
    %c4_151 = arith.constant 4 : index
    %c0_152 = arith.constant 0 : index
    %167 = vector.load %arg28[%c1_150, %c4_151, %c0_152] : memref<2x132x6xf32, #tpu.memory_space<vmem>>, vector<1x124x6xf32>
    %168 = vector.shape_cast %167 : vector<1x124x6xf32> to vector<124x6xf32>
    %169 = vector.shape_cast %166 : vector<124x6xf32> to vector<1x124x6xf32>
    tpu.vector_store %arg28[%c1_150, %c4_151, %c0_152], %169 {strides = array<i32>} : memref<2x132x6xf32, #tpu.memory_space<vmem>>, vector<1x124x6xf32>,
    %cst_153 = arith.constant 0.000000e+00 : f32
    %170 = vector.broadcast %cst_153 : f32 to vector<128x6xf32>
    %c0_154 = arith.constant 0 : index
    %c4_155 = arith.constant 4 : index
    %c0_156 = arith.constant 0 : index
    %171 = vector.load %arg28[%c0_154, %c4_155, %c0_156] : memref<2x132x6xf32, #tpu.memory_space<vmem>>, vector<1x128x6xf32>
    %172 = vector.shape_cast %171 : vector<1x128x6xf32> to vector<128x6xf32>
    %c0_157 = arith.constant 0 : index
    %c0_158 = arith.constant 0 : index
    %c0_159 = arith.constant 0 : index
    %173 = vector.load %arg16[%c0_157, %c0_158, %c0_159] : memref<5x6x6xf32, #tpu.memory_space<vmem>>, vector<1x6x6xf32>
    %174 = vector.shape_cast %173 : vector<1x6x6xf32> to vector<6x6xf32>
    %cst_160 = arith.constant dense<0.000000e+00> : vector<128x6xf32>
    %175 = tpu.matmul %172, %174, %cst_160 {dimension_numbers = #tpu.dot_dimension_numbers<[1], [0], [0], [1], [0, 0, 1, 1], [], []>} : vector<128x6xf32>, vector<6x6xf32>, vector<128x6xf32> -> vector<128x6xf32>
    %176 = arith.addf %170, %175 : vector<128x6xf32>
    %c0_161 = arith.constant 0 : index
    %c3_162 = arith.constant 3 : index
    %c0_163 = arith.constant 0 : index
    %177 = vector.load %arg28[%c0_161, %c3_162, %c0_163] : memref<2x132x6xf32, #tpu.memory_space<vmem>>, vector<1x128x6xf32>
    %178 = vector.shape_cast %177 : vector<1x128x6xf32> to vector<128x6xf32>
    %c1_164 = arith.constant 1 : index
    %c0_165 = arith.constant 0 : index
    %c0_166 = arith.constant 0 : index
    %179 = vector.load %arg16[%c1_164, %c0_165, %c0_166] : memref<5x6x6xf32, #tpu.memory_space<vmem>>, vector<1x6x6xf32>
    %180 = vector.shape_cast %179 : vector<1x6x6xf32> to vector<6x6xf32>
    %cst_167 = arith.constant dense<0.000000e+00> : vector<128x6xf32>
    %181 = tpu.matmul %178, %180, %cst_167 {dimension_numbers = #tpu.dot_dimension_numbers<[1], [0], [0], [1], [0, 0, 1, 1], [], []>} : vector<128x6xf32>, vector<6x6xf32>, vector<128x6xf32> -> vector<128x6xf32>
    %182 = arith.addf %176, %181 : vector<128x6xf32>
    %c0_168 = arith.constant 0 : index
    %c2_169 = arith.constant 2 : index
    %c0_170 = arith.constant 0 : index
    %183 = vector.load %arg28[%c0_168, %c2_169, %c0_170] : memref<2x132x6xf32, #tpu.memory_space<vmem>>, vector<1x128x6xf32>
    %184 = vector.shape_cast %183 : vector<1x128x6xf32> to vector<128x6xf32>
    %c2_171 = arith.constant 2 : index
    %c0_172 = arith.constant 0 : index
    %c0_173 = arith.constant 0 : index
    %185 = vector.load %arg16[%c2_171, %c0_172, %c0_173] : memref<5x6x6xf32, #tpu.memory_space<vmem>>, vector<1x6x6xf32>
    %186 = vector.shape_cast %185 : vector<1x6x6xf32> to vector<6x6xf32>
    %cst_174 = arith.constant dense<0.000000e+00> : vector<128x6xf32>
    %187 = tpu.matmul %184, %186, %cst_174 {dimension_numbers = #tpu.dot_dimension_numbers<[1], [0], [0], [1], [0, 0, 1, 1], [], []>} : vector<128x6xf32>, vector<6x6xf32>, vector<128x6xf32> -> vector<128x6xf32>
    %188 = arith.addf %182, %187 : vector<128x6xf32>
    %c0_175 = arith.constant 0 : index
    %c1_176 = arith.constant 1 : index
    %c0_177 = arith.constant 0 : index
    %189 = vector.load %arg28[%c0_175, %c1_176, %c0_177] : memref<2x132x6xf32, #tpu.memory_space<vmem>>, vector<1x128x6xf32>
    %190 = vector.shape_cast %189 : vector<1x128x6xf32> to vector<128x6xf32>
    %c3_178 = arith.constant 3 : index
    %c0_179 = arith.constant 0 : index
    %c0_180 = arith.constant 0 : index
    %191 = vector.load %arg16[%c3_178, %c0_179, %c0_180] : memref<5x6x6xf32, #tpu.memory_space<vmem>>, vector<1x6x6xf32>
    %192 = vector.shape_cast %191 : vector<1x6x6xf32> to vector<6x6xf32>
    %cst_181 = arith.constant dense<0.000000e+00> : vector<128x6xf32>
    %193 = tpu.matmul %190, %192, %cst_181 {dimension_numbers = #tpu.dot_dimension_numbers<[1], [0], [0], [1], [0, 0, 1, 1], [], []>} : vector<128x6xf32>, vector<6x6xf32>, vector<128x6xf32> -> vector<128x6xf32>
    %194 = arith.addf %188, %193 : vector<128x6xf32>
    %c0_182 = arith.constant 0 : index
    %c0_183 = arith.constant 0 : index
    %c0_184 = arith.constant 0 : index
    %195 = vector.load %arg28[%c0_182, %c0_183, %c0_184] : memref<2x132x6xf32, #tpu.memory_space<vmem>>, vector<1x128x6xf32>
    %196 = vector.shape_cast %195 : vector<1x128x6xf32> to vector<128x6xf32>
    %c4_185 = arith.constant 4 : index
    %c0_186 = arith.constant 0 : index
    %c0_187 = arith.constant 0 : index
    %197 = vector.load %arg16[%c4_185, %c0_186, %c0_187] : memref<5x6x6xf32, #tpu.memory_space<vmem>>, vector<1x6x6xf32>
    %198 = vector.shape_cast %197 : vector<1x6x6xf32> to vector<6x6xf32>
    %cst_188 = arith.constant dense<0.000000e+00> : vector<128x6xf32>
    %199 = tpu.matmul %196, %198, %cst_188 {dimension_numbers = #tpu.dot_dimension_numbers<[1], [0], [0], [1], [0, 0, 1, 1], [], []>} : vector<128x6xf32>, vector<6x6xf32>, vector<128x6xf32> -> vector<128x6xf32>
    %200 = arith.addf %194, %199 : vector<128x6xf32>
    %c0_189 = arith.constant 0 : index
    %c0_190 = arith.constant 0 : index
    %201 = vector.load %arg17[%c0_189, %c0_190] : memref<1x6xf32, #tpu.memory_space<vmem>>, vector<1x6xf32>
    %202 = vector.broadcast %201 : vector<1x6xf32> to vector<128x6xf32>
    %203 = arith.addf %200, %202 : vector<128x6xf32>
    %c0_191 = arith.constant 0 : index
    %c0_192 = arith.constant 0 : index
    %c0_193 = arith.constant 0 : index
    %204 = vector.load %arg29[%c0_191, %c0_192, %c0_193] : memref<2x128x6xf32, #tpu.memory_space<vmem>>, vector<1x128x6xf32>
    %205 = vector.shape_cast %204 : vector<1x128x6xf32> to vector<128x6xf32>
    %206 = vector.shape_cast %203 : vector<128x6xf32> to vector<1x128x6xf32>
    tpu.vector_store %arg29[%c0_191, %c0_192, %c0_193], %206 {strides = array<i32>} : memref<2x128x6xf32, #tpu.memory_space<vmem>>, vector<1x128x6xf32>,
    %cst_194 = arith.constant 0.000000e+00 : f32
    %207 = vector.broadcast %cst_194 : f32 to vector<128x6xf32>
    %c1_195 = arith.constant 1 : index
    %c4_196 = arith.constant 4 : index
    %c0_197 = arith.constant 0 : index
    %208 = vector.load %arg28[%c1_195, %c4_196, %c0_197] : memref<2x132x6xf32, #tpu.memory_space<vmem>>, vector<1x128x6xf32>
    %209 = vector.shape_cast %208 : vector<1x128x6xf32> to vector<128x6xf32>
    %c0_198 = arith.constant 0 : index
    %c0_199 = arith.constant 0 : index
    %c0_200 = arith.constant 0 : index
    %210 = vector.load %arg16[%c0_198, %c0_199, %c0_200] : memref<5x6x6xf32, #tpu.memory_space<vmem>>, vector<1x6x6xf32>
    %211 = vector.shape_cast %210 : vector<1x6x6xf32> to vector<6x6xf32>
    %cst_201 = arith.constant dense<0.000000e+00> : vector<128x6xf32>
    %212 = tpu.matmul %209, %211, %cst_201 {dimension_numbers = #tpu.dot_dimension_numbers<[1], [0], [0], [1], [0, 0, 1, 1], [], []>} : vector<128x6xf32>, vector<6x6xf32>, vector<128x6xf32> -> vector<128x6xf32>
    %213 = arith.addf %207, %212 : vector<128x6xf32>
    %c1_202 = arith.constant 1 : index
    %c3_203 = arith.constant 3 : index
    %c0_204 = arith.constant 0 : index
    %214 = vector.load %arg28[%c1_202, %c3_203, %c0_204] : memref<2x132x6xf32, #tpu.memory_space<vmem>>, vector<1x128x6xf32>
    %215 = vector.shape_cast %214 : vector<1x128x6xf32> to vector<128x6xf32>
    %c1_205 = arith.constant 1 : index
    %c0_206 = arith.constant 0 : index
    %c0_207 = arith.constant 0 : index
    %216 = vector.load %arg16[%c1_205, %c0_206, %c0_207] : memref<5x6x6xf32, #tpu.memory_space<vmem>>, vector<1x6x6xf32>
    %217 = vector.shape_cast %216 : vector<1x6x6xf32> to vector<6x6xf32>
    %cst_208 = arith.constant dense<0.000000e+00> : vector<128x6xf32>
    %218 = tpu.matmul %215, %217, %cst_208 {dimension_numbers = #tpu.dot_dimension_numbers<[1], [0], [0], [1], [0, 0, 1, 1], [], []>} : vector<128x6xf32>, vector<6x6xf32>, vector<128x6xf32> -> vector<128x6xf32>
    %219 = arith.addf %213, %218 : vector<128x6xf32>
    %c1_209 = arith.constant 1 : index
    %c2_210 = arith.constant 2 : index
    %c0_211 = arith.constant 0 : index
    %220 = vector.load %arg28[%c1_209, %c2_210, %c0_211] : memref<2x132x6xf32, #tpu.memory_space<vmem>>, vector<1x128x6xf32>
    %221 = vector.shape_cast %220 : vector<1x128x6xf32> to vector<128x6xf32>
    %c2_212 = arith.constant 2 : index
    %c0_213 = arith.constant 0 : index
    %c0_214 = arith.constant 0 : index
    %222 = vector.load %arg16[%c2_212, %c0_213, %c0_214] : memref<5x6x6xf32, #tpu.memory_space<vmem>>, vector<1x6x6xf32>
    %223 = vector.shape_cast %222 : vector<1x6x6xf32> to vector<6x6xf32>
    %cst_215 = arith.constant dense<0.000000e+00> : vector<128x6xf32>
    %224 = tpu.matmul %221, %223, %cst_215 {dimension_numbers = #tpu.dot_dimension_numbers<[1], [0], [0], [1], [0, 0, 1, 1], [], []>} : vector<128x6xf32>, vector<6x6xf32>, vector<128x6xf32> -> vector<128x6xf32>
    %225 = arith.addf %219, %224 : vector<128x6xf32>
    %c1_216 = arith.constant 1 : index
    %c1_217 = arith.constant 1 : index
    %c0_218 = arith.constant 0 : index
    %226 = vector.load %arg28[%c1_216, %c1_217, %c0_218] : memref<2x132x6xf32, #tpu.memory_space<vmem>>, vector<1x128x6xf32>
    %227 = vector.shape_cast %226 : vector<1x128x6xf32> to vector<128x6xf32>
    %c3_219 = arith.constant 3 : index
    %c0_220 = arith.constant 0 : index
    %c0_221 = arith.constant 0 : index
    %228 = vector.load %arg16[%c3_219, %c0_220, %c0_221] : memref<5x6x6xf32, #tpu.memory_space<vmem>>, vector<1x6x6xf32>
    %229 = vector.shape_cast %228 : vector<1x6x6xf32> to vector<6x6xf32>
    %cst_222 = arith.constant dense<0.000000e+00> : vector<128x6xf32>
    %230 = tpu.matmul %227, %229, %cst_222 {dimension_numbers = #tpu.dot_dimension_numbers<[1], [0], [0], [1], [0, 0, 1, 1], [], []>} : vector<128x6xf32>, vector<6x6xf32>, vector<128x6xf32> -> vector<128x6xf32>
    %231 = arith.addf %225, %230 : vector<128x6xf32>
    %c1_223 = arith.constant 1 : index
    %c0_224 = arith.constant 0 : index
    %c0_225 = arith.constant 0 : index
    %232 = vector.load %arg28[%c1_223, %c0_224, %c0_225] : memref<2x132x6xf32, #tpu.memory_space<vmem>>, vector<1x128x6xf32>
    %233 = vector.shape_cast %232 : vector<1x128x6xf32> to vector<128x6xf32>
    %c4_226 = arith.constant 4 : index
    %c0_227 = arith.constant 0 : index
    %c0_228 = arith.constant 0 : index
    %234 = vector.load %arg16[%c4_226, %c0_227, %c0_228] : memref<5x6x6xf32, #tpu.memory_space<vmem>>, vector<1x6x6xf32>
    %235 = vector.shape_cast %234 : vector<1x6x6xf32> to vector<6x6xf32>
    %cst_229 = arith.constant dense<0.000000e+00> : vector<128x6xf32>
    %236 = tpu.matmul %233, %235, %cst_229 {dimension_numbers = #tpu.dot_dimension_numbers<[1], [0], [0], [1], [0, 0, 1, 1], [], []>} : vector<128x6xf32>, vector<6x6xf32>, vector<128x6xf32> -> vector<128x6xf32>
    %237 = arith.addf %231, %236 : vector<128x6xf32>
    %c0_230 = arith.constant 0 : index
    %c0_231 = arith.constant 0 : index
    %238 = vector.load %arg17[%c0_230, %c0_231] : memref<1x6xf32, #tpu.memory_space<vmem>>, vector<1x6xf32>
    %239 = vector.broadcast %238 : vector<1x6xf32> to vector<128x6xf32>
    %240 = arith.addf %237, %239 : vector<128x6xf32>
    %c1_232 = arith.constant 1 : index
    %c0_233 = arith.constant 0 : index
    %c0_234 = arith.constant 0 : index
    %241 = vector.load %arg29[%c1_232, %c0_233, %c0_234] : memref<2x128x6xf32, #tpu.memory_space<vmem>>, vector<1x128x6xf32>
    %242 = vector.shape_cast %241 : vector<1x128x6xf32> to vector<128x6xf32>
    %243 = vector.shape_cast %240 : vector<128x6xf32> to vector<1x128x6xf32>
    tpu.vector_store %arg29[%c1_232, %c0_233, %c0_234], %243 {strides = array<i32>} : memref<2x128x6xf32, #tpu.memory_space<vmem>>, vector<1x128x6xf32>,
    %c0_235 = arith.constant 0 : index
    %c0_236 = arith.constant 0 : index
    %c0_237 = arith.constant 0 : index
    %244 = vector.load %arg29[%c0_235, %c0_236, %c0_237] : memref<2x128x6xf32, #tpu.memory_space<vmem>>, vector<2x128x6xf32>
    %cst_238 = arith.constant dense<0.000000e+00> : vector<6xf32>
    %245 = vector.multi_reduction <add>, %244, %cst_238 [0, 1] : vector<2x128x6xf32> to vector<6xf32>
    %246 = vector.shape_cast %245 : vector<6xf32> to vector<1x1x6xf32>
    %cst_239 = arith.constant 2.560000e+02 : f32
    %247 = vector.broadcast %cst_239 : f32 to vector<1x1x6xf32>
    %248 = arith.divf %246, %247 : vector<1x1x6xf32>
    %249 = vector.broadcast %248 : vector<1x1x6xf32> to vector<2x128x6xf32>
    %250 = arith.subf %244, %249 : vector<2x128x6xf32>
    %251 = arith.mulf %250, %250 : vector<2x128x6xf32>
    %cst_240 = arith.constant dense<0.000000e+00> : vector<6xf32>
    %252 = vector.multi_reduction <add>, %251, %cst_240 [0, 1] : vector<2x128x6xf32> to vector<6xf32>
    %253 = vector.shape_cast %252 : vector<6xf32> to vector<1x1x6xf32>
    %cst_241 = arith.constant 2.560000e+02 : f32
    %254 = vector.broadcast %cst_241 : f32 to vector<1x1x6xf32>
    %255 = arith.divf %253, %254 : vector<1x1x6xf32>
    %256 = vector.broadcast %248 : vector<1x1x6xf32> to vector<2x128x6xf32>
    %257 = arith.subf %244, %256 : vector<2x128x6xf32>
    %cst_242 = arith.constant 9.99999974E-6 : f32
    %258 = vector.broadcast %cst_242 : f32 to vector<1x1x6xf32>
    %259 = arith.addf %255, %258 : vector<1x1x6xf32>
    %260 = math.rsqrt %259 : vector<1x1x6xf32>
    %261 = vector.broadcast %260 : vector<1x1x6xf32> to vector<2x128x6xf32>
    %262 = arith.mulf %257, %261 : vector<2x128x6xf32>
    %c0_243 = arith.constant 0 : index
    %c0_244 = arith.constant 0 : index
    %263 = vector.load %arg18[%c0_243, %c0_244] : memref<1x6xf32, #tpu.memory_space<vmem>>, vector<1x6xf32>
    %264 = vector.shape_cast %263 : vector<1x6xf32> to vector<1x1x6xf32>
    %265 = vector.broadcast %264 : vector<1x1x6xf32> to vector<2x128x6xf32>
    %266 = arith.mulf %262, %265 : vector<2x128x6xf32>
    %c0_245 = arith.constant 0 : index
    %c0_246 = arith.constant 0 : index
    %267 = vector.load %arg19[%c0_245, %c0_246] : memref<1x6xf32, #tpu.memory_space<vmem>>, vector<1x6xf32>
    %268 = vector.shape_cast %267 : vector<1x6xf32> to vector<1x1x6xf32>
    %269 = vector.broadcast %268 : vector<1x1x6xf32> to vector<2x128x6xf32>
    %270 = arith.addf %266, %269 : vector<2x128x6xf32>
    %cst_247 = arith.constant 0.000000e+00 : f32
    %271 = vector.broadcast %cst_247 : f32 to vector<2x128x6xf32>
    %272 = arith.maximumf %270, %271 : vector<2x128x6xf32>
    %c0_248 = arith.constant 0 : index
    %c0_249 = arith.constant 0 : index
    %273 = vector.load %arg20[%c0_248, %c0_249] : memref<6x6xf32, #tpu.memory_space<vmem>>, vector<6x6xf32>
    %274 = vector.extract_strided_slice %272 {offsets = [0, 0, 0], sizes = [1, 128, 6], strides = [1, 1, 1]} : vector<2x128x6xf32> to vector<1x128x6xf32>
    %275 = vector.shape_cast %274 : vector<1x128x6xf32> to vector<128x6xf32>
    %cst_250 = arith.constant dense<0.000000e+00> : vector<6x128xf32>
    %276 = tpu.matmul %273, %275, %cst_250 {dimension_numbers = #tpu.dot_dimension_numbers<[1], [1], [0], [0], [0, 0, 1, 0], [], []>} : vector<6x6xf32>, vector<128x6xf32>, vector<6x128xf32> -> vector<6x128xf32>
    %c0_251 = arith.constant 0 : index
    %c0_252 = arith.constant 0 : index
    %277 = vector.load %arg21[%c0_251, %c0_252] : memref<6x1xf32, #tpu.memory_space<vmem>>, vector<6x1xf32>
    %278 = vector.broadcast %277 : vector<6x1xf32> to vector<6x128xf32>
    %279 = arith.addf %276, %278 : vector<6x128xf32>
    %c0_253 = arith.constant 0 : index
    %c0_254 = arith.constant 0 : index
    %c0_255 = arith.constant 0 : index
    %280 = vector.load %arg22[%c0_253, %c0_254, %c0_255] : memref<2x6x128xf32, #tpu.memory_space<vmem>>, vector<1x6x128xf32>
    %281 = vector.shape_cast %280 : vector<1x6x128xf32> to vector<6x128xf32>
    %282 = vector.shape_cast %279 : vector<6x128xf32> to vector<1x6x128xf32>
    tpu.vector_store %arg22[%c0_253, %c0_254, %c0_255], %282 {strides = array<i32>} : memref<2x6x128xf32, #tpu.memory_space<vmem>>, vector<1x6x128xf32>,
    %c0_256 = arith.constant 0 : index
    %c0_257 = arith.constant 0 : index
    %283 = vector.load %arg20[%c0_256, %c0_257] : memref<6x6xf32, #tpu.memory_space<vmem>>, vector<6x6xf32>
    %284 = vector.extract_strided_slice %272 {offsets = [1, 0, 0], sizes = [1, 128, 6], strides = [1, 1, 1]} : vector<2x128x6xf32> to vector<1x128x6xf32>
    %285 = vector.shape_cast %284 : vector<1x128x6xf32> to vector<128x6xf32>
    %cst_258 = arith.constant dense<0.000000e+00> : vector<6x128xf32>
    %286 = tpu.matmul %283, %285, %cst_258 {dimension_numbers = #tpu.dot_dimension_numbers<[1], [1], [0], [0], [0, 0, 1, 0], [], []>} : vector<6x6xf32>, vector<128x6xf32>, vector<6x128xf32> -> vector<6x128xf32>
    %c0_259 = arith.constant 0 : index
    %c0_260 = arith.constant 0 : index
    %287 = vector.load %arg21[%c0_259, %c0_260] : memref<6x1xf32, #tpu.memory_space<vmem>>, vector<6x1xf32>
    %288 = vector.broadcast %287 : vector<6x1xf32> to vector<6x128xf32>
    %289 = arith.addf %286, %288 : vector<6x128xf32>
    %c1_261 = arith.constant 1 : index
    %c0_262 = arith.constant 0 : index
    %c0_263 = arith.constant 0 : index
    %290 = vector.load %arg22[%c1_261, %c0_262, %c0_263] : memref<2x6x128xf32, #tpu.memory_space<vmem>>, vector<1x6x128xf32>
    %291 = vector.shape_cast %290 : vector<1x6x128xf32> to vector<6x128xf32>
    %292 = vector.shape_cast %289 : vector<6x128xf32> to vector<1x6x128xf32>
    tpu.vector_store %arg22[%c1_261, %c0_262, %c0_263], %292 {strides = array<i32>} : memref<2x6x128xf32, #tpu.memory_space<vmem>>, vector<1x6x128xf32>,
    return
  }
}

</mosaic_0001>

<bundles_post_ra>
// kernel: vae_decoder_forward.1
= control target key start
LH: loop header
LB: loop body
LE: loop exit
PB: predicated region body
PF: predicated region fallthrough
CT: control target
= control target key end

     0   :  { %vm89_vm0 = vcmask 1043456   ;;  %vm82_vm1 = vcmask 97280   ;;  %vm10207_vm2 = vmmov 1   ;;  %s12623_s1 = inlined_call_operand.vmem [shape: f32[12,12], index: 1, kind: input, shape index: {}]   ;;  %s12624_s5 = inlined_call_operand.vmem [shape: f32[120,12,48], index: 5, kind: input, shape index: {}]   ;;  %s12625_s6 = inlined_call_operand.vmem [shape: f32[120,12,48], index: 6, kind: input, shape index: {}]   ;;  %s12626_s7 = inlined_call_operand.vmem [shape: f32[120,1,48], index: 7, kind: input, shape index: {}]   ;;  %s12627_s8 = inlined_call_operand.vmem [shape: f32[12,12], index: 8, kind: input, shape index: {}]   ;;  %s12628_s9 = inlined_call_operand.vmem [shape: f32[1,12], index: 9, kind: input, shape index: {}]   ;;  %s12629_s10 = inlined_call_operand.vmem [shape: f32[12,6], index: 10, kind: input, shape index: {}]   ;;  %s12630_s11 = inlined_call_operand.vmem [shape: f32[1,6], index: 11, kind: input, shape index: {}]   ;;  %s12631_s12 = inlined_call_operand.vmem [shape: f32[5,6,6], index: 12, kind: input, shape index: {}]   ;;  %s12632_s13 = inlined_call_operand.vmem [shape: f32[1,6], index: 13, kind: input, shape index: {}]   ;;  %s12633_s14 = inlined_call_operand.vmem [shape: f32[1,6], index: 14, kind: input, shape index: {}]   ;;  %s12634_s15 = inlined_call_operand.vmem [shape: f32[1,6], index: 15, kind: input, shape index: {}]   ;;  %s12635_s16 = inlined_call_operand.vmem [shape: f32[5,6,6], index: 16, kind: input, shape index: {}]   ;;  %s12636_s17 = inlined_call_operand.vmem [shape: f32[1,6], index: 17, kind: input, shape index: {}]   ;;  %s12637_s18 = inlined_call_operand.vmem [shape: f32[1,6], index: 18, kind: input, shape index: {}]   ;;  %s12638_s19 = inlined_call_operand.vmem [shape: f32[1,6], index: 19, kind: input, shape index: {}]   ;;  %s12639_s20 = inlined_call_operand.vmem [shape: f32[6,6], index: 20, kind: input, shape index: {}]   ;;  %s12640_s21 = inlined_call_operand.vmem [shape: f32[6,1], index: 21, kind: input, shape index: {}]   ;;  %s12641_s22 = inlined_call_operand.vmem [shape: f32[2,6,128], index: 22, kind: output, shape index: {}]   ;;  %s12642_s0 = inlined_call_operand.vmem [shape: f32[16,12], index: 0, kind: input, shape index: {}]   ;;  %s12643_s3 = inlined_call_operand.vmem [shape: f32[12,12], index: 3, kind: input, shape index: {}]   ;;  %s12644_s2 = inlined_call_operand.vmem [shape: f32[1,12], index: 2, kind: input, shape index: {}]   ;;  %s12645_s4 = inlined_call_operand.vmem [shape: f32[1,12], index: 4, kind: input, shape index: {}]  }
   0x1   :  { %12649 = sst [smem:[#allocation9_spill]] %s12623_s1  ;;  %vm10339_vm3 = vmpackc.low %vm89_vm0, %vm10207_vm2  ;;  %v71_v4 = vld [vmem:[%s12642_s0] sm:$0xff]  ;;  %v72_v5 = vld [vmem:[%s12642_s0 + $0x8] sm:$0xff] }
   0x2   :  { %12650 = sst [smem:[#allocation10_spill]] %s12624_s5  ;;  %s12656_s29 = sld [smem:[#allocation9_spill]]  ;;  %8866 = vmatprep.mubr.msk.f32.mxu0 %vm82_vm1, %v71_v4  ;;  %v170_v6 = vld [vmem:[%s12643_s3] sm:$0xff]  ;;  %v171_v7 = vld [vmem:[%s12643_s3 + $0x8] sm:$0xf] }
   0x3   :  { %12651 = sst [smem:[#allocation11_spill]] %s12625_s6  ;;  %v9731_v8 = vpack.c.bf16 %v171_v7, %v170_v6  ;;  %v7880_v9 = vld [vmem:[%s12644_s2] ss:$0 sm:$0xff]  ;;  %s10375_s2 = smov 0  }
   0x4   :  { %12652 = sst [smem:[#allocation12_spill]] %s12626_s7  ;;  %v7884_v16 = vld [vmem:[%s12645_s4] ss:$0 sm:$0xff] }
   0x5   :  { %12653 = sst [smem:[#allocation13_spill]] %s12627_s8  ;;  %9733 = vmatprep.subr.msk.bf16.mxu1 %vm10339_vm3, %v9731_v8 }
   0x6   :  { %12654 = sst [smem:[#allocation14_spill]] %s12628_s9  ;;  %9736 = vmatpush3.bf16.msk.msra.mxu1 %vm10339_vm3, %v9731_v8 }
   0x7   :  { %12655 = sst [smem:[#allocation15_spill]] %s12629_s10 }
   0x8   :  { %v73_v0 = vld [vmem:[%s12656_s29] sm:$0xff]  ;;  %v74_v1 = vld [vmem:[%s12656_s29 + $0x8] sm:$0xf] }
   0x9   :  { %v9725_v3 = vpack.c.bf16 %v74_v1, %v73_v0 }
   0xb   :  { %9727 = vmatprep.subr.msk.bf16.mxu0 %vm10339_vm3, %v9725_v3 }
   0xc   :  { %9730 = vmatpush3.bf16.msk.msra.mxu0 %vm10339_vm3, %v9725_v3 }
   0xf   :  { %8867 = vmatmul.mubr.msk.f32.vlgmr.msra.gmra.mrb[0].mxu0 %vm82_vm1, %v72_v5 }
  0xe2   :  { %v8868_v10 = vpop.f32.mrb[0].mxu0 }
  0xe3   :  { %v165_v11 = vadd.f32 %v8868_v10, %v7880_v9  ;;  %v159_v12 = vpop.f32.mrb[1].mxu0 }
  0xe4   :  { %v160_v13 = vadd.f32 %v7880_v9, %v159_v12 }
  0xe5   :  { %v169_v15 = vmax.f32 %v165_v11, 0.0 }
  0xe6   :  { %v168_v14 = vmax.f32 %v160_v13, 0.0 }
  0xe8   :  { %8873 = vmatprep.mubr.msk.f32.mxu1 %vm82_vm1, %v168_v14 }
  0xe9   :  { %8874 = vmatmul.mubr.msk.f32.vlgmr.msra.gmra.mrb[0].mxu1 %vm82_vm1, %v169_v15 }
 0x1bc   :  { %v8875_v17 = vpop.f32.mrb[0].mxu1 }
 0x1bd   :  { %v260_v18 = vadd.f32 %v8875_v17, %v7884_v16  ;;  %v254_v19 = vpop.f32.mrb[1].mxu1 }
 0x1be   :  { %v255_v20 = vadd.f32 %v7884_v16, %v254_v19 }
 0x1bf   :  { %v264_v21 = vmax.f32 %v260_v18, 0.0 }
 0x1c0   :  { %v263_v22 = vmax.f32 %v255_v20, 0.0 }
 0x1c1   :  { %266 = vst.msk [vmem:[#allocation2 + $0x8] sm:$0xff] %vm82_vm1, %v264_v21 }
 0x1c2   :  { %265 = vst.msk [vmem:[#allocation2] sm:$0xff] %vm82_vm1, %v263_v22 }
 0x1c3 LB: > { %v10208_v24 = vmov 0.0|0.0   ;;  %s7888_s4 = sshll.u32 %s10205_s2, 4  ;;  %vm10209_vm4 = vmmov 0   ;;  %v10210_v25 = vmov 0.0   ;;  %s12659_s29 = sld [smem:[#allocation11_spill]]  ;;  %vm374_vm5 = vcmask 392192   ;;  %s10205_s2 = sphi %s10375_s2, %s272_s2  }
 0x1c4   : > { %9743 = vmatprep.subr.bf16.mxu1 %v10208_v24  ;;  %8887 = vmatprep.mubr.msk.f32.mxu1 %vm10209_vm4, %v10210_v25  ;;  %s12660_s23 = sld [smem:[#allocation10_spill]]  ;;  %s12661_s10 = sld [smem:[#allocation12_spill]]  ;;  %vm483_vm6 = vcmask 91136   ;;  %vm1207_vm7 = vcmask 90112   ;;  %vm1211_vm8 = vcmask 91137  }
 0x1c5   : > { %s10211_s26 = smov 92   ;;  %s10212_s6 = smov 12  }
 0x1c6   : > { %s10213_s27 = smov 104   ;;  %s1206_s0 = scalar_lea.vmem [#allocation4], %s10205_s2 }
 0x1c8   : > { %v278_v32 = vld [vmem:[#allocation2 + $0x8] sm:$0xff] }
 0x1c9   : > { %v277_v23 = vld [vmem:[#allocation2] sm:$0xff]  ;;  %s274_s30 = scalar_lea.vmem %s12659_s29, %s7888_s4 }
 0x1ca   : > { %8880 = vmatprep.mubr.msk.f32.mxu0 %vm82_vm1, %v277_v23  ;;  %s279_s5 = scalar_lea.vmem %s12660_s23, %s7888_s4  ;;  %v275_v26 = vld [vmem:[%s274_s30] sm:$0xff]  ;;  %v276_v27 = vld [vmem:[%s274_s30 + $0x8] sm:$0xf]  ;;  %s282_s25 = scalar_lea.vmem %s12661_s10, %s10205_s2 }
 0x1cb   : > { %v280_v28 = vld [vmem:[%s279_s5] sm:$0xff]  ;;  %v281_v29 = vld [vmem:[%s279_s5 + $0x8] sm:$0xf]  ;;  %v10391_v30 = vpack.c.bf16 %v276_v27, %v275_v26  ;;  %s272_s2 = sadd.s32 1, %s10205_s2  }
 0x1cc   : > { %v9737_v31 = vpack.c.bf16 %v281_v29, %v280_v28  ;;  %v7889_v33 = vld [vmem:[%s282_s25] ss:$0 sm:$0xff]  ;;  %p269_p0 = scmp.ge.s32.totalorder %s272_s2, 120  }
 0x1cd   : > { %9746 = vmatpush3.bf16.msk.msra.mxu1 %vm10339_vm3, %v10391_v30  ;;  %s12662_s7 = sld [smem:[#allocation13_spill]] (%p269_p0)  ;;  %vm10215_vm9 = vmmov (%p269_p0), 0   ;;  %s12663_s23 = sld [smem:[#allocation15_spill]] (%p269_p0)  ;;  %vm1213_vm10 = vcmask (%p269_p0), 48128   ;;  %vm2238_vm11 = vcmask (%p269_p0), 1045504   ;;  %vm3311_vm12 = vcmask (%p269_p0), 44032  }
 0x1ce   : > { %9739 = vmatprep.subr.msk.bf16.mxu0 %vm10339_vm3, %v9737_v31  ;;  %9751 = vmatprep.subr.bf16.mxu1 %v10208_v24  ;;  %s12664_s25 = sld [smem:[#allocation14_spill]] (%p269_p0)  ;;  %vm12459_vm13 = vmpackc.low (%p269_p0), %vm1213_vm10, %vm1213_vm10 }
 0x1cf   : > { %9742 = vmatpush3.bf16.msk.msra.mxu0 %vm10339_vm3, %v9737_v31 }
 0x1d0   : > { %8888 = vmatmul.mubr.f32.vlgmr.msra.gmra.mrb[0].mxu1 %v10210_v25  ;;  %9747 = vmatprep.subr.bf16.mxu0 %v10208_v24 }
 0x1d1   : > { %9754 = vmatpush3.bf16.msk.msra.mxu1 %vm10339_vm3, %v10391_v30  ;;  %8901 = vmatprep.mubr.msk.f32.mxu1 %vm10209_vm4, %v10210_v25 }
 0x1d2   : > { %8881 = vmatmul.mubr.msk.f32.vlgmr.msra.gmra.mrb[0].mxu0 %vm82_vm1, %v278_v32  ;;  %9759 = vmatprep.subr.bf16.mxu1 %v10208_v24 }
 0x1d3   : > { %9750 = vmatpush3.bf16.msk.msra.mxu0 %vm10339_vm3, %v10391_v30  ;;  %8894 = vmatprep.mubr.msk.f32.mxu0 %vm10209_vm4, %v10210_v25 }
 0x1d4   : > { %9755 = vmatprep.subr.bf16.mxu0 %v10208_v24 }
 0x2a3   : > { %v450_v34 = vpop.f32.mrb[0].mxu1 }
 0x2a4   : > { %v8889_v35 = vpop.f32.mrb[1].mxu1 }
 0x2a5   : > { %v8882_v36 = vpop.f32.mrb[0].mxu0 }
 0x2a6   : > { %v371_v37 = vadd.f32 %v8882_v36, %v7889_v33  ;;  %v365_v38 = vpop.f32.mrb[1].mxu0 }
 0x2a7   : > { %v366_v39 = vadd.f32 %v7889_v33, %v365_v38 }
 0x2a8   : > { %376 = vst.msk [vmem:[#allocation3 + $0x8] sm:$0xff] %vm374_vm5, %v371_v37 }
 0x2a9   : > { %375 = vst.msk [vmem:[#allocation3] sm:$0xff] %vm374_vm5, %v366_v39 }
 0x2b0   : > { %v377_v40 = vld [vmem:[#allocation3] sm:$0x3]  ;;  %v485_v56 = vld [vmem:[#allocation3 + $0x2] sm:$0x3]  ;;  %v588_v11 = vld [vmem:[#allocation3 + $0x4] sm:$0x3] }
 0x2b1   : > { %v454_v41 = vadd.f32 %v450_v34, %v377_v40  ;;  %v691_v32 = vld [vmem:[#allocation3 + $0x6] sm:$0x3] }
 0x2b3   : > { %10130 = vtanh.f32 %v454_v41  ;;  %v7894_v43 = vmul.f32 -1.442695, %v454_v41 }
 0x2b5   : > { %10132 = vpow2.f32 %v7894_v43 }
 0x2bd   : > { %v10131_v42 = vpop.eup %10130 }
 0x2be   : > { %464 = vrot.lane.b32.xlu0 %v10131_v42, %s10211_s26 }
 0x2bf   : > { %v10133_v44 = vpop.eup %10132 }
 0x2c0   : > { %v458_v45 = vadd.f32 1.0, %v10133_v44 }
 0x2c2   : > { %10134 = vrcp.f32 %v458_v45 }
 0x2cc   : > { %v10135_v46 = vpop.eup %10134 }
 0x2cd   : > { %v462_v49 = vmul.f32 0.0, %v10135_v46 }
 0x330   : > { %v465_v47 = vpop.permute.xlu0 %464 }
 0x331   : > { %v467_v48 = vmul.f32 %v10135_v46, %v465_v47 }
 0x333   : > { %469 = vrot.lane.b32.xlu0 %v467_v48, %s10212_s6 }
 0x3a5   : > { %v470_v50 = vpop.permute.xlu0 %469 }
 0x3a6   : > { %v472_v51 = vadd.f32 %v470_v50, %v462_v49  ;;  %v794_v49 = vld [vmem:[#allocation3 + $0x8] sm:$0x3] }
 0x3a8   : > { %10136 = vtanh.f32 %v472_v51 }
 0x3b2   : > { %v10137_v52 = vpop.eup %10136 }
 0x3b3   : > { %475 = vrot.lane.b32.xlu1 %v10137_v52, %s10212_s6 }
 0x425   : > { %v476_v53 = vpop.permute.xlu1 %475 }
 0x426   : > { %v478_v54 = vmul.f32 %v10135_v46, %v476_v53 }
 0x428   : > { %480 = vrot.lane.b32.xlu1 %v478_v54, %s10213_s27 }
 0x49a   : > { %v481_v55 = vpop.permute.xlu1 %480 }
 0x49b   : > { %484 = vst.msk [vmem:[#allocation2] sm:$0x3] %vm483_vm6, %v481_v55  ;;  %8895 = vmatmul.mubr.msk.f32.vlgmr.msra.gmra.mrb[2].mxu0 %vm82_vm1, %v481_v55 }
 0x49c   : > { %9758 = vmatpush3.bf16.msk.msra.mxu0 %vm10339_vm3, %v10391_v30  ;;  %8908 = vmatprep.mubr.msk.f32.mxu0 %vm10209_vm4, %v10210_v25 }
 0x49d   : > { %9763 = vmatprep.subr.bf16.mxu0 %v10208_v24 }
 0x56e   : > { %v554_v57 = vpop.f32.mrb[2].mxu0 }
 0x56f   : > { %v558_v58 = vadd.f32 %v554_v57, %v485_v56  ;;  %v8896_v59 = vpop.f32.mrb[3].mxu0 }
 0x571   : > { %10138 = vtanh.f32 %v558_v58  ;;  %v7897_v61 = vmul.f32 -1.442695, %v558_v58 }
 0x573   : > { %10140 = vpow2.f32 %v7897_v61 }
 0x57b   : > { %v10139_v60 = vpop.eup %10138 }
 0x57c   : > { %568 = vrot.lane.b32.xlu0 %v10139_v60, %s10211_s26 }
 0x57d   : > { %v10141_v62 = vpop.eup %10140 }
 0x57e   : > { %v562_v63 = vadd.f32 1.0, %v10141_v62 }
 0x580   : > { %10142 = vrcp.f32 %v562_v63 }
 0x58a   : > { %v10143_v0 = vpop.eup %10142 }
 0x58b   : > { %v566_v4 = vmul.f32 %v10143_v0, %v472_v51 }
 0x5ee   : > { %v569_v1 = vpop.permute.xlu0 %568 }
 0x5ef   : > { %v571_v3 = vmul.f32 %v10143_v0, %v569_v1 }
 0x5f1   : > { %573 = vrot.lane.b32.xlu1 %v571_v3, %s10212_s6 }
 0x663   : > { %v574_v5 = vpop.permute.xlu1 %573 }
 0x664   : > { %v576_v6 = vadd.f32 %v574_v5, %v566_v4  ;;  %v897_v4 = vld [vmem:[#allocation3 + $0xa] sm:$0x3] }
 0x666   : > { %10144 = vtanh.f32 %v576_v6 }
 0x670   : > { %v10145_v7 = vpop.eup %10144 }
 0x671   : > { %579 = vrot.lane.b32.xlu0 %v10145_v7, %s10212_s6 }
 0x6e3   : > { %v580_v8 = vpop.permute.xlu0 %579 }
 0x6e4   : > { %v582_v9 = vmul.f32 %v10143_v0, %v580_v8 }
 0x6e6   : > { %584 = vrot.lane.b32.xlu1 %v582_v9, %s10213_s27 }
 0x758   : > { %v585_v10 = vpop.permute.xlu1 %584 }
 0x759   : > { %587 = vst.msk [vmem:[#allocation2 + $0x2] sm:$0x3] %vm483_vm6, %v585_v10  ;;  %8902 = vmatmul.mubr.msk.f32.vlgmr.msra.gmra.mrb[2].mxu1 %vm82_vm1, %v585_v10 }
 0x75a   : > { %9762 = vmatpush3.bf16.msk.msra.mxu1 %vm10339_vm3, %v10391_v30  ;;  %8915 = vmatprep.mubr.msk.f32.mxu1 %vm10209_vm4, %v10210_v25 }
 0x75b   : > { %9767 = vmatprep.subr.bf16.mxu1 %v10208_v24 }
 0x82c   : > { %v657_v12 = vpop.f32.mrb[2].mxu1 }
 0x82d   : > { %v661_v13 = vadd.f32 %v657_v12, %v588_v11  ;;  %v8903_v14 = vpop.f32.mrb[3].mxu1 }
 0x82f   : > { %10146 = vtanh.f32 %v661_v13  ;;  %v7900_v16 = vmul.f32 -1.442695, %v661_v13 }
 0x831   : > { %10148 = vpow2.f32 %v7900_v16 }
 0x839   : > { %v10147_v15 = vpop.eup %10146 }
 0x83a   : > { %671 = vrot.lane.b32.xlu0 %v10147_v15, %s10211_s26 }
 0x83b   : > { %v10149_v17 = vpop.eup %10148 }
 0x83c   : > { %v665_v18 = vadd.f32 1.0, %v10149_v17 }
 0x83e   : > { %10150 = vrcp.f32 %v665_v18 }
 0x848   : > { %v10151_v19 = vpop.eup %10150 }
 0x849   : > { %v669_v22 = vmul.f32 %v10151_v19, %v576_v6 }
 0x8ac   : > { %v672_v20 = vpop.permute.xlu0 %671 }
 0x8ad   : > { %v674_v21 = vmul.f32 %v10151_v19, %v672_v20  ;;  %v1000_v20 = vld [vmem:[#allocation3 + $0xc] sm:$0x3] }
 0x8af   : > { %676 = vrot.lane.b32.xlu1 %v674_v21, %s10212_s6 }
 0x921   : > { %v677_v23 = vpop.permute.xlu1 %676 }
 0x922   : > { %v679_v26 = vadd.f32 %v677_v23, %v669_v22 }
 0x924   : > { %10152 = vtanh.f32 %v679_v26 }
 0x92e   : > { %v10153_v27 = vpop.eup %10152 }
 0x92f   : > { %682 = vrot.lane.b32.xlu0 %v10153_v27, %s10212_s6 }
 0x9a1   : > { %v683_v28 = vpop.permute.xlu0 %682 }
 0x9a2   : > { %v685_v29 = vmul.f32 %v10151_v19, %v683_v28 }
 0x9a4   : > { %687 = vrot.lane.b32.xlu1 %v685_v29, %s10213_s27 }
 0xa16   : > { %v688_v31 = vpop.permute.xlu1 %687 }
 0xa17   : > { %690 = vst.msk [vmem:[#allocation2 + $0x4] sm:$0x3] %vm483_vm6, %v688_v31  ;;  %8909 = vmatmul.mubr.msk.f32.vlgmr.msra.gmra.mrb[4].mxu0 %vm82_vm1, %v688_v31 }
 0xa18   : > { %9766 = vmatpush3.bf16.msk.msra.mxu0 %vm10339_vm3, %v10391_v30  ;;  %8922 = vmatprep.mubr.msk.f32.mxu0 %vm10209_vm4, %v10210_v25 }
 0xa19   : > { %9771 = vmatprep.subr.bf16.mxu0 %v10208_v24 }
 0xaea   : > { %v760_v33 = vpop.f32.mrb[4].mxu0 }
 0xaeb   : > { %v764_v34 = vadd.f32 %v760_v33, %v691_v32  ;;  %v8910_v35 = vpop.f32.mrb[5].mxu0 }
 0xaed   : > { %10154 = vtanh.f32 %v764_v34  ;;  %v7903_v37 = vmul.f32 -1.442695, %v764_v34 }
 0xaef   : > { %10156 = vpow2.f32 %v7903_v37 }
 0xaf7   : > { %v10155_v36 = vpop.eup %10154 }
 0xaf8   : > { %774 = vrot.lane.b32.xlu0 %v10155_v36, %s10211_s26 }
 0xaf9   : > { %v10157_v38 = vpop.eup %10156 }
 0xafa   : > { %v768_v39 = vadd.f32 1.0, %v10157_v38 }
 0xafc   : > { %10158 = vrcp.f32 %v768_v39 }
 0xb06   : > { %v10159_v40 = vpop.eup %10158 }
 0xb07   : > { %v772_v43 = vmul.f32 %v10159_v40, %v679_v26 }
 0xb6a   : > { %v775_v41 = vpop.permute.xlu0 %774 }
 0xb6b   : > { %v777_v42 = vmul.f32 %v10159_v40, %v775_v41  ;;  %v1103_v41 = vld [vmem:[#allocation3 + $0xe] sm:$0x3] }
 0xb6d   : > { %779 = vrot.lane.b32.xlu1 %v777_v42, %s10212_s6 }
 0xbdf   : > { %v780_v24 = vpop.permute.xlu1 %779 }
 0xbe0   : > { %v782_v44 = vadd.f32 %v780_v24, %v772_v43 }
 0xbe2   : > { %10160 = vtanh.f32 %v782_v44 }
 0xbec   : > { %v10161_v45 = vpop.eup %10160 }
 0xbed   : > { %785 = vrot.lane.b32.xlu0 %v10161_v45, %s10212_s6 }
 0xc5f   : > { %v786_v46 = vpop.permute.xlu0 %785 }
 0xc60   : > { %v788_v47 = vmul.f32 %v10159_v40, %v786_v46 }
 0xc62   : > { %790 = vrot.lane.b32.xlu1 %v788_v47, %s10213_s27 }
 0xcd4   : > { %v791_v48 = vpop.permute.xlu1 %790 }
 0xcd5   : > { %793 = vst.msk [vmem:[#allocation2 + $0x6] sm:$0x3] %vm483_vm6, %v791_v48  ;;  %8916 = vmatmul.mubr.msk.f32.vlgmr.msra.gmra.mrb[4].mxu1 %vm82_vm1, %v791_v48 }
 0xcd6   : > { %9770 = vmatpush3.bf16.msk.msra.mxu1 %vm10339_vm3, %v10391_v30  ;;  %8929 = vmatprep.mubr.msk.f32.mxu1 %vm10209_vm4, %v10210_v25 }
 0xda8   : > { %v863_v50 = vpop.f32.mrb[4].mxu1 }
 0xda9   : > { %v867_v51 = vadd.f32 %v863_v50, %v794_v49  ;;  %v8917_v52 = vpop.f32.mrb[5].mxu1 }
 0xdab   : > { %10162 = vtanh.f32 %v867_v51  ;;  %v7906_v54 = vmul.f32 -1.442695, %v867_v51 }
 0xdad   : > { %10164 = vpow2.f32 %v7906_v54 }
 0xdb5   : > { %v10163_v53 = vpop.eup %10162 }
 0xdb6   : > { %877 = vrot.lane.b32.xlu0 %v10163_v53, %s10211_s26 }
 0xdb7   : > { %v10165_v55 = vpop.eup %10164 }
 0xdb8   : > { %v871_v56 = vadd.f32 1.0, %v10165_v55 }
 0xdba   : > { %10166 = vrcp.f32 %v871_v56 }
 0xdc4   : > { %v10167_v57 = vpop.eup %10166 }
 0xdc5   : > { %v875_v60 = vmul.f32 %v10167_v57, %v782_v44 }
 0xe28   : > { %v878_v58 = vpop.permute.xlu0 %877 }
 0xe29   : > { %v880_v59 = vmul.f32 %v10167_v57, %v878_v58  ;;  %v1261_v58 = vld [vmem:[%s12662_s7] sm:$0xff] (%p269_p0) }
 0xe2b   : > { %882 = vrot.lane.b32.xlu1 %v880_v59, %s10212_s6  ;;  %v1262_v59 = vld [vmem:[%s12662_s7 + $0x8] sm:$0xf] (%p269_p0) }
 0xe9d   : > { %v883_v61 = vpop.permute.xlu1 %882 }
 0xe9e   : > { %v885_v62 = vadd.f32 %v883_v61, %v875_v60  ;;  %v10214_v60 = vmov (%p269_p0), 0.0|0.0   ;;  %v9776_v61 = vpack.c.bf16 (%p269_p0), %v1262_v59, %v1261_v58 }
 0xe9f   :  { %9779 = vmatprep.subr.bf16.mxu1 (%p269_p0), %v10214_v60 }
 0xea0   : > { %10168 = vtanh.f32 %v885_v62 }
 0xeaa   : > { %v10169_v63 = vpop.eup %10168 }
 0xeab   : > { %888 = vrot.lane.b32.xlu0 %v10169_v63, %s10212_s6  ;;  %v1716_v63 = vld [vmem:[%s12662_s7 + $0x8] sm:$0xf] (%p269_p0) }
 0xf1d   : > { %v889_v0 = vpop.permute.xlu0 %888 }
 0xf1e   : > { %v891_v1 = vmul.f32 %v10167_v57, %v889_v0 }
 0xf20   : > { %893 = vrot.lane.b32.xlu1 %v891_v1, %s10213_s27  ;;  %v9784_v1 = vpack.c.bf16 (%p269_p0), %v1716_v63, %v1261_v58 }
 0xf92   : > { %v894_v3 = vpop.permute.xlu1 %893 }
 0xf93   : > { %896 = vst.msk [vmem:[#allocation2 + $0x8] sm:$0x3] %vm483_vm6, %v894_v3  ;;  %8923 = vmatmul.mubr.msk.f32.vlgmr.msra.gmra.mrb[6].mxu0 %vm82_vm1, %v894_v3 }
 0xf94   : > { %9774 = vmatpush3.bf16.msk.msra.mxu0 %vm10339_vm3, %v10391_v30  ;;  %8936 = vmatprep.mubr.msk.f32.mxu0 %vm10209_vm4, %v10210_v25 }
 0xf95   :  { %9775 = vmatprep.subr.bf16.mxu0 (%p269_p0), %v10214_v60 }
0x1066   : > { %v966_v5 = vpop.f32.mrb[6].mxu0 }
0x1067   : > { %v970_v6 = vadd.f32 %v966_v5, %v897_v4  ;;  %v8924_v7 = vpop.f32.mrb[7].mxu0 }
0x1069   : > { %10170 = vtanh.f32 %v970_v6  ;;  %v7909_v9 = vmul.f32 -1.442695, %v970_v6 }
0x106b   : > { %10172 = vpow2.f32 %v7909_v9 }
0x1073   : > { %v10171_v8 = vpop.eup %10170 }
0x1074   : > { %980 = vrot.lane.b32.xlu0 %v10171_v8, %s10211_s26 }
0x1075   : > { %v10173_v10 = vpop.eup %10172 }
0x1076   : > { %v974_v11 = vadd.f32 1.0, %v10173_v10 }
0x1078   : > { %10174 = vrcp.f32 %v974_v11 }
0x1082   : > { %v10175_v12 = vpop.eup %10174 }
0x1083   : > { %v978_v30 = vmul.f32 %v10175_v12, %v885_v62  ;;  %v10216_v62 = vmov (%p269_p0), 0.0  }
0x1084   :  { %1214 = vst.msk [vmem:[#allocation5] sm:$0xff] (%p269_p0), %vm1213_vm10, %v10216_v62  ;;  %1215 = vst.msk [vmem:[#allocation5 + $0x8] sm:$0xff] (%p269_p0), %vm1213_vm10, %v10216_v62 }
0x1085   :  { %1216 = vst.msk [vmem:[#allocation5 + $0x10] sm:$0xff] (%p269_p0), %vm1213_vm10, %v10216_v62  ;;  %1217 = vst.msk [vmem:[#allocation5 + $0x18] sm:$0xff] (%p269_p0), %vm1213_vm10, %v10216_v62 }
0x1086   :  { %1218 = vst.msk [vmem:[#allocation5 + $0x20] sm:$0xff] (%p269_p0), %vm1213_vm10, %v10216_v62  ;;  %1219 = vst.msk [vmem:[#allocation5 + $0x28] sm:$0xff] (%p269_p0), %vm1213_vm10, %v10216_v62 }
0x1087   :  { %1220 = vst.msk [vmem:[#allocation5 + $0x30] sm:$0xff] (%p269_p0), %vm1213_vm10, %v10216_v62  ;;  %1221 = vst.msk [vmem:[#allocation5 + $0x38] sm:$0xff] (%p269_p0), %vm1213_vm10, %v10216_v62 }
0x1088   :  { %1222 = vst.msk [vmem:[#allocation5 + $0x40] sm:$0xff] (%p269_p0), %vm1213_vm10, %v10216_v62  ;;  %1223 = vst.msk [vmem:[#allocation5 + $0x48] sm:$0xff] (%p269_p0), %vm1213_vm10, %v10216_v62 }
0x1089   :  { %1224 = vst.msk [vmem:[#allocation5 + $0x50] sm:$0xff] (%p269_p0), %vm1213_vm10, %v10216_v62  ;;  %1225 = vst.msk [vmem:[#allocation5 + $0x58] sm:$0xff] (%p269_p0), %vm1213_vm10, %v10216_v62 }
0x108a   :  { %1226 = vst.msk [vmem:[#allocation5 + $0x60] sm:$0xff] (%p269_p0), %vm1213_vm10, %v10216_v62  ;;  %1227 = vst.msk [vmem:[#allocation5 + $0x68] sm:$0xff] (%p269_p0), %vm1213_vm10, %v10216_v62 }
0x108b   :  { %1228 = vst.msk [vmem:[#allocation5 + $0x70] sm:$0xff] (%p269_p0), %vm1213_vm10, %v10216_v62  ;;  %1229 = vst.msk [vmem:[#allocation5 + $0x78] sm:$0xff] (%p269_p0), %vm1213_vm10, %v10216_v62 }
0x108c   :  { %1230 = vst.msk [vmem:[#allocation5 + $0x80] sm:$0xff] (%p269_p0), %vm1213_vm10, %v10216_v62  ;;  %1231 = vst.msk [vmem:[#allocation5 + $0x88] sm:$0xff] (%p269_p0), %vm1213_vm10, %v10216_v62 }
0x108d   :  { %1232 = vst.msk [vmem:[#allocation5 + $0x90] sm:$0xff] (%p269_p0), %vm1213_vm10, %v10216_v62  ;;  %1233 = vst.msk [vmem:[#allocation5 + $0x98] sm:$0xff] (%p269_p0), %vm1213_vm10, %v10216_v62 }
0x108e   :  { %1234 = vst.msk [vmem:[#allocation5 + $0xa0] sm:$0xff] (%p269_p0), %vm1213_vm10, %v10216_v62  ;;  %1235 = vst.msk [vmem:[#allocation5 + $0xa8] sm:$0xff] (%p269_p0), %vm1213_vm10, %v10216_v62 }
0x108f   :  { %1236 = vst.msk [vmem:[#allocation5 + $0xb0] sm:$0xff] (%p269_p0), %vm1213_vm10, %v10216_v62  ;;  %1237 = vst.msk [vmem:[#allocation5 + $0xb8] sm:$0xff] (%p269_p0), %vm1213_vm10, %v10216_v62 }
0x1090   :  { %1238 = vst.msk [vmem:[#allocation5 + $0xc0] sm:$0xff] (%p269_p0), %vm1213_vm10, %v10216_v62  ;;  %1239 = vst.msk [vmem:[#allocation5 + $0xc8] sm:$0xff] (%p269_p0), %vm1213_vm10, %v10216_v62 }
0x1091   :  { %1240 = vst.msk [vmem:[#allocation5 + $0xd0] sm:$0xff] (%p269_p0), %vm1213_vm10, %v10216_v62  ;;  %1241 = vst.msk [vmem:[#allocation5 + $0xd8] sm:$0xff] (%p269_p0), %vm1213_vm10, %v10216_v62 }
0x1092   :  { %1242 = vst.msk [vmem:[#allocation5 + $0xe0] sm:$0xff] (%p269_p0), %vm1213_vm10, %v10216_v62  ;;  %1243 = vst.msk [vmem:[#allocation5 + $0xe8] sm:$0xff] (%p269_p0), %vm1213_vm10, %v10216_v62 }
0x1093   :  { %1244 = vst.msk [vmem:[#allocation5 + $0xf0] sm:$0xff] (%p269_p0), %vm1213_vm10, %v10216_v62  ;;  %1245 = vst.msk [vmem:[#allocation5 + $0xf8] sm:$0xff] (%p269_p0), %vm1213_vm10, %v10216_v62 }
0x1094   :  { %4847 = vst.msk [vmem:[#allocation7] sm:$0xff] (%p269_p0), %vm1213_vm10, %v10216_v62  ;;  %4848 = vst.msk [vmem:[#allocation7 + $0x8] sm:$0xff] (%p269_p0), %vm1213_vm10, %v10216_v62 }
0x1095   :  { %4849 = vst.msk [vmem:[#allocation7 + $0x10] sm:$0xff] (%p269_p0), %vm1213_vm10, %v10216_v62  ;;  %4850 = vst.msk [vmem:[#allocation7 + $0x18] sm:$0xff] (%p269_p0), %vm1213_vm10, %v10216_v62 }
0x1096   :  { %4851 = vst.msk [vmem:[#allocation7 + $0x20] sm:$0xff] (%p269_p0), %vm1213_vm10, %v10216_v62  ;;  %4852 = vst.msk [vmem:[#allocation7 + $0x28] sm:$0xff] (%p269_p0), %vm1213_vm10, %v10216_v62 }
0x1097   :  { %4853 = vst.msk [vmem:[#allocation7 + $0x30] sm:$0xff] (%p269_p0), %vm1213_vm10, %v10216_v62  ;;  %4854 = vst.msk [vmem:[#allocation7 + $0x38] sm:$0xff] (%p269_p0), %vm1213_vm10, %v10216_v62 }
0x1098   :  { %4855 = vst.msk [vmem:[#allocation7 + $0x40] sm:$0xff] (%p269_p0), %vm1213_vm10, %v10216_v62  ;;  %4856 = vst.msk [vmem:[#allocation7 + $0x48] sm:$0xff] (%p269_p0), %vm1213_vm10, %v10216_v62 }
0x1099   :  { %4857 = vst.msk [vmem:[#allocation7 + $0x50] sm:$0xff] (%p269_p0), %vm1213_vm10, %v10216_v62  ;;  %4858 = vst.msk [vmem:[#allocation7 + $0x58] sm:$0xff] (%p269_p0), %vm1213_vm10, %v10216_v62 }
0x109a   :  { %4859 = vst.msk [vmem:[#allocation7 + $0x60] sm:$0xff] (%p269_p0), %vm1213_vm10, %v10216_v62  ;;  %4860 = vst.msk [vmem:[#allocation7 + $0x68] sm:$0xff] (%p269_p0), %vm1213_vm10, %v10216_v62 }
0x109b   :  { %4861 = vst.msk [vmem:[#allocation7 + $0x70] sm:$0xff] (%p269_p0), %vm1213_vm10, %v10216_v62  ;;  %4862 = vst.msk [vmem:[#allocation7 + $0x78] sm:$0xff] (%p269_p0), %vm1213_vm10, %v10216_v62 }
0x109c   :  { %4864 = vst.msk [vmem:[#allocation7 + $0x88] sm:$0xff] (%p269_p0), %vm1213_vm10, %v10216_v62  ;;  %4865 = vst.msk [vmem:[#allocation7 + $0x90] sm:$0xff] (%p269_p0), %vm1213_vm10, %v10216_v62 }
0x109d   :  { %4866 = vst.msk [vmem:[#allocation7 + $0x98] sm:$0xff] (%p269_p0), %vm1213_vm10, %v10216_v62  ;;  %4867 = vst.msk [vmem:[#allocation7 + $0xa0] sm:$0xff] (%p269_p0), %vm1213_vm10, %v10216_v62 }
0x109e   :  { %4868 = vst.msk [vmem:[#allocation7 + $0xa8] sm:$0xff] (%p269_p0), %vm1213_vm10, %v10216_v62  ;;  %4869 = vst.msk [vmem:[#allocation7 + $0xb0] sm:$0xff] (%p269_p0), %vm1213_vm10, %v10216_v62 }
0x109f   :  { %4870 = vst.msk [vmem:[#allocation7 + $0xb8] sm:$0xff] (%p269_p0), %vm1213_vm10, %v10216_v62  ;;  %4871 = vst.msk [vmem:[#allocation7 + $0xc0] sm:$0xff] (%p269_p0), %vm1213_vm10, %v10216_v62 }
0x10a0   :  { %4872 = vst.msk [vmem:[#allocation7 + $0xc8] sm:$0xff] (%p269_p0), %vm1213_vm10, %v10216_v62  ;;  %4873 = vst.msk [vmem:[#allocation7 + $0xd0] sm:$0xff] (%p269_p0), %vm1213_vm10, %v10216_v62 }
0x10a1   :  { %4874 = vst.msk [vmem:[#allocation7 + $0xd8] sm:$0xff] (%p269_p0), %vm1213_vm10, %v10216_v62  ;;  %4875 = vst.msk [vmem:[#allocation7 + $0xe0] sm:$0xff] (%p269_p0), %vm1213_vm10, %v10216_v62 }
0x10a2   :  { %4876 = vst.msk [vmem:[#allocation7 + $0xe8] sm:$0xff] (%p269_p0), %vm1213_vm10, %v10216_v62  ;;  %4877 = vst.msk [vmem:[#allocation7 + $0xf0] sm:$0xff] (%p269_p0), %vm1213_vm10, %v10216_v62 }
0x10a3   :  { %4878 = vst.msk [vmem:[#allocation7 + $0xf8] sm:$0xff] (%p269_p0), %vm1213_vm10, %v10216_v62  ;;  %4879 = vst.msk [vmem:[#allocation7 + $0x100] sm:$0xff] (%p269_p0), %vm1213_vm10, %v10216_v62 }
0x10a4   :  { %4863 = vst.msk [vmem:[#allocation7 + $0x80] sm:$0xf] (%p269_p0), %vm3311_vm12, %v10216_v62  ;;  %4880 = vst.msk [vmem:[#allocation7 + $0x108] sm:$0xf] (%p269_p0), %vm3311_vm12, %v10216_v62 }
0x10e6   : > { %v981_v13 = vpop.permute.xlu0 %980 }
0x10e7   : > { %v983_v14 = vmul.f32 %v10175_v12, %v981_v13 }
0x10e9   : > { %985 = vrot.lane.b32.xlu1 %v983_v14, %s10212_s6 }
0x115b   : > { %v986_v25 = vpop.permute.xlu1 %985 }
0x115c   : > { %v988_v15 = vadd.f32 %v986_v25, %v978_v30 }
0x115e   : > { %10176 = vtanh.f32 %v988_v15 }
0x1168   : > { %v10177_v16 = vpop.eup %10176 }
0x1169   : > { %991 = vrot.lane.b32.xlu0 %v10177_v16, %s10212_s6 }
0x11db   : > { %v992_v17 = vpop.permute.xlu0 %991 }
0x11dc   : > { %v994_v18 = vmul.f32 %v10175_v12, %v992_v17 }
0x11de   : > { %996 = vrot.lane.b32.xlu1 %v994_v18, %s10213_s27 }
0x1250   : > { %v997_v19 = vpop.permute.xlu1 %996 }
0x1251   : > { %999 = vst.msk [vmem:[#allocation2 + $0xa] sm:$0x3] %vm483_vm6, %v997_v19  ;;  %8930 = vmatmul.mubr.msk.f32.vlgmr.msra.gmra.mrb[6].mxu1 %vm82_vm1, %v997_v19 }
0x1252   :  { %8992 = vmatprep.mubr.msk.f32.mxu1 (%p269_p0), %vm10215_vm9, %v10216_v62 }
0x1324   : > { %v1069_v21 = vpop.f32.mrb[6].mxu1 }
0x1325   : > { %v1073_v22 = vadd.f32 %v1069_v21, %v1000_v20  ;;  %v8931_v23 = vpop.f32.mrb[7].mxu1 }
0x1326   :  { %v1474_v23 = vld [vmem:[%s12663_s23 + $0x8] sm:$0xf] (%p269_p0) }
0x1327   : > { %10178 = vtanh.f32 %v1073_v22  ;;  %v7912_v27 = vmul.f32 -1.442695, %v1073_v22  ;;  %v10585_v22 = vld [vmem:[%s12663_s23] sm:$0xff] (%p269_p0) }
0x1329   : > { %10180 = vpow2.f32 %v7912_v27 }
0x1331   : > { %v10179_v26 = vpop.eup %10178 }
0x1332   : > { %1083 = vrot.lane.b32.xlu0 %v10179_v26, %s10211_s26  ;;  %v9780_v26 = vpack.c.bf16 (%p269_p0), %v1474_v23, %v10585_v22 }
0x1333   : > { %v10181_v28 = vpop.eup %10180 }
0x1334   : > { %v1077_v29 = vadd.f32 1.0, %v10181_v28  ;;  %9782 = vmatpush3.bf16.msk.msra.mxu1 (%p269_p0), %vm10339_vm3, %v9780_v26 }
0x1335   :  { %9787 = vmatprep.subr.bf16.mxu1 (%p269_p0), %v10214_v60 }
0x1336   : > { %10182 = vrcp.f32 %v1077_v29 }
0x1340   : > { %v10183_v31 = vpop.eup %10182 }
0x1341   : > { %v1081_v34 = vmul.f32 %v10183_v31, %v988_v15 }
0x13a4   : > { %v1084_v32 = vpop.permute.xlu0 %1083 }
0x13a5   : > { %v1086_v33 = vmul.f32 %v10183_v31, %v1084_v32 }
0x13a7   : > { %1088 = vrot.lane.b32.xlu1 %v1086_v33, %s10212_s6 }
0x1419   : > { %v1089_v35 = vpop.permute.xlu1 %1088 }
0x141a   : > { %v1091_v36 = vadd.f32 %v1089_v35, %v1081_v34 }
0x141c   : > { %10184 = vtanh.f32 %v1091_v36 }
0x1426   : > { %v10185_v37 = vpop.eup %10184 }
0x1427   : > { %1094 = vrot.lane.b32.xlu0 %v10185_v37, %s10212_s6  ;;  %v1928_v37 = vld [vmem:[%s12663_s23 + $0x8] sm:$0xf] (%p269_p0) }
0x1499   : > { %v1095_v38 = vpop.permute.xlu0 %1094 }
0x149a   : > { %v1097_v39 = vmul.f32 %v10183_v31, %v1095_v38 }
0x149c   : > { %1099 = vrot.lane.b32.xlu1 %v1097_v39, %s10213_s27 }
0x150e   : > { %v1100_v40 = vpop.permute.xlu1 %1099 }
0x150f   : > { %1102 = vst.msk [vmem:[#allocation2 + $0xc] sm:$0x3] %vm483_vm6, %v1100_v40  ;;  %8937 = vmatmul.mubr.msk.f32.vlgmr.msra.gmra.mrb[8].mxu0 %vm82_vm1, %v1100_v40 }
0x1510   :  { %8943 = vmatprep.mubr.msk.f32.mxu0 (%p269_p0), %vm10215_vm9, %v10216_v62  ;;  %9778 = vmatpush3.bf16.msk.msra.mxu0 (%p269_p0), %vm10339_vm3, %v9776_v61 }
0x1511   :  { %9783 = vmatprep.subr.bf16.mxu0 (%p269_p0), %v10214_v60 }
0x15e2   : > { %v1172_v42 = vpop.f32.mrb[8].mxu0 }
0x15e3   : > { %v1176_v43 = vadd.f32 %v1172_v42, %v1103_v41  ;;  %v8938_v24 = vpop.f32.mrb[9].mxu0  ;;  %v9788_v41 = vpack.c.bf16 (%p269_p0), %v1928_v37, %v10585_v22 }
0x15e5   : > { %10186 = vtanh.f32 %v1176_v43  ;;  %v7915_v45 = vmul.f32 -1.442695, %v1176_v43 }
0x15e7   : > { %10188 = vpow2.f32 %v7915_v45 }
0x15ef   : > { %v10187_v44 = vpop.eup %10186 }
0x15f0   : > { %1186 = vrot.lane.b32.xlu0 %v10187_v44, %s10211_s26 }
0x15f1   : > { %v10189_v46 = vpop.eup %10188 }
0x15f2   : > { %v1180_v47 = vadd.f32 1.0, %v10189_v46 }
0x15f4   : > { %10190 = vrcp.f32 %v1180_v47 }
0x15fe   : > { %v10191_v48 = vpop.eup %10190 }
0x15ff   : > { %v1184_v51 = vmul.f32 %v10191_v48, %v1091_v36  ;;  %v10750_v36 = vld [vmem:[%s12664_s25] ss:$0 sm:$0xff] (%p269_p0) }
0x1662   : > { %v1187_v49 = vpop.permute.xlu0 %1186 }
0x1663   : > { %v1189_v50 = vmul.f32 %v10191_v48, %v1187_v49 }
0x1665   : > { %1191 = vrot.lane.b32.xlu1 %v1189_v50, %s10212_s6 }
0x16d7   : > { %v1192_v52 = vpop.permute.xlu1 %1191 }
0x16d8   : > { %v1194_v53 = vadd.f32 %v1192_v52, %v1184_v51 }
0x16da   : > { %10192 = vtanh.f32 %v1194_v53 }
0x16e4   : > { %v10193_v54 = vpop.eup %10192 }
0x16e5   : > { %1197 = vrot.lane.b32.xlu0 %v10193_v54, %s10212_s6 }
0x1757   : > { %v1198_v55 = vpop.permute.xlu0 %1197 }
0x1758   : > { %v1200_v56 = vmul.f32 %v10191_v48, %v1198_v55 }
0x175a   : > { %1202 = vrot.lane.b32.xlu1 %v1200_v56, %s10213_s27 }
0x17c9   :  { %271 = sbr.rel (!%p269_p0) target bundleno = 451 (0x1c3), region = 133 }
0x17cc   : > { %v1203_v57 = vpop.permute.xlu1 %1202 }
0x17cd   : > { %1205 = vst.msk [vmem:[#allocation2 + $0xe] sm:$0x3] %vm483_vm6, %v1203_v57 }
0x17ce   : > { %1208 = vst.msk [vmem:[%s1206_s0] sm:$0x1] %vm1207_vm7, %v1203_v57 }
0x17cf   : > { %7916 = vst.msk [vmem:[%s1206_s0 + $0x77] sm:$0x2] %vm1211_vm8, %v1203_v57 }
0x17d6   :  { %v1246_v0 = vld [vmem:[#allocation4] sm:$0xff]  ;;  %v1247_v3 = vld [vmem:[#allocation4 + $0x8] sm:$0xff]  ;;  %v1248_v4 = vld [vmem:[#allocation4 + $0x10] sm:$0xff] }
0x17d7   :  { %8944 = vmatmul.mubr.msk.f32.vlgmr.msra.gmra.mrb[0].mxu0 %vm82_vm1, %v1246_v0  ;;  %v1249_v5 = vld [vmem:[#allocation4 + $0x18] sm:$0xff]  ;;  %v1250_v6 = vld [vmem:[#allocation4 + $0x20] sm:$0xff]  ;;  %v1251_v7 = vld [vmem:[#allocation4 + $0x28] sm:$0xff] }
0x17d8   :  { %9786 = vmatpush3.bf16.msk.msra.mxu0 %vm10339_vm3, %v9784_v1  ;;  %8946 = vmatprep.mubr.msk.f32.mxu0 %vm10215_vm9, %v10216_v62  ;;  %v1252_v8 = vld [vmem:[#allocation4 + $0x30] sm:$0xff]  ;;  %v1253_v9 = vld [vmem:[#allocation4 + $0x38] sm:$0xff]  ;;  %v1254_v10 = vld [vmem:[#allocation4 + $0x40] sm:$0xff] }
0x17d9   :  { %v1255_v11 = vld [vmem:[#allocation4 + $0x48] sm:$0xff]  ;;  %v1256_v12 = vld [vmem:[#allocation4 + $0x50] sm:$0xff]  ;;  %v1257_v13 = vld [vmem:[#allocation4 + $0x58] sm:$0xff] }
0x17da   :  { %v1258_v14 = vld [vmem:[#allocation4 + $0x60] sm:$0xff]  ;;  %v1259_v30 = vld [vmem:[#allocation4 + $0x68] sm:$0xff]  ;;  %v1260_v25 = vld [vmem:[#allocation4 + $0x70] sm:$0xff] }
0x17db   :  { %8947 = vmatmul.mubr.msk.f32.gmra.mrb[2].mxu0 %vm82_vm1, %v1247_v3  ;;  %v1700_v15 = vld [vmem:[#allocation4 + $0x78] sm:$0xff]  ;;  %v1701_v16 = vld [vmem:[#allocation4 + $0x80] sm:$0xff]  ;;  %v1702_v17 = vld [vmem:[#allocation4 + $0x88] sm:$0xff] }
0x17dc   :  { %8949 = vmatprep.mubr.msk.f32.mxu0 %vm10215_vm9, %v10216_v62  ;;  %v1703_v18 = vld [vmem:[#allocation4 + $0x90] sm:$0xff]  ;;  %v1704_v19 = vld [vmem:[#allocation4 + $0x98] sm:$0xff]  ;;  %v1705_v20 = vld [vmem:[#allocation4 + $0xa0] sm:$0xff] }
0x17dd   :  { %v1706_v21 = vld [vmem:[#allocation4 + $0xa8] sm:$0xff]  ;;  %v1707_v27 = vld [vmem:[#allocation4 + $0xb0] sm:$0xff]  ;;  %v1708_v28 = vld [vmem:[#allocation4 + $0xb8] sm:$0xff] }
0x17de   :  { %v1709_v29 = vld [vmem:[#allocation4 + $0xc0] sm:$0xff]  ;;  %v1710_v31 = vld [vmem:[#allocation4 + $0xc8] sm:$0xff]  ;;  %v1711_v32 = vld [vmem:[#allocation4 + $0xd0] sm:$0xff] }
0x17df   :  { %8950 = vmatmul.mubr.msk.f32.gmra.mrb[4].mxu0 %vm82_vm1, %v1248_v4  ;;  %v1712_v33 = vld [vmem:[#allocation4 + $0xd8] sm:$0xff]  ;;  %v1713_v34 = vld [vmem:[#allocation4 + $0xe0] sm:$0xff]  ;;  %v1714_v35 = vld [vmem:[#allocation4 + $0xe8] sm:$0xff] }
0x17e0   :  { %8952 = vmatprep.mubr.msk.f32.mxu0 %vm10215_vm9, %v10216_v62 }
0x17e3   :  { %8953 = vmatmul.mubr.msk.f32.gmra.mrb[6].mxu0 %vm82_vm1, %v1249_v5 }
0x17e4   :  { %8955 = vmatprep.mubr.msk.f32.mxu0 %vm10215_vm9, %v10216_v62 }
0x17e7   :  { %8956 = vmatmul.mubr.msk.f32.gmra.mrb[8].mxu0 %vm82_vm1, %v1250_v6 }
0x17e8   :  { %8958 = vmatprep.mubr.msk.f32.mxu0 %vm10215_vm9, %v10216_v62 }
0x17eb   :  { %8959 = vmatmul.mubr.msk.f32.gmra.mrb[10].mxu0 %vm82_vm1, %v1251_v7 }
0x17ec   :  { %8961 = vmatprep.mubr.msk.f32.mxu0 %vm10215_vm9, %v10216_v62 }
0x17ef   :  { %8962 = vmatmul.mubr.msk.f32.gmra.mrb[12].mxu0 %vm82_vm1, %v1252_v8 }
0x17f0   :  { %8964 = vmatprep.mubr.msk.f32.mxu0 %vm10215_vm9, %v10216_v62 }
0x17f3   :  { %8965 = vmatmul.mubr.msk.f32.gmra.mrb[14].mxu0 %vm82_vm1, %v1253_v9 }
0x17f4   :  { %8967 = vmatprep.mubr.msk.f32.mxu0 %vm10215_vm9, %v10216_v62 }
0x17f7   :  { %8968 = vmatmul.mubr.msk.f32.gmra.mrb[16].mxu0 %vm82_vm1, %v1254_v10 }
0x17f8   :  { %8970 = vmatprep.mubr.msk.f32.mxu0 %vm10215_vm9, %v10216_v62 }
0x17fb   :  { %8971 = vmatmul.mubr.msk.f32.gmra.mrb[18].mxu0 %vm82_vm1, %v1255_v11 }
0x17fc   :  { %8973 = vmatprep.mubr.msk.f32.mxu0 %vm10215_vm9, %v10216_v62 }
0x17ff   :  { %8974 = vmatmul.mubr.msk.f32.gmra.mrb[20].mxu0 %vm82_vm1, %v1256_v12 }
0x1800   :  { %8976 = vmatprep.mubr.msk.f32.mxu0 %vm10215_vm9, %v10216_v62 }
0x1803   :  { %8977 = vmatmul.mubr.msk.f32.gmra.mrb[22].mxu0 %vm82_vm1, %v1257_v13 }
0x1804   :  { %8979 = vmatprep.mubr.msk.f32.mxu0 %vm10215_vm9, %v10216_v62 }
0x1807   :  { %8980 = vmatmul.mubr.msk.f32.gmra.mrb[24].mxu0 %vm82_vm1, %v1258_v14 }
0x1808   :  { %8982 = vmatprep.mubr.msk.f32.mxu0 %vm10215_vm9, %v10216_v62 }
0x180b   :  { %8983 = vmatmul.mubr.msk.f32.gmra.mrb[26].mxu0 %vm82_vm1, %v1259_v30 }
0x180c   :  { %8985 = vmatprep.mubr.msk.f32.mxu0 %vm10215_vm9, %v10216_v62 }
0x180f   :  { %8986 = vmatmul.mubr.msk.f32.gmra.mrb[28].mxu0 %vm82_vm1, %v1260_v25 }
0x1810   :  { %9041 = vmatprep.mubr.msk.f32.mxu0 %vm10215_vm9, %v10216_v62 }
0x1813   :  { %9042 = vmatmul.mubr.msk.f32.vlgmr.msra.gmra.mrb[30].mxu0 %vm82_vm1, %v1700_v15 }
0x1814   :  { %9044 = vmatprep.mubr.msk.f32.mxu0 %vm10215_vm9, %v10216_v62 }
0x1817   :  { %9045 = vmatmul.mubr.msk.f32.gmra.mrb[32].mxu0 %vm82_vm1, %v1701_v16 }
0x1818   :  { %9047 = vmatprep.mubr.msk.f32.mxu0 %vm10215_vm9, %v10216_v62 }
0x181b   :  { %9048 = vmatmul.mubr.msk.f32.gmra.mrb[34].mxu0 %vm82_vm1, %v1702_v17 }
0x181c   :  { %9050 = vmatprep.mubr.msk.f32.mxu0 %vm10215_vm9, %v10216_v62 }
0x181f   :  { %9051 = vmatmul.mubr.msk.f32.gmra.mrb[36].mxu0 %vm82_vm1, %v1703_v18 }
0x1820   :  { %9053 = vmatprep.mubr.msk.f32.mxu0 %vm10215_vm9, %v10216_v62 }
0x1823   :  { %9054 = vmatmul.mubr.msk.f32.gmra.mrb[38].mxu0 %vm82_vm1, %v1704_v19 }
0x1824   :  { %9056 = vmatprep.mubr.msk.f32.mxu0 %vm10215_vm9, %v10216_v62 }
0x1827   :  { %9057 = vmatmul.mubr.msk.f32.gmra.mrb[40].mxu0 %vm82_vm1, %v1705_v20 }
0x1828   :  { %9059 = vmatprep.mubr.msk.f32.mxu0 %vm10215_vm9, %v10216_v62 }
0x182b   :  { %9060 = vmatmul.mubr.msk.f32.gmra.mrb[42].mxu0 %vm82_vm1, %v1706_v21 }
0x182c   :  { %9062 = vmatprep.mubr.msk.f32.mxu0 %vm10215_vm9, %v10216_v62 }
0x182f   :  { %9063 = vmatmul.mubr.msk.f32.gmra.mrb[44].mxu0 %vm82_vm1, %v1707_v27 }
0x1830   :  { %9065 = vmatprep.mubr.msk.f32.mxu0 %vm10215_vm9, %v10216_v62 }
0x1833   :  { %9066 = vmatmul.mubr.msk.f32.gmra.mrb[46].mxu0 %vm82_vm1, %v1708_v28 }
0x1834   :  { %9068 = vmatprep.mubr.msk.f32.mxu0 %vm10215_vm9, %v10216_v62 }
0x1837   :  { %9069 = vmatmul.mubr.msk.f32.gmra.mrb[48].mxu0 %vm82_vm1, %v1709_v29 }
0x1838   :  { %9071 = vmatprep.mubr.msk.f32.mxu0 %vm10215_vm9, %v10216_v62 }
0x183b   :  { %9072 = vmatmul.mubr.msk.f32.gmra.mrb[50].mxu0 %vm82_vm1, %v1710_v31 }
0x183c   :  { %9074 = vmatprep.mubr.msk.f32.mxu0 %vm10215_vm9, %v10216_v62 }
0x183f   :  { %9075 = vmatmul.mubr.msk.f32.gmra.mrb[52].mxu0 %vm82_vm1, %v1711_v32 }
0x1840   :  { %9077 = vmatprep.mubr.msk.f32.mxu0 %vm10215_vm9, %v10216_v62 }
0x1843   :  { %9078 = vmatmul.mubr.msk.f32.gmra.mrb[54].mxu0 %vm82_vm1, %v1712_v33 }
0x1844   :  { %9080 = vmatprep.mubr.msk.f32.mxu0 %vm10215_vm9, %v10216_v62 }
0x1847   :  { %9081 = vmatmul.mubr.msk.f32.gmra.mrb[56].mxu0 %vm82_vm1, %v1713_v34 }
0x1848   :  { %9083 = vmatprep.mubr.msk.f32.mxu0 %vm10215_vm9, %v10216_v62 }
0x184b   :  { %9084 = vmatmul.mubr.msk.f32.gmra.mrb[58].mxu0 %vm82_vm1, %v1714_v35 }
0x18aa   :  { %v1384_v38 = vpop.f32.mrb[0].mxu0 }
0x18ab   :  { %v1385_v39 = vadd.f32 %v10750_v36, %v1384_v38  ;;  %v8945_v40 = vpop.f32.mrb[1].mxu0 }
0x18ad   :  { %v1458_v42 = vmax.f32 %v1385_v39, 0.0 }
0x18ae   :  { %v1389_v43 = vpop.f32.mrb[2].mxu0 }
0x18af   :  { %v1390_v24 = vadd.f32 %v10750_v36, %v1389_v43  ;;  %v8948_v44 = vpop.f32.mrb[3].mxu0  ;;  %8993 = vmatmul.mubr.msk.f32.vlgmr.msra.gmra.mrb[0].mxu1 %vm82_vm1, %v1458_v42 }
0x18b0   :  { %9790 = vmatpush3.bf16.msk.msra.mxu1 %vm10339_vm3, %v9788_v41  ;;  %8995 = vmatprep.mubr.msk.f32.mxu1 %vm10215_vm9, %v10216_v62 }
0x18b1   :  { %v1459_v45 = vmax.f32 %v1390_v24, 0.0 }
0x18b2   :  { %v1394_v46 = vpop.f32.mrb[4].mxu0 }
0x18b3   :  { %v1395_v47 = vadd.f32 %v10750_v36, %v1394_v46  ;;  %v8951_v48 = vpop.f32.mrb[5].mxu0  ;;  %8996 = vmatmul.mubr.msk.f32.gmra.mrb[2].mxu1 %vm82_vm1, %v1459_v45 }
0x18b4   :  { %8998 = vmatprep.mubr.msk.f32.mxu1 %vm10215_vm9, %v10216_v62 }
0x18b5   :  { %v1460_v49 = vmax.f32 %v1395_v47, 0.0 }
0x18b6   :  { %v1399_v50 = vpop.f32.mrb[6].mxu0 }
0x18b7   :  { %v1400_v51 = vadd.f32 %v10750_v36, %v1399_v50  ;;  %v8954_v52 = vpop.f32.mrb[7].mxu0  ;;  %8999 = vmatmul.mubr.msk.f32.gmra.mrb[4].mxu1 %vm82_vm1, %v1460_v49 }
0x18b8   :  { %9001 = vmatprep.mubr.msk.f32.mxu1 %vm10215_vm9, %v10216_v62 }
0x18b9   :  { %v1461_v2 = vmax.f32 %v1400_v51, 0.0 }
0x18ba   :  { %v1404_v53 = vpop.f32.mrb[8].mxu0 }
0x18bb   :  { %v1405_v54 = vadd.f32 %v10750_v36, %v1404_v53  ;;  %v8957_v55 = vpop.f32.mrb[9].mxu0  ;;  %9002 = vmatmul.mubr.msk.f32.gmra.mrb[6].mxu1 %vm82_vm1, %v1461_v2 }
0x18bc   :  { %9004 = vmatprep.mubr.msk.f32.mxu1 %vm10215_vm9, %v10216_v62 }
0x18bd   :  { %v1462_v56 = vmax.f32 %v1405_v54, 0.0 }
0x18be   :  { %v1409_v57 = vpop.f32.mrb[10].mxu0 }
0x18bf   :  { %v1410_v58 = vadd.f32 %v10750_v36, %v1409_v57  ;;  %v8960_v59 = vpop.f32.mrb[11].mxu0  ;;  %9005 = vmatmul.mubr.msk.f32.gmra.mrb[8].mxu1 %vm82_vm1, %v1462_v56 }
0x18c0   :  { %9007 = vmatprep.mubr.msk.f32.mxu1 %vm10215_vm9, %v10216_v62 }
0x18c1   :  { %v1463_v61 = vmax.f32 %v1410_v58, 0.0 }
0x18c2   :  { %v1414_v63 = vpop.f32.mrb[12].mxu0 }
0x18c3   :  { %v1415_v0 = vadd.f32 %v10750_v36, %v1414_v63  ;;  %v8963_v1 = vpop.f32.mrb[13].mxu0  ;;  %9008 = vmatmul.mubr.msk.f32.gmra.mrb[10].mxu1 %vm82_vm1, %v1463_v61 }
0x18c4   :  { %9010 = vmatprep.mubr.msk.f32.mxu1 %vm10215_vm9, %v10216_v62 }
0x18c5   :  { %v1464_v3 = vmax.f32 %v1415_v0, 0.0 }
0x18c6   :  { %v1419_v4 = vpop.f32.mrb[14].mxu0 }
0x18c7   :  { %v1420_v5 = vadd.f32 %v10750_v36, %v1419_v4  ;;  %v8966_v6 = vpop.f32.mrb[15].mxu0  ;;  %9011 = vmatmul.mubr.msk.f32.gmra.mrb[12].mxu1 %vm82_vm1, %v1464_v3 }
0x18c8   :  { %9013 = vmatprep.mubr.msk.f32.mxu1 %vm10215_vm9, %v10216_v62 }
0x18c9   :  { %v1465_v7 = vmax.f32 %v1420_v5, 0.0 }
0x18ca   :  { %v1424_v8 = vpop.f32.mrb[16].mxu0 }
0x18cb   :  { %v1425_v9 = vadd.f32 %v10750_v36, %v1424_v8  ;;  %v8969_v10 = vpop.f32.mrb[17].mxu0  ;;  %9014 = vmatmul.mubr.msk.f32.gmra.mrb[14].mxu1 %vm82_vm1, %v1465_v7 }
0x18cc   :  { %9016 = vmatprep.mubr.msk.f32.mxu1 %vm10215_vm9, %v10216_v62 }
0x18cd   :  { %v1466_v11 = vmax.f32 %v1425_v9, 0.0 }
0x18ce   :  { %v1429_v12 = vpop.f32.mrb[18].mxu0 }
0x18cf   :  { %v1430_v13 = vadd.f32 %v10750_v36, %v1429_v12  ;;  %v8972_v14 = vpop.f32.mrb[19].mxu0  ;;  %9017 = vmatmul.mubr.msk.f32.gmra.mrb[16].mxu1 %vm82_vm1, %v1466_v11 }
0x18d0   :  { %9019 = vmatprep.mubr.msk.f32.mxu1 %vm10215_vm9, %v10216_v62 }
0x18d1   :  { %v1467_v30 = vmax.f32 %v1430_v13, 0.0 }
0x18d2   :  { %v1434_v25 = vpop.f32.mrb[20].mxu0 }
0x18d3   :  { %v1435_v15 = vadd.f32 %v10750_v36, %v1434_v25  ;;  %v8975_v16 = vpop.f32.mrb[21].mxu0  ;;  %9020 = vmatmul.mubr.msk.f32.gmra.mrb[18].mxu1 %vm82_vm1, %v1467_v30 }
0x18d4   :  { %9022 = vmatprep.mubr.msk.f32.mxu1 %vm10215_vm9, %v10216_v62  ;;  %v7985_v16 = vld [vmem:[%s12631_s12 + $0x8] sm:$0x3f] }
0x18d5   :  { %v1468_v17 = vmax.f32 %v1435_v15, 0.0  ;;  %9135 = vmatprep.subr.msk.mxu0 %vm2238_vm11, %v7985_v16 }
0x18d6   :  { %v1439_v18 = vpop.f32.mrb[22].mxu0  ;;  %9136 = vmatpush3.msk.msra.mxu0 %vm2238_vm11, %v7985_v16 }
0x18d7   :  { %v1440_v19 = vadd.f32 %v10750_v36, %v1439_v18  ;;  %v8978_v20 = vpop.f32.mrb[23].mxu0  ;;  %9023 = vmatmul.mubr.msk.f32.gmra.mrb[20].mxu1 %vm82_vm1, %v1468_v17 }
0x18d8   :  { %9025 = vmatprep.mubr.msk.f32.mxu1 %vm10215_vm9, %v10216_v62 }
0x18d9   :  { %v1469_v21 = vmax.f32 %v1440_v19, 0.0 }
0x18da   :  { %v1444_v22 = vpop.f32.mrb[24].mxu0 }
0x18db   :  { %v1445_v23 = vadd.f32 %v10750_v36, %v1444_v22  ;;  %v8981_v26 = vpop.f32.mrb[25].mxu0  ;;  %9026 = vmatmul.mubr.msk.f32.gmra.mrb[22].mxu1 %vm82_vm1, %v1469_v21 }
0x18dc   :  { %9028 = vmatprep.mubr.msk.f32.mxu1 %vm10215_vm9, %v10216_v62 }
0x18dd   :  { %v1470_v27 = vmax.f32 %v1445_v23, 0.0 }
0x18de   :  { %v1449_v28 = vpop.f32.mrb[26].mxu0 }
0x18df   :  { %v1450_v29 = vadd.f32 %v10750_v36, %v1449_v28  ;;  %v8984_v31 = vpop.f32.mrb[27].mxu0  ;;  %9029 = vmatmul.mubr.msk.f32.gmra.mrb[24].mxu1 %vm82_vm1, %v1470_v27 }
0x18e0   :  { %9031 = vmatprep.mubr.msk.f32.mxu1 %vm10215_vm9, %v10216_v62 }
0x18e1   :  { %v1471_v32 = vmax.f32 %v1450_v29, 0.0 }
0x18e2   :  { %v1454_v33 = vpop.f32.mrb[28].mxu0 }
0x18e3   :  { %v1455_v34 = vadd.f32 %v10750_v36, %v1454_v33  ;;  %v8987_v35 = vpop.f32.mrb[29].mxu0  ;;  %9032 = vmatmul.mubr.msk.f32.gmra.mrb[26].mxu1 %vm82_vm1, %v1471_v32 }
0x18e4   :  { %9034 = vmatprep.mubr.msk.f32.mxu1 %vm10215_vm9, %v10216_v62 }
0x18e5   :  { %v1472_v37 = vmax.f32 %v1455_v34, 0.0 }
0x18e6   :  { %v1838_v38 = vpop.f32.mrb[30].mxu0 }
0x18e7   :  { %v1839_v39 = vadd.f32 %v10750_v36, %v1838_v38  ;;  %9035 = vmatmul.mubr.msk.f32.gmra.mrb[28].mxu1 %vm82_vm1, %v1472_v37  ;;  %v9043_v40 = vpop.f32.mrb[31].mxu0  ;;  %v8075_v38 = vld [vmem:[%s12631_s12 + $0x8] sm:$0x3f] }
0x18e8   :  { %9090 = vmatprep.mubr.msk.f32.mxu1 %vm10215_vm9, %v10216_v62  ;;  %9265 = vmatprep.subr.msk.mxu1 %vm2238_vm11, %v8075_v38  ;;  %v10900_v40 = vld [vmem:[%s12630_s11] ss:$0 sm:$0xff] }
0x18e9   :  { %v1912_v41 = vmax.f32 %v1839_v39, 0.0  ;;  %v10893_v39 = vld [vmem:[%s12631_s12] sm:$0x3f] }
0x18ea   :  { %v1843_v42 = vpop.f32.mrb[32].mxu0 }
0x18eb   :  { %v1844_v43 = vadd.f32 %v10750_v36, %v1843_v42  ;;  %v9046_v24 = vpop.f32.mrb[33].mxu0  ;;  %9091 = vmatmul.mubr.msk.f32.vlgmr.msra.gmra.mrb[30].mxu1 %vm82_vm1, %v1912_v41 }
0x18ec   :  { %9093 = vmatprep.mubr.msk.f32.mxu1 %vm10215_vm9, %v10216_v62  ;;  %9266 = vmatpush3.msk.msra.mxu1 %vm2238_vm11, %v8075_v38 }
0x18ed   :  { %v1913_v44 = vmax.f32 %v1844_v43, 0.0  ;;  %9291 = vmatprep.subr.msk.mxu1 %vm2238_vm11, %v10893_v39 }
0x18ee   :  { %v1848_v45 = vpop.f32.mrb[34].mxu0 }
0x18ef   :  { %v1849_v46 = vadd.f32 %v10750_v36, %v1848_v45  ;;  %v9049_v47 = vpop.f32.mrb[35].mxu0  ;;  %9094 = vmatmul.mubr.msk.f32.gmra.mrb[32].mxu1 %vm82_vm1, %v1913_v44 }
0x18f0   :  { %9096 = vmatprep.mubr.msk.f32.mxu1 %vm10215_vm9, %v10216_v62 }
0x18f1   :  { %v1914_v48 = vmax.f32 %v1849_v46, 0.0 }
0x18f2   :  { %v1853_v49 = vpop.f32.mrb[36].mxu0 }
0x18f3   :  { %v1854_v50 = vadd.f32 %v10750_v36, %v1853_v49  ;;  %v9052_v51 = vpop.f32.mrb[37].mxu0  ;;  %9097 = vmatmul.mubr.msk.f32.gmra.mrb[34].mxu1 %vm82_vm1, %v1914_v48 }
0x18f4   :  { %9099 = vmatprep.mubr.msk.f32.mxu1 %vm10215_vm9, %v10216_v62 }
0x18f5   :  { %v1915_v52 = vmax.f32 %v1854_v50, 0.0 }
0x18f6   :  { %v1858_v2 = vpop.f32.mrb[38].mxu0 }
0x18f7   :  { %v1859_v53 = vadd.f32 %v10750_v36, %v1858_v2  ;;  %v9055_v54 = vpop.f32.mrb[39].mxu0  ;;  %9100 = vmatmul.mubr.msk.f32.gmra.mrb[36].mxu1 %vm82_vm1, %v1915_v52 }
0x18f8   :  { %9102 = vmatprep.mubr.msk.f32.mxu1 %vm10215_vm9, %v10216_v62 }
0x18f9   :  { %v1916_v55 = vmax.f32 %v1859_v53, 0.0 }
0x18fa   :  { %v1863_v56 = vpop.f32.mrb[40].mxu0 }
0x18fb   :  { %v1864_v57 = vadd.f32 %v10750_v36, %v1863_v56  ;;  %v9058_v58 = vpop.f32.mrb[41].mxu0  ;;  %9103 = vmatmul.mubr.msk.f32.gmra.mrb[38].mxu1 %vm82_vm1, %v1916_v55 }
0x18fc   :  { %9105 = vmatprep.mubr.msk.f32.mxu1 %vm10215_vm9, %v10216_v62  ;;  %v10913_v58 = vld [vmem:[%s12631_s12 + $0x10] sm:$0x3f] }
0x18fd   :  { %v1917_v59 = vmax.f32 %v1864_v57, 0.0 }
0x18fe   :  { %v1868_v61 = vpop.f32.mrb[42].mxu0 }
0x18ff   :  { %v1869_v63 = vadd.f32 %v10750_v36, %v1868_v61  ;;  %v9061_v0 = vpop.f32.mrb[43].mxu0  ;;  %9106 = vmatmul.mubr.msk.f32.gmra.mrb[40].mxu1 %vm82_vm1, %v1917_v59 }
0x1900   :  { %9108 = vmatprep.mubr.msk.f32.mxu1 %vm10215_vm9, %v10216_v62 }
0x1901   :  { %v1918_v1 = vmax.f32 %v1869_v63, 0.0 }
0x1902   :  { %v1873_v3 = vpop.f32.mrb[44].mxu0 }
0x1903   :  { %v1874_v4 = vadd.f32 %v10750_v36, %v1873_v3  ;;  %v9064_v5 = vpop.f32.mrb[45].mxu0  ;;  %9109 = vmatmul.mubr.msk.f32.gmra.mrb[42].mxu1 %vm82_vm1, %v1918_v1 }
0x1904   :  { %9111 = vmatprep.mubr.msk.f32.mxu1 %vm10215_vm9, %v10216_v62 }
0x1905   :  { %v1919_v6 = vmax.f32 %v1874_v4, 0.0 }
0x1906   :  { %v1878_v7 = vpop.f32.mrb[46].mxu0 }
0x1907   :  { %v1879_v8 = vadd.f32 %v10750_v36, %v1878_v7  ;;  %v9067_v9 = vpop.f32.mrb[47].mxu0  ;;  %9112 = vmatmul.mubr.msk.f32.gmra.mrb[44].mxu1 %vm82_vm1, %v1919_v6 }
0x1908   :  { %9114 = vmatprep.mubr.msk.f32.mxu1 %vm10215_vm9, %v10216_v62 }
0x1909   :  { %v1920_v10 = vmax.f32 %v1879_v8, 0.0 }
0x190a   :  { %v1883_v11 = vpop.f32.mrb[48].mxu0 }
0x190b   :  { %v1884_v12 = vadd.f32 %v10750_v36, %v1883_v11  ;;  %v9070_v13 = vpop.f32.mrb[49].mxu0  ;;  %9115 = vmatmul.mubr.msk.f32.gmra.mrb[46].mxu1 %vm82_vm1, %v1920_v10 }
0x190c   :  { %9117 = vmatprep.mubr.msk.f32.mxu1 %vm10215_vm9, %v10216_v62 }
0x190d   :  { %v1921_v14 = vmax.f32 %v1884_v12, 0.0 }
0x190e   :  { %v1888_v30 = vpop.f32.mrb[50].mxu0 }
0x190f   :  { %v1889_v25 = vadd.f32 %v10750_v36, %v1888_v30  ;;  %v9073_v15 = vpop.f32.mrb[51].mxu0  ;;  %9118 = vmatmul.mubr.msk.f32.gmra.mrb[48].mxu1 %vm82_vm1, %v1921_v14 }
0x1910   :  { %9120 = vmatprep.mubr.msk.f32.mxu1 %vm10215_vm9, %v10216_v62 }
0x1911   :  { %v1922_v17 = vmax.f32 %v1889_v25, 0.0 }
0x1912   :  { %v1893_v18 = vpop.f32.mrb[52].mxu0 }
0x1913   :  { %v1894_v19 = vadd.f32 %v10750_v36, %v1893_v18  ;;  %v9076_v20 = vpop.f32.mrb[53].mxu0  ;;  %9121 = vmatmul.mubr.msk.f32.gmra.mrb[50].mxu1 %vm82_vm1, %v1922_v17 }
0x1914   :  { %9123 = vmatprep.mubr.msk.f32.mxu1 %vm10215_vm9, %v10216_v62 }
0x1915   :  { %v1923_v21 = vmax.f32 %v1894_v19, 0.0 }
0x1916   :  { %v1898_v22 = vpop.f32.mrb[54].mxu0 }
0x1917   :  { %v1899_v23 = vadd.f32 %v10750_v36, %v1898_v22  ;;  %v9079_v26 = vpop.f32.mrb[55].mxu0  ;;  %9124 = vmatmul.mubr.msk.f32.gmra.mrb[52].mxu1 %vm82_vm1, %v1923_v21 }
0x1918   :  { %9126 = vmatprep.mubr.msk.f32.mxu1 %vm10215_vm9, %v10216_v62 }
0x1919   :  { %v1924_v27 = vmax.f32 %v1899_v23, 0.0 }
0x191a   :  { %v1903_v28 = vpop.f32.mrb[56].mxu0 }
0x191b   :  { %v1904_v29 = vadd.f32 %v10750_v36, %v1903_v28  ;;  %v9082_v31 = vpop.f32.mrb[57].mxu0  ;;  %9127 = vmatmul.mubr.msk.f32.gmra.mrb[54].mxu1 %vm82_vm1, %v1924_v27 }
0x191c   :  { %9129 = vmatprep.mubr.msk.f32.mxu1 %vm10215_vm9, %v10216_v62 }
0x191d   :  { %v1925_v32 = vmax.f32 %v1904_v29, 0.0 }
0x191e   :  { %v1908_v33 = vpop.f32.mrb[58].mxu0 }
0x191f   :  { %v1909_v34 = vadd.f32 %v10750_v36, %v1908_v33  ;;  %v9085_v35 = vpop.f32.mrb[59].mxu0  ;;  %9130 = vmatmul.mubr.msk.f32.gmra.mrb[56].mxu1 %vm82_vm1, %v1925_v32  ;;  %v2171_v36 = vld [vmem:[%s12631_s12] sm:$0x3f] }
0x1920   :  { %9132 = vmatprep.mubr.msk.f32.mxu1 %vm10215_vm9, %v10216_v62  ;;  %9161 = vmatprep.subr.msk.mxu0 %vm2238_vm11, %v2171_v36 }
0x1921   :  { %v1926_v37 = vmax.f32 %v1909_v34, 0.0 }
0x1923   :  { %9133 = vmatmul.mubr.msk.f32.gmra.mrb[58].mxu1 %vm82_vm1, %v1926_v37 }
0x1982   :  { %v1596_v41 = vpop.f32.mrb[0].mxu1 }
0x1983   :  { %v1597_v42 = vadd.f32 %v10900_v40, %v1596_v41  ;;  %v8994_v43 = vpop.f32.mrb[1].mxu1 }
0x1985   :  { %v1670_v24 = vmax.f32 %v1597_v42, 0.0 }
0x1986   :  { %v1601_v44 = vpop.f32.mrb[2].mxu1 }
0x1987   :  { %1685 = vst.msk [vmem:[#allocation5 + $0x4] sm:$0xff] %vm1213_vm10, %v1670_v24  ;;  %v1602_v45 = vadd.f32 %v10900_v40, %v1601_v44  ;;  %v8997_v46 = vpop.f32.mrb[3].mxu1 }
0x1989   :  { %v1671_v47 = vmax.f32 %v1602_v45, 0.0 }
0x198a   :  { %v1606_v48 = vpop.f32.mrb[4].mxu1 }
0x198b   :  { %1686 = vst.msk [vmem:[#allocation5 + $0xc] sm:$0xff] %vm1213_vm10, %v1671_v47  ;;  %v1607_v49 = vadd.f32 %v10900_v40, %v1606_v48  ;;  %v9000_v50 = vpop.f32.mrb[5].mxu1 }
0x198d   :  { %v1672_v51 = vmax.f32 %v1607_v49, 0.0 }
0x198e   :  { %v1611_v52 = vpop.f32.mrb[6].mxu1  ;;  %v2172_v2 = vld [vmem:[#allocation5 + $0x3] sm:$0xff] }
0x198f   :  { %1687 = vst.msk [vmem:[#allocation5 + $0x14] sm:$0xff] %vm1213_vm10, %v1672_v51  ;;  %v1612_v53 = vadd.f32 %v10900_v40, %v1611_v52  ;;  %v9003_v54 = vpop.f32.mrb[7].mxu1  ;;  %9137 = vmatprep.mubr.msk.f32.mxu0 %vm1213_vm10, %v2172_v2 }
0x1991   :  { %v1673_v55 = vmax.f32 %v1612_v53, 0.0 }
0x1992   :  { %v1616_v56 = vpop.f32.mrb[8].mxu1  ;;  %v2173_v57 = vld [vmem:[#allocation5 + $0xb] sm:$0xff] }
0x1993   :  { %1688 = vst.msk [vmem:[#allocation5 + $0x1c] sm:$0xff] %vm1213_vm10, %v1673_v55  ;;  %v1617_v59 = vadd.f32 %v10900_v40, %v1616_v56  ;;  %v9006_v61 = vpop.f32.mrb[9].mxu1  ;;  %9138 = vmatmul.mubr.msk.f32.vlgmr.msra.gmra.mrb[60].mxu0 %vm1213_vm10, %v2173_v57 }
0x1994   :  { %9162 = vmatpush3.msk.msra.mxu0 %vm2238_vm11, %v2171_v36 }
0x1995   :  { %v1674_v63 = vmax.f32 %v1617_v59, 0.0  ;;  %9187 = vmatprep.subr.msk.mxu0 %vm2238_vm11, %v10913_v58 }
0x1996   :  { %v1621_v0 = vpop.f32.mrb[10].mxu1  ;;  %v2174_v1 = vld [vmem:[#allocation5 + $0x13] sm:$0xff] }
0x1997   :  { %1689 = vst.msk [vmem:[#allocation5 + $0x24] sm:$0xff] %vm1213_vm10, %v1674_v63  ;;  %v1622_v3 = vadd.f32 %v10900_v40, %v1621_v0  ;;  %v9009_v4 = vpop.f32.mrb[11].mxu1  ;;  %9140 = vmatprep.mubr.msk.f32.mxu0 %vm1213_vm10, %v2174_v1 }
0x1999   :  { %v1675_v5 = vmax.f32 %v1622_v3, 0.0 }
0x199a   :  { %v1626_v6 = vpop.f32.mrb[12].mxu1  ;;  %v2175_v7 = vld [vmem:[#allocation5 + $0x1b] sm:$0xff] }
0x199b   :  { %1690 = vst.msk [vmem:[#allocation5 + $0x2c] sm:$0xff] %vm1213_vm10, %v1675_v5  ;;  %v1627_v8 = vadd.f32 %v10900_v40, %v1626_v6  ;;  %v9012_v9 = vpop.f32.mrb[13].mxu1  ;;  %9141 = vmatmul.mubr.msk.f32.gmra.mrb[62].mxu0 %vm1213_vm10, %v2175_v7  ;;  %v2155_v7 = vld [vmem:[#allocation5 + $0x4] sm:$0xff] }
0x199d   :  { %v1676_v10 = vmax.f32 %v1627_v8, 0.0 }
0x199e   :  { %v1631_v11 = vpop.f32.mrb[14].mxu1  ;;  %v2176_v12 = vld [vmem:[#allocation5 + $0x23] sm:$0xff] }
0x199f   :  { %1691 = vst.msk [vmem:[#allocation5 + $0x34] sm:$0xff] %vm1213_vm10, %v1676_v10  ;;  %v1632_v13 = vadd.f32 %v10900_v40, %v1631_v11  ;;  %v9015_v14 = vpop.f32.mrb[15].mxu1  ;;  %9143 = vmatprep.mubr.msk.f32.mxu0 %vm1213_vm10, %v2176_v12 }
0x19a0   :  { %v10968_v14 = vld [vmem:[%s12631_s12 + $0x18] sm:$0x3f] }
0x19a1   :  { %v1677_v30 = vmax.f32 %v1632_v13, 0.0  ;;  %v2156_v13 = vld [vmem:[#allocation5 + $0xc] sm:$0xff] }
0x19a2   :  { %v1636_v25 = vpop.f32.mrb[16].mxu1  ;;  %v2177_v15 = vld [vmem:[#allocation5 + $0x2b] sm:$0xff] }
0x19a3   :  { %1692 = vst.msk [vmem:[#allocation5 + $0x3c] sm:$0xff] %vm1213_vm10, %v1677_v30  ;;  %v1637_v16 = vadd.f32 %v10900_v40, %v1636_v25  ;;  %v9018_v17 = vpop.f32.mrb[17].mxu1  ;;  %9144 = vmatmul.mubr.msk.f32.gmra.mrb[64].mxu0 %vm1213_vm10, %v2177_v15  ;;  %v2157_v30 = vld [vmem:[#allocation5 + $0x14] sm:$0xff] }
0x19a4   :  { %v10979_v17 = vld [vmem:[%s12631_s12 + $0x10] sm:$0x3f] }
0x19a5   :  { %v1678_v18 = vmax.f32 %v1637_v16, 0.0 }
0x19a6   :  { %v1641_v19 = vpop.f32.mrb[18].mxu1  ;;  %v2178_v20 = vld [vmem:[#allocation5 + $0x33] sm:$0xff] }
0x19a7   :  { %1693 = vst.msk [vmem:[#allocation5 + $0x44] sm:$0xff] %vm1213_vm10, %v1678_v18  ;;  %v1642_v21 = vadd.f32 %v10900_v40, %v1641_v19  ;;  %v9021_v22 = vpop.f32.mrb[19].mxu1  ;;  %9146 = vmatprep.mubr.msk.f32.mxu0 %vm1213_vm10, %v2178_v20  ;;  %v2158_v20 = vld [vmem:[#allocation5 + $0x1c] sm:$0xff] }
0x19a9   :  { %v1679_v23 = vmax.f32 %v1642_v21, 0.0 }
0x19aa   :  { %v1646_v26 = vpop.f32.mrb[20].mxu1  ;;  %v2179_v27 = vld [vmem:[#allocation5 + $0x3b] sm:$0xff] }
0x19ab   :  { %1694 = vst.msk [vmem:[#allocation5 + $0x4c] sm:$0xff] %vm1213_vm10, %v1679_v23  ;;  %v1647_v28 = vadd.f32 %v10900_v40, %v1646_v26  ;;  %v9024_v29 = vpop.f32.mrb[21].mxu1  ;;  %9147 = vmatmul.mubr.msk.f32.gmra.mrb[66].mxu0 %vm1213_vm10, %v2179_v27 }
0x19ac   :  { %v2161_v29 = vld [vmem:[#allocation5 + $0x34] sm:$0xff] }
0x19ad   :  { %v1680_v31 = vmax.f32 %v1647_v28, 0.0  ;;  %v2160_v28 = vld [vmem:[#allocation5 + $0x2c] sm:$0xff] }
0x19ae   :  { %v1651_v32 = vpop.f32.mrb[22].mxu1  ;;  %v2180_v33 = vld [vmem:[#allocation5 + $0x43] sm:$0xff] }
0x19af   :  { %1695 = vst.msk [vmem:[#allocation5 + $0x54] sm:$0xff] %vm1213_vm10, %v1680_v31  ;;  %v1652_v34 = vadd.f32 %v10900_v40, %v1651_v32  ;;  %v9027_v35 = vpop.f32.mrb[23].mxu1  ;;  %9149 = vmatprep.mubr.msk.f32.mxu0 %vm1213_vm10, %v2180_v33 }
0x19b0   :  { %v2162_v35 = vld [vmem:[#allocation5 + $0x3c] sm:$0xff] }
0x19b1   :  { %v1681_v37 = vmax.f32 %v1652_v34, 0.0 }
0x19b2   :  { %v1656_v38 = vpop.f32.mrb[24].mxu1  ;;  %v2181_v36 = vld [vmem:[#allocation5 + $0x4b] sm:$0xff] }
0x19b3   :  { %1696 = vst.msk [vmem:[#allocation5 + $0x5c] sm:$0xff] %vm1213_vm10, %v1681_v37  ;;  %v1657_v41 = vadd.f32 %v10900_v40, %v1656_v38  ;;  %v9030_v42 = vpop.f32.mrb[25].mxu1  ;;  %9150 = vmatmul.mubr.msk.f32.gmra.mrb[68].mxu0 %vm1213_vm10, %v2181_v36  ;;  %v2163_v37 = vld [vmem:[#allocation5 + $0x44] sm:$0xff] }
0x19b5   :  { %v1682_v43 = vmax.f32 %v1657_v41, 0.0 }
0x19b6   :  { %v1661_v24 = vpop.f32.mrb[26].mxu1  ;;  %v2182_v44 = vld [vmem:[#allocation5 + $0x53] sm:$0xff] }
0x19b7   :  { %1697 = vst.msk [vmem:[#allocation5 + $0x64] sm:$0xff] %vm1213_vm10, %v1682_v43  ;;  %v1662_v45 = vadd.f32 %v10900_v40, %v1661_v24  ;;  %v9033_v46 = vpop.f32.mrb[27].mxu1  ;;  %9152 = vmatprep.mubr.msk.f32.mxu0 %vm1213_vm10, %v2182_v44  ;;  %v2164_v24 = vld [vmem:[#allocation5 + $0x4c] sm:$0xff]  ;;  %v2165_v44 = vld [vmem:[#allocation5 + $0x54] sm:$0xff] }
0x19b9   :  { %v1683_v47 = vmax.f32 %v1662_v45, 0.0 }
0x19ba   :  { %v1666_v48 = vpop.f32.mrb[28].mxu1  ;;  %v2183_v49 = vld [vmem:[#allocation5 + $0x5b] sm:$0xff] }
0x19bb   :  { %1698 = vst.msk [vmem:[#allocation5 + $0x6c] sm:$0xff] %vm1213_vm10, %v1683_v47  ;;  %v1667_v50 = vadd.f32 %v10900_v40, %v1666_v48  ;;  %v9036_v51 = vpop.f32.mrb[29].mxu1  ;;  %9153 = vmatmul.mubr.msk.f32.gmra.mrb[70].mxu0 %vm1213_vm10, %v2183_v49 }
0x19bd   :  { %v1684_v52 = vmax.f32 %v1667_v50, 0.0  ;;  %v2166_v50 = vld [vmem:[#allocation5 + $0x5c] sm:$0xff] }
0x19be   :  { %v2050_v2 = vpop.f32.mrb[30].mxu1  ;;  %v2184_v53 = vld [vmem:[#allocation5 + $0x63] sm:$0xff] }
0x19bf   :  { %1699 = vst.msk [vmem:[#allocation5 + $0x74] sm:$0xff] %vm1213_vm10, %v1684_v52  ;;  %v2051_v54 = vadd.f32 %v10900_v40, %v2050_v2  ;;  %v9092_v55 = vpop.f32.mrb[31].mxu1  ;;  %9155 = vmatprep.mubr.msk.f32.mxu0 %vm1213_vm10, %v2184_v53  ;;  %v2167_v51 = vld [vmem:[#allocation5 + $0x64] sm:$0xff] }
0x19c1   :  { %v2124_v56 = vmax.f32 %v2051_v54, 0.0 }
0x19c2   :  { %v2055_v57 = vpop.f32.mrb[32].mxu1  ;;  %v2185_v59 = vld [vmem:[#allocation5 + $0x6b] sm:$0xff] }
0x19c3   :  { %2140 = vst.msk [vmem:[#allocation5 + $0x84] sm:$0xff] %vm1213_vm10, %v2124_v56  ;;  %v2056_v61 = vadd.f32 %v10900_v40, %v2055_v57  ;;  %v9095_v63 = vpop.f32.mrb[33].mxu1  ;;  %9156 = vmatmul.mubr.msk.f32.gmra.mrb[72].mxu0 %vm1213_vm10, %v2185_v59  ;;  %v2168_v56 = vld [vmem:[#allocation5 + $0x6c] sm:$0xff] }
0x19c5   :  { %v2125_v0 = vmax.f32 %v2056_v61, 0.0  ;;  %v2170_v61 = vld [vmem:[#allocation5 + $0x7c] sm:$0xf] }
0x19c6   :  { %v2060_v1 = vpop.f32.mrb[34].mxu1  ;;  %v2186_v3 = vld [vmem:[#allocation5 + $0x73] sm:$0xff]  ;;  %v2187_v4 = vld [vmem:[#allocation5 + $0x7b] sm:$0xf] }
0x19c7   :  { %2141 = vst.msk [vmem:[#allocation5 + $0x8c] sm:$0xff] %vm1213_vm10, %v2125_v0  ;;  %v2061_v5 = vadd.f32 %v10900_v40, %v2060_v1  ;;  %v9098_v6 = vpop.f32.mrb[35].mxu1  ;;  %9158 = vmatprep.mubr.msk.f32.mxu0 %vm1213_vm10, %v2186_v3  ;;  %v2169_v57 = vld [vmem:[#allocation5 + $0x74] sm:$0xff] }
0x19c8   :  { %9159 = vmatmul.mubr.msk.f32.gmra.mrb[74].mxu0 %vm1213_vm10, %v2187_v4  ;;  %v2583_v4 = vld [vmem:[#allocation5 + $0x2] sm:$0xff] }
0x19c9   :  { %v2126_v8 = vmax.f32 %v2061_v5, 0.0  ;;  %9163 = vmatprep.mubr.msk.f32.mxu0 %vm1213_vm10, %v2155_v7 }
0x19ca   :  { %v2065_v9 = vpop.f32.mrb[36].mxu1  ;;  %v3330_v10 = vld [vmem:[#allocation5 + $0x83] sm:$0xff] }
0x19cb   :  { %2142 = vst.msk [vmem:[#allocation5 + $0x94] sm:$0xff] %vm1213_vm10, %v2126_v8  ;;  %v2066_v11 = vadd.f32 %v10900_v40, %v2065_v9  ;;  %v9101_v12 = vpop.f32.mrb[37].mxu1  ;;  %9267 = vmatprep.mubr.msk.f32.mxu1 %vm1213_vm10, %v3330_v10  ;;  %v2584_v10 = vld [vmem:[#allocation5 + $0xa] sm:$0xff] }
0x19cc   :  { %9164 = vmatmul.mubr.msk.f32.vlgmr.msra.gmra.mrb[60].mxu0 %vm1213_vm10, %v2156_v13  ;;  %v2585_v12 = vld [vmem:[#allocation5 + $0x12] sm:$0xff] }
0x19cd   :  { %v2127_v25 = vmax.f32 %v2066_v11, 0.0  ;;  %9166 = vmatprep.mubr.msk.f32.mxu0 %vm1213_vm10, %v2157_v30  ;;  %9188 = vmatpush3.msk.msra.mxu0 %vm2238_vm11, %v10913_v58  ;;  %v2159_v58 = vld [vmem:[#allocation5 + $0x24] sm:$0xff]  ;;  %v11026_v11 = vld [vmem:[%s12631_s12 + $0x20] sm:$0x3f] }
0x19ce   :  { %v2070_v15 = vpop.f32.mrb[38].mxu1  ;;  %v3331_v16 = vld [vmem:[#allocation5 + $0x8b] sm:$0xff]  ;;  %9213 = vmatprep.subr.msk.mxu0 %vm2238_vm11, %v10968_v14 }
0x19cf   :  { %2143 = vst.msk [vmem:[#allocation5 + $0x9c] sm:$0xff] %vm1213_vm10, %v2127_v25  ;;  %v2071_v18 = vadd.f32 %v10900_v40, %v2070_v15  ;;  %v9104_v19 = vpop.f32.mrb[39].mxu1  ;;  %9268 = vmatmul.mubr.msk.f32.vlgmr.msra.gmra.mrb[60].mxu1 %vm1213_vm10, %v3331_v16 }
0x19d0   :  { %9167 = vmatmul.mubr.msk.f32.gmra.mrb[62].mxu0 %vm1213_vm10, %v2158_v20  ;;  %9292 = vmatpush3.msk.msra.mxu1 %vm2238_vm11, %v10893_v39  ;;  %v2587_v19 = vld [vmem:[#allocation5 + $0x22] sm:$0xff] }
0x19d1   :  { %v2128_v21 = vmax.f32 %v2071_v18, 0.0  ;;  %9169 = vmatprep.mubr.msk.f32.mxu0 %vm1213_vm10, %v2159_v58  ;;  %9317 = vmatprep.subr.msk.mxu1 %vm2238_vm11, %v10979_v17  ;;  %v2586_v18 = vld [vmem:[#allocation5 + $0x1a] sm:$0xff] }
0x19d2   :  { %v2075_v22 = vpop.f32.mrb[40].mxu1  ;;  %v3332_v23 = vld [vmem:[#allocation5 + $0x93] sm:$0xff] }
0x19d3   :  { %2144 = vst.msk [vmem:[#allocation5 + $0xa4] sm:$0xff] %vm1213_vm10, %v2128_v21  ;;  %v2076_v26 = vadd.f32 %v10900_v40, %v2075_v22  ;;  %v9107_v27 = vpop.f32.mrb[41].mxu1  ;;  %9270 = vmatprep.mubr.msk.f32.mxu1 %vm1213_vm10, %v3332_v23  ;;  %v2588_v23 = vld [vmem:[#allocation5 + $0x2a] sm:$0xff] }
0x19d4   :  { %9170 = vmatmul.mubr.msk.f32.gmra.mrb[64].mxu0 %vm1213_vm10, %v2160_v28 }
0x19d5   :  { %v2129_v39 = vmax.f32 %v2076_v26, 0.0  ;;  %9172 = vmatprep.mubr.msk.f32.mxu0 %vm1213_vm10, %v2161_v29  ;;  %v2589_v26 = vld [vmem:[#allocation5 + $0x32] sm:$0xff] }
0x19d6   :  { %v2080_v31 = vpop.f32.mrb[42].mxu1  ;;  %v3333_v32 = vld [vmem:[#allocation5 + $0x9b] sm:$0xff] }
0x19d7   :  { %2145 = vst.msk [vmem:[#allocation5 + $0xac] sm:$0xff] %vm1213_vm10, %v2129_v39  ;;  %v2081_v33 = vadd.f32 %v10900_v40, %v2080_v31  ;;  %v9110_v34 = vpop.f32.mrb[43].mxu1  ;;  %9271 = vmatmul.mubr.msk.f32.gmra.mrb[62].mxu1 %vm1213_vm10, %v3333_v32  ;;  %v2590_v32 = vld [vmem:[#allocation5 + $0x3a] sm:$0xff] }
0x19d8   :  { %9173 = vmatmul.mubr.msk.f32.gmra.mrb[66].mxu0 %vm1213_vm10, %v2162_v35 }
0x19d9   :  { %v2130_v38 = vmax.f32 %v2081_v33, 0.0  ;;  %9175 = vmatprep.mubr.msk.f32.mxu0 %vm1213_vm10, %v2163_v37  ;;  %v2591_v33 = vld [vmem:[#allocation5 + $0x42] sm:$0xff]  ;;  %v2592_v37 = vld [vmem:[#allocation5 + $0x4a] sm:$0xff] }
0x19da   :  { %v2085_v36 = vpop.f32.mrb[44].mxu1  ;;  %v3334_v41 = vld [vmem:[#allocation5 + $0xa3] sm:$0xff] }
0x19db   :  { %2146 = vst.msk [vmem:[#allocation5 + $0xb4] sm:$0xff] %vm1213_vm10, %v2130_v38  ;;  %v2086_v42 = vadd.f32 %v10900_v40, %v2085_v36  ;;  %v9113_v43 = vpop.f32.mrb[45].mxu1  ;;  %9273 = vmatprep.mubr.msk.f32.mxu1 %vm1213_vm10, %v3334_v41  ;;  %v2593_v38 = vld [vmem:[#allocation5 + $0x52] sm:$0xff]  ;;  %v2594_v36 = vld [vmem:[#allocation5 + $0x5a] sm:$0xff]  ;;  %v2595_v41 = vld [vmem:[#allocation5 + $0x62] sm:$0xff] }
0x19dc   :  { %9176 = vmatmul.mubr.msk.f32.gmra.mrb[68].mxu0 %vm1213_vm10, %v2164_v24  ;;  %v2596_v24 = vld [vmem:[#allocation5 + $0x6a] sm:$0xff] }
0x19dd   :  { %v2131_v45 = vmax.f32 %v2086_v42, 0.0  ;;  %9178 = vmatprep.mubr.msk.f32.mxu0 %vm1213_vm10, %v2165_v44  ;;  %v2597_v44 = vld [vmem:[#allocation5 + $0x72] sm:$0xff] }
0x19de   :  { %v2090_v46 = vpop.f32.mrb[46].mxu1  ;;  %v3335_v47 = vld [vmem:[#allocation5 + $0xab] sm:$0xff] }
0x19df   :  { %2147 = vst.msk [vmem:[#allocation5 + $0xbc] sm:$0xff] %vm1213_vm10, %v2131_v45  ;;  %v2091_v48 = vadd.f32 %v10900_v40, %v2090_v46  ;;  %v9116_v49 = vpop.f32.mrb[47].mxu1  ;;  %9274 = vmatmul.mubr.msk.f32.gmra.mrb[64].mxu1 %vm1213_vm10, %v3335_v47  ;;  %v3313_v45 = vld [vmem:[#allocation5 + $0x84] sm:$0xff]  ;;  %v2598_v46 = vld [vmem:[#allocation5 + $0x7a] sm:$0xf]  ;;  %v3314_v47 = vld [vmem:[#allocation5 + $0x8c] sm:$0xff] }
0x19e0   :  { %9179 = vmatmul.mubr.msk.f32.gmra.mrb[70].mxu0 %vm1213_vm10, %v2166_v50  ;;  %v3315_v49 = vld [vmem:[#allocation5 + $0x94] sm:$0xff]  ;;  %v11066_v50 = vld [vmem:[%s12631_s12 + $0x18] sm:$0x3f] }
0x19e1   :  { %v2132_v52 = vmax.f32 %v2091_v48, 0.0  ;;  %9181 = vmatprep.mubr.msk.f32.mxu0 %vm1213_vm10, %v2167_v51  ;;  %v2813_v48 = vld [vmem:[#allocation5 + $0x1] sm:$0xff]  ;;  %v2814_v51 = vld [vmem:[#allocation5 + $0x9] sm:$0xff] }
0x19e2   :  { %v2095_v2 = vpop.f32.mrb[48].mxu1  ;;  %v3336_v53 = vld [vmem:[#allocation5 + $0xb3] sm:$0xff] }
0x19e3   :  { %2148 = vst.msk [vmem:[#allocation5 + $0xc4] sm:$0xff] %vm1213_vm10, %v2132_v52  ;;  %v2096_v54 = vadd.f32 %v10900_v40, %v2095_v2  ;;  %v9119_v55 = vpop.f32.mrb[49].mxu1  ;;  %9276 = vmatprep.mubr.msk.f32.mxu1 %vm1213_vm10, %v3336_v53  ;;  %v3316_v52 = vld [vmem:[#allocation5 + $0x9c] sm:$0xff]  ;;  %v2815_v2 = vld [vmem:[#allocation5 + $0x11] sm:$0xff]  ;;  %v3317_v53 = vld [vmem:[#allocation5 + $0xa4] sm:$0xff] }
0x19e4   :  { %9182 = vmatmul.mubr.msk.f32.gmra.mrb[72].mxu0 %vm1213_vm10, %v2168_v56  ;;  %v2817_v55 = vld [vmem:[#allocation5 + $0x21] sm:$0xff]  ;;  %v3319_v56 = vld [vmem:[#allocation5 + $0xb4] sm:$0xff] }
0x19e5   :  { %v2133_v59 = vmax.f32 %v2096_v54, 0.0  ;;  %9184 = vmatprep.mubr.msk.f32.mxu0 %vm1213_vm10, %v2169_v57  ;;  %v2816_v54 = vld [vmem:[#allocation5 + $0x19] sm:$0xff]  ;;  %v2818_v57 = vld [vmem:[#allocation5 + $0x29] sm:$0xff] }
0x19e6   :  { %v2100_v63 = vpop.f32.mrb[50].mxu1  ;;  %v3337_v0 = vld [vmem:[#allocation5 + $0xbb] sm:$0xff] }
0x19e7   :  { %2149 = vst.msk [vmem:[#allocation5 + $0xcc] sm:$0xff] %vm1213_vm10, %v2133_v59  ;;  %v2101_v1 = vadd.f32 %v10900_v40, %v2100_v63  ;;  %v9122_v3 = vpop.f32.mrb[51].mxu1  ;;  %9277 = vmatmul.mubr.msk.f32.gmra.mrb[66].mxu1 %vm1213_vm10, %v3337_v0  ;;  %v3320_v59 = vld [vmem:[#allocation5 + $0xbc] sm:$0xff] }
0x19e8   :  { %9185 = vmatmul.mubr.msk.f32.gmra.mrb[74].mxu0 %vm1213_vm10, %v2170_v61  ;;  %v2819_v61 = vld [vmem:[#allocation5 + $0x31] sm:$0xff]  ;;  %v2820_v0 = vld [vmem:[#allocation5 + $0x39] sm:$0xff]  ;;  %v2821_v3 = vld [vmem:[#allocation5 + $0x41] sm:$0xff] }
0x19e9   :  { %v2134_v5 = vmax.f32 %v2101_v1, 0.0  ;;  %9189 = vmatprep.mubr.msk.f32.mxu0 %vm1213_vm10, %v2583_v4 }
0x19ea   :  { %v2105_v6 = vpop.f32.mrb[52].mxu1  ;;  %v3338_v7 = vld [vmem:[#allocation5 + $0xc3] sm:$0xff] }
0x19eb   :  { %2150 = vst.msk [vmem:[#allocation5 + $0xd4] sm:$0xff] %vm1213_vm10, %v2134_v5  ;;  %v2106_v8 = vadd.f32 %v10900_v40, %v2105_v6  ;;  %v9125_v9 = vpop.f32.mrb[53].mxu1  ;;  %9279 = vmatprep.mubr.msk.f32.mxu1 %vm1213_vm10, %v3338_v7  ;;  %v3321_v63 = vld [vmem:[#allocation5 + $0xc4] sm:$0xff]  ;;  %v2823_v7 = vld [vmem:[#allocation5 + $0x51] sm:$0xff] }
0x19ec   :  { %9190 = vmatmul.mubr.msk.f32.vlgmr.msra.gmra.mrb[60].mxu0 %vm1213_vm10, %v2584_v10  ;;  %v2822_v5 = vld [vmem:[#allocation5 + $0x49] sm:$0xff]  ;;  %v2824_v9 = vld [vmem:[#allocation5 + $0x59] sm:$0xff] }
0x19ed   :  { %v2135_v13 = vmax.f32 %v2106_v8, 0.0  ;;  %9192 = vmatprep.mubr.msk.f32.mxu0 %vm1213_vm10, %v2585_v12  ;;  %9214 = vmatpush3.msk.msra.mxu0 %vm2238_vm11, %v10968_v14 }
0x19ee   :  { %v2110_v30 = vpop.f32.mrb[54].mxu1  ;;  %v3339_v25 = vld [vmem:[#allocation5 + $0xcb] sm:$0xff]  ;;  %9239 = vmatprep.subr.msk.mxu0 %vm2238_vm11, %v11026_v11 }
0x19ef   :  { %2151 = vst.msk [vmem:[#allocation5 + $0xdc] sm:$0xff] %vm1213_vm10, %v2135_v13  ;;  %v2111_v15 = vadd.f32 %v10900_v40, %v2110_v30  ;;  %v9128_v16 = vpop.f32.mrb[55].mxu1  ;;  %9280 = vmatmul.mubr.msk.f32.gmra.mrb[68].mxu1 %vm1213_vm10, %v3339_v25  ;;  %v3322_v1 = vld [vmem:[#allocation5 + $0xcc] sm:$0xff]  ;;  %v3328_v13 = vld [vmem:[#allocation5 + $0xfc] sm:$0xf] }
0x19f0   :  { %9193 = vmatmul.mubr.msk.f32.gmra.mrb[62].mxu0 %vm1213_vm10, %v2586_v18  ;;  %v2826_v30 = vld [vmem:[#allocation5 + $0x69] sm:$0xff]  ;;  %v2827_v25 = vld [vmem:[#allocation5 + $0x71] sm:$0xff]  ;;  %v2828_v16 = vld [vmem:[#allocation5 + $0x79] sm:$0xf] }
0x19f1   :  { %v2136_v20 = vmax.f32 %v2111_v15, 0.0  ;;  %9195 = vmatprep.mubr.msk.f32.mxu0 %vm1213_vm10, %v2587_v19  ;;  %v3739_v15 = vld [vmem:[#allocation5 + $0x82] sm:$0xff]  ;;  %v3740_v18 = vld [vmem:[#allocation5 + $0x8a] sm:$0xff] }
0x19f2   :  { %v2115_v14 = vpop.f32.mrb[56].mxu1  ;;  %v3340_v58 = vld [vmem:[#allocation5 + $0xd3] sm:$0xff]  ;;  %v3043_v19 = vld [vmem:[#allocation5] sm:$0xff] }
0x19f3   :  { %2152 = vst.msk [vmem:[#allocation5 + $0xe4] sm:$0xff] %vm1213_vm10, %v2136_v20  ;;  %v2116_v21 = vadd.f32 %v10900_v40, %v2115_v14  ;;  %v9131_v22 = vpop.f32.mrb[57].mxu1  ;;  %9282 = vmatprep.mubr.msk.f32.mxu1 %vm1213_vm10, %v3340_v58  ;;  %v3323_v4 = vld [vmem:[#allocation5 + $0xd4] sm:$0xff]  ;;  %v3044_v58 = vld [vmem:[#allocation5 + $0x8] sm:$0xff] }
0x19f4   :  { %9196 = vmatmul.mubr.msk.f32.gmra.mrb[64].mxu0 %vm1213_vm10, %v2588_v23  ;;  %v3741_v20 = vld [vmem:[#allocation5 + $0x92] sm:$0xff]  ;;  %v3743_v23 = vld [vmem:[#allocation5 + $0xa2] sm:$0xff] }
0x19f5   :  { %v2137_v27 = vmax.f32 %v2116_v21, 0.0  ;;  %9198 = vmatprep.mubr.msk.f32.mxu0 %vm1213_vm10, %v2589_v26  ;;  %v11109_v14 = vld [vmem:[%s12631_s12 + $0x20] sm:$0x3f]  ;;  %v3742_v21 = vld [vmem:[#allocation5 + $0x9a] sm:$0xff] }
0x19f6   :  { %v2120_v28 = vpop.f32.mrb[58].mxu1  ;;  %v3341_v29 = vld [vmem:[#allocation5 + $0xdb] sm:$0xff]  ;;  %v3045_v22 = vld [vmem:[#allocation5 + $0x10] sm:$0xff] }
0x19f7   :  { %2153 = vst.msk [vmem:[#allocation5 + $0xec] sm:$0xff] %vm1213_vm10, %v2137_v27  ;;  %v2121_v39 = vadd.f32 %v10900_v40, %v2120_v28  ;;  %v9134_v31 = vpop.f32.mrb[59].mxu1  ;;  %9283 = vmatmul.mubr.msk.f32.gmra.mrb[70].mxu1 %vm1213_vm10, %v3341_v29  ;;  %v3324_v6 = vld [vmem:[#allocation5 + $0xdc] sm:$0xff]  ;;  %v3744_v27 = vld [vmem:[#allocation5 + $0xaa] sm:$0xff]  ;;  %v3745_v29 = vld [vmem:[#allocation5 + $0xb2] sm:$0xff] }
0x19f8   :  { %9199 = vmatmul.mubr.msk.f32.gmra.mrb[66].mxu0 %vm1213_vm10, %v2590_v32  ;;  %v3046_v26 = vld [vmem:[#allocation5 + $0x18] sm:$0xff]  ;;  %v3047_v28 = vld [vmem:[#allocation5 + $0x20] sm:$0xff]  ;;  %v3049_v32 = vld [vmem:[#allocation5 + $0x30] sm:$0xff] }
0x19f9   :  { %v2138_v34 = vmax.f32 %v2121_v39, 0.0  ;;  %9201 = vmatprep.mubr.msk.f32.mxu0 %vm1213_vm10, %v2591_v33  ;;  %v3048_v39 = vld [vmem:[#allocation5 + $0x28] sm:$0xff]  ;;  %v3746_v31 = vld [vmem:[#allocation5 + $0xba] sm:$0xff] }
0x19fa   :  { %v3342_v35 = vld [vmem:[#allocation5 + $0xe3] sm:$0xff] }
0x19fb   :  { %2154 = vst.msk [vmem:[#allocation5 + $0xf4] sm:$0xff] %vm1213_vm10, %v2138_v34  ;;  %9285 = vmatprep.mubr.msk.f32.mxu1 %vm1213_vm10, %v3342_v35  ;;  %v3325_v8 = vld [vmem:[#allocation5 + $0xe4] sm:$0xff]  ;;  %v3050_v34 = vld [vmem:[#allocation5 + $0x38] sm:$0xff] }
0x19fc   :  { %9202 = vmatmul.mubr.msk.f32.gmra.mrb[68].mxu0 %vm1213_vm10, %v2592_v37  ;;  %v3747_v33 = vld [vmem:[#allocation5 + $0xc2] sm:$0xff]  ;;  %v3748_v35 = vld [vmem:[#allocation5 + $0xca] sm:$0xff] }
0x19fd   :  { %9204 = vmatprep.mubr.msk.f32.mxu0 %vm1213_vm10, %v2593_v38  ;;  %v3051_v37 = vld [vmem:[#allocation5 + $0x40] sm:$0xff]  ;;  %v3749_v38 = vld [vmem:[#allocation5 + $0xd2] sm:$0xff] }
0x19fe   :  { %v3343_v40 = vld [vmem:[#allocation5 + $0xeb] sm:$0xff] }
0x19ff   :  { %9286 = vmatmul.mubr.msk.f32.gmra.mrb[72].mxu1 %vm1213_vm10, %v3343_v40  ;;  %v3326_v10 = vld [vmem:[#allocation5 + $0xec] sm:$0xff] }
0x1a00   :  { %9205 = vmatmul.mubr.msk.f32.gmra.mrb[70].mxu0 %vm1213_vm10, %v2594_v36  ;;  %v3052_v40 = vld [vmem:[#allocation5 + $0x48] sm:$0xff]  ;;  %v3750_v36 = vld [vmem:[#allocation5 + $0xda] sm:$0xff] }
0x1a01   :  { %9207 = vmatprep.mubr.msk.f32.mxu0 %vm1213_vm10, %v2595_v41  ;;  %v3053_v41 = vld [vmem:[#allocation5 + $0x50] sm:$0xff] }
0x1a02   :  { %v3344_v42 = vld [vmem:[#allocation5 + $0xf3] sm:$0xff]  ;;  %v3345_v43 = vld [vmem:[#allocation5 + $0xfb] sm:$0xf] }
0x1a03   :  { %9288 = vmatprep.mubr.msk.f32.mxu1 %vm1213_vm10, %v3344_v42  ;;  %v3327_v12 = vld [vmem:[#allocation5 + $0xf4] sm:$0xff]  ;;  %v3751_v42 = vld [vmem:[#allocation5 + $0xe2] sm:$0xff] }
0x1a04   :  { %9208 = vmatmul.mubr.msk.f32.gmra.mrb[72].mxu0 %vm1213_vm10, %v2596_v24  ;;  %9289 = vmatmul.mubr.msk.f32.gmra.mrb[74].mxu1 %vm1213_vm10, %v3345_v43  ;;  %v3054_v43 = vld [vmem:[#allocation5 + $0x58] sm:$0xff]  ;;  %v3752_v24 = vld [vmem:[#allocation5 + $0xea] sm:$0xff] }
0x1a05   :  { %9210 = vmatprep.mubr.msk.f32.mxu0 %vm1213_vm10, %v2597_v44  ;;  %9293 = vmatprep.mubr.msk.f32.mxu1 %vm1213_vm10, %v3313_v45  ;;  %v3055_v44 = vld [vmem:[#allocation5 + $0x60] sm:$0xff]  ;;  %v3753_v45 = vld [vmem:[#allocation5 + $0xf2] sm:$0xff] }
0x1a08   :  { %9211 = vmatmul.mubr.msk.f32.gmra.mrb[74].mxu0 %vm1213_vm10, %v2598_v46  ;;  %9294 = vmatmul.mubr.msk.f32.vlgmr.msra.gmra.mrb[60].mxu1 %vm1213_vm10, %v3314_v47  ;;  %v3056_v46 = vld [vmem:[#allocation5 + $0x68] sm:$0xff]  ;;  %v3754_v47 = vld [vmem:[#allocation5 + $0xfa] sm:$0xf] }
0x1a09   :  { %9215 = vmatprep.mubr.msk.f32.mxu0 %vm1213_vm10, %v2813_v48  ;;  %9296 = vmatprep.mubr.msk.f32.mxu1 %vm1213_vm10, %v3315_v49  ;;  %v3057_v48 = vld [vmem:[#allocation5 + $0x70] sm:$0xff]  ;;  %v3968_v49 = vld [vmem:[#allocation5 + $0x81] sm:$0xff] }
0x1a0a   :  { %9318 = vmatpush3.msk.msra.mxu1 %vm2238_vm11, %v10979_v17  ;;  %v3318_v17 = vld [vmem:[#allocation5 + $0xac] sm:$0xff] }
0x1a0b   :  { %9343 = vmatprep.subr.msk.mxu1 %vm2238_vm11, %v11066_v50 }
0x1a0c   :  { %9216 = vmatmul.mubr.msk.f32.vlgmr.msra.gmra.mrb[60].mxu0 %vm1213_vm10, %v2814_v51  ;;  %9297 = vmatmul.mubr.msk.f32.gmra.mrb[62].mxu1 %vm1213_vm10, %v3316_v52  ;;  %v3969_v51 = vld [vmem:[#allocation5 + $0x89] sm:$0xff]  ;;  %v3970_v52 = vld [vmem:[#allocation5 + $0x91] sm:$0xff] }
0x1a0d   :  { %9218 = vmatprep.mubr.msk.f32.mxu0 %vm1213_vm10, %v2815_v2  ;;  %9299 = vmatprep.mubr.msk.f32.mxu1 %vm1213_vm10, %v3317_v53  ;;  %v3971_v2 = vld [vmem:[#allocation5 + $0x99] sm:$0xff]  ;;  %v3972_v53 = vld [vmem:[#allocation5 + $0xa1] sm:$0xff] }
0x1a0e   :  { %9240 = vmatpush3.msk.msra.mxu0 %vm2238_vm11, %v11026_v11  ;;  %v2825_v11 = vld [vmem:[#allocation5 + $0x61] sm:$0xff] }
0x1a10   :  { %9219 = vmatmul.mubr.msk.f32.gmra.mrb[62].mxu0 %vm1213_vm10, %v2816_v54  ;;  %9300 = vmatmul.mubr.msk.f32.gmra.mrb[64].mxu1 %vm1213_vm10, %v3318_v17  ;;  %v3973_v54 = vld [vmem:[#allocation5 + $0xa9] sm:$0xff]  ;;  %v3974_v17 = vld [vmem:[#allocation5 + $0xb1] sm:$0xff] }
0x1a11   :  { %9221 = vmatprep.mubr.msk.f32.mxu0 %vm1213_vm10, %v2817_v55  ;;  %9302 = vmatprep.mubr.msk.f32.mxu1 %vm1213_vm10, %v3319_v56  ;;  %v3975_v55 = vld [vmem:[#allocation5 + $0xb9] sm:$0xff]  ;;  %v3976_v56 = vld [vmem:[#allocation5 + $0xc1] sm:$0xff] }
0x1a14   :  { %9222 = vmatmul.mubr.msk.f32.gmra.mrb[64].mxu0 %vm1213_vm10, %v2818_v57  ;;  %9303 = vmatmul.mubr.msk.f32.gmra.mrb[66].mxu1 %vm1213_vm10, %v3320_v59  ;;  %v3977_v57 = vld [vmem:[#allocation5 + $0xc9] sm:$0xff]  ;;  %v3978_v59 = vld [vmem:[#allocation5 + $0xd1] sm:$0xff] }
0x1a15   :  { %9224 = vmatprep.mubr.msk.f32.mxu0 %vm1213_vm10, %v2819_v61  ;;  %9305 = vmatprep.mubr.msk.f32.mxu1 %vm1213_vm10, %v3321_v63  ;;  %v3979_v61 = vld [vmem:[#allocation5 + $0xd9] sm:$0xff]  ;;  %v3980_v63 = vld [vmem:[#allocation5 + $0xe1] sm:$0xff] }
0x1a18   :  { %9225 = vmatmul.mubr.msk.f32.gmra.mrb[66].mxu0 %vm1213_vm10, %v2820_v0  ;;  %9306 = vmatmul.mubr.msk.f32.gmra.mrb[68].mxu1 %vm1213_vm10, %v3322_v1  ;;  %v3981_v0 = vld [vmem:[#allocation5 + $0xe9] sm:$0xff]  ;;  %v3982_v1 = vld [vmem:[#allocation5 + $0xf1] sm:$0xff] }
0x1a19   :  { %9227 = vmatprep.mubr.msk.f32.mxu0 %vm1213_vm10, %v2821_v3  ;;  %9308 = vmatprep.mubr.msk.f32.mxu1 %vm1213_vm10, %v3323_v4  ;;  %v3983_v3 = vld [vmem:[#allocation5 + $0xf9] sm:$0xf]  ;;  %v4197_v4 = vld [vmem:[#allocation5 + $0x80] sm:$0xff] }
0x1a1c   :  { %9228 = vmatmul.mubr.msk.f32.gmra.mrb[68].mxu0 %vm1213_vm10, %v2822_v5  ;;  %9309 = vmatmul.mubr.msk.f32.gmra.mrb[70].mxu1 %vm1213_vm10, %v3324_v6  ;;  %v4198_v5 = vld [vmem:[#allocation5 + $0x88] sm:$0xff]  ;;  %v4199_v6 = vld [vmem:[#allocation5 + $0x90] sm:$0xff] }
0x1a1d   :  { %9230 = vmatprep.mubr.msk.f32.mxu0 %vm1213_vm10, %v2823_v7  ;;  %9311 = vmatprep.mubr.msk.f32.mxu1 %vm1213_vm10, %v3325_v8  ;;  %v4200_v7 = vld [vmem:[#allocation5 + $0x98] sm:$0xff]  ;;  %v4201_v8 = vld [vmem:[#allocation5 + $0xa0] sm:$0xff] }
0x1a20   :  { %9231 = vmatmul.mubr.msk.f32.gmra.mrb[70].mxu0 %vm1213_vm10, %v2824_v9  ;;  %9312 = vmatmul.mubr.msk.f32.gmra.mrb[72].mxu1 %vm1213_vm10, %v3326_v10  ;;  %v4202_v9 = vld [vmem:[#allocation5 + $0xa8] sm:$0xff]  ;;  %v4203_v10 = vld [vmem:[#allocation5 + $0xb0] sm:$0xff] }
0x1a21   :  { %9233 = vmatprep.mubr.msk.f32.mxu0 %vm1213_vm10, %v2825_v11  ;;  %9314 = vmatprep.mubr.msk.f32.mxu1 %vm1213_vm10, %v3327_v12  ;;  %v4204_v11 = vld [vmem:[#allocation5 + $0xb8] sm:$0xff]  ;;  %v4205_v12 = vld [vmem:[#allocation5 + $0xc0] sm:$0xff] }
0x1a24   :  { %9234 = vmatmul.mubr.msk.f32.gmra.mrb[72].mxu0 %vm1213_vm10, %v2826_v30  ;;  %9315 = vmatmul.mubr.msk.f32.gmra.mrb[74].mxu1 %vm1213_vm10, %v3328_v13  ;;  %v4206_v13 = vld [vmem:[#allocation5 + $0xc8] sm:$0xff]  ;;  %v4207_v30 = vld [vmem:[#allocation5 + $0xd0] sm:$0xff] }
0x1a25   :  { %9236 = vmatprep.mubr.msk.f32.mxu0 %vm1213_vm10, %v2827_v25  ;;  %9319 = vmatprep.mubr.msk.f32.mxu1 %vm1213_vm10, %v3739_v15  ;;  %v4208_v25 = vld [vmem:[#allocation5 + $0xd8] sm:$0xff]  ;;  %v4209_v15 = vld [vmem:[#allocation5 + $0xe0] sm:$0xff] }
0x1a28   :  { %9237 = vmatmul.mubr.msk.f32.gmra.mrb[74].mxu0 %vm1213_vm10, %v2828_v16  ;;  %9320 = vmatmul.mubr.msk.f32.vlgmr.msra.gmra.mrb[60].mxu1 %vm1213_vm10, %v3740_v18  ;;  %v4210_v16 = vld [vmem:[#allocation5 + $0xe8] sm:$0xff]  ;;  %v4211_v18 = vld [vmem:[#allocation5 + $0xf0] sm:$0xff] }
0x1a29   :  { %9241 = vmatprep.mubr.msk.f32.mxu0 %vm1213_vm10, %v3043_v19  ;;  %9322 = vmatprep.mubr.msk.f32.mxu1 %vm1213_vm10, %v3741_v20  ;;  %v4212_v19 = vld [vmem:[#allocation5 + $0xf8] sm:$0xf]  ;;  %v11186_v20 = vld [vmem:[%s12632_s13] ss:$0 sm:$0xff] }
0x1a2a   :  { %9344 = vmatpush3.msk.msra.mxu1 %vm2238_vm11, %v11066_v50  ;;  %v3058_v50 = vld [vmem:[#allocation5 + $0x78] sm:$0xf] }
0x1a2b   :  { %9369 = vmatprep.subr.msk.mxu1 %vm2238_vm11, %v11109_v14 }
0x1a2c   :  { %9242 = vmatmul.mubr.msk.f32.vlgmr.msra.gmra.mrb[60].mxu0 %vm1213_vm10, %v3044_v58  ;;  %9323 = vmatmul.mubr.msk.f32.gmra.mrb[62].mxu1 %vm1213_vm10, %v3742_v21 }
0x1a2d   :  { %9244 = vmatprep.mubr.msk.f32.mxu0 %vm1213_vm10, %v3045_v22  ;;  %9325 = vmatprep.mubr.msk.f32.mxu1 %vm1213_vm10, %v3743_v23 }
0x1a30   :  { %9245 = vmatmul.mubr.msk.f32.gmra.mrb[62].mxu0 %vm1213_vm10, %v3046_v26  ;;  %9326 = vmatmul.mubr.msk.f32.gmra.mrb[64].mxu1 %vm1213_vm10, %v3744_v27 }
0x1a31   :  { %9247 = vmatprep.mubr.msk.f32.mxu0 %vm1213_vm10, %v3047_v28  ;;  %9328 = vmatprep.mubr.msk.f32.mxu1 %vm1213_vm10, %v3745_v29 }
0x1a34   :  { %9248 = vmatmul.mubr.msk.f32.gmra.mrb[64].mxu0 %vm1213_vm10, %v3048_v39  ;;  %9329 = vmatmul.mubr.msk.f32.gmra.mrb[66].mxu1 %vm1213_vm10, %v3746_v31 }
0x1a35   :  { %9250 = vmatprep.mubr.msk.f32.mxu0 %vm1213_vm10, %v3049_v32  ;;  %9331 = vmatprep.mubr.msk.f32.mxu1 %vm1213_vm10, %v3747_v33 }
0x1a38   :  { %9251 = vmatmul.mubr.msk.f32.gmra.mrb[66].mxu0 %vm1213_vm10, %v3050_v34  ;;  %9332 = vmatmul.mubr.msk.f32.gmra.mrb[68].mxu1 %vm1213_vm10, %v3748_v35 }
0x1a39   :  { %9253 = vmatprep.mubr.msk.f32.mxu0 %vm1213_vm10, %v3051_v37  ;;  %9334 = vmatprep.mubr.msk.f32.mxu1 %vm1213_vm10, %v3749_v38 }
0x1a3c   :  { %9254 = vmatmul.mubr.msk.f32.gmra.mrb[68].mxu0 %vm1213_vm10, %v3052_v40  ;;  %9335 = vmatmul.mubr.msk.f32.gmra.mrb[70].mxu1 %vm1213_vm10, %v3750_v36 }
0x1a3d   :  { %9256 = vmatprep.mubr.msk.f32.mxu0 %vm1213_vm10, %v3053_v41  ;;  %9337 = vmatprep.mubr.msk.f32.mxu1 %vm1213_vm10, %v3751_v42 }
0x1a40   :  { %9257 = vmatmul.mubr.msk.f32.gmra.mrb[70].mxu0 %vm1213_vm10, %v3054_v43  ;;  %9338 = vmatmul.mubr.msk.f32.gmra.mrb[72].mxu1 %vm1213_vm10, %v3752_v24 }
0x1a41   :  { %9259 = vmatprep.mubr.msk.f32.mxu0 %vm1213_vm10, %v3055_v44  ;;  %9340 = vmatprep.mubr.msk.f32.mxu1 %vm1213_vm10, %v3753_v45 }
0x1a44   :  { %9260 = vmatmul.mubr.msk.f32.gmra.mrb[72].mxu0 %vm1213_vm10, %v3056_v46  ;;  %9341 = vmatmul.mubr.msk.f32.gmra.mrb[74].mxu1 %vm1213_vm10, %v3754_v47 }
0x1a45   :  { %9262 = vmatprep.mubr.msk.f32.mxu0 %vm1213_vm10, %v3057_v48  ;;  %9345 = vmatprep.mubr.msk.f32.mxu1 %vm1213_vm10, %v3968_v49 }
0x1a48   :  { %9263 = vmatmul.mubr.msk.f32.gmra.mrb[74].mxu0 %vm1213_vm10, %v3058_v50  ;;  %9346 = vmatmul.mubr.msk.f32.vlgmr.msra.gmra.mrb[60].mxu1 %vm1213_vm10, %v3969_v51 }
0x1a49   :  { %9348 = vmatprep.mubr.msk.f32.mxu1 %vm1213_vm10, %v3970_v52  ;;  %9370 = vmatpush3.msk.msra.mxu1 %vm2238_vm11, %v11109_v14 }
0x1a4c   :  { %9349 = vmatmul.mubr.msk.f32.gmra.mrb[62].mxu1 %vm1213_vm10, %v3971_v2 }
0x1a4d   :  { %9351 = vmatprep.mubr.msk.f32.mxu1 %vm1213_vm10, %v3972_v53 }
0x1a50   :  { %9352 = vmatmul.mubr.msk.f32.gmra.mrb[64].mxu1 %vm1213_vm10, %v3973_v54 }
0x1a51   :  { %9354 = vmatprep.mubr.msk.f32.mxu1 %vm1213_vm10, %v3974_v17 }
0x1a54   :  { %9355 = vmatmul.mubr.msk.f32.gmra.mrb[66].mxu1 %vm1213_vm10, %v3975_v55 }
0x1a55   :  { %9357 = vmatprep.mubr.msk.f32.mxu1 %vm1213_vm10, %v3976_v56 }
0x1a58   :  { %9358 = vmatmul.mubr.msk.f32.gmra.mrb[68].mxu1 %vm1213_vm10, %v3977_v57 }
0x1a59   :  { %9360 = vmatprep.mubr.msk.f32.mxu1 %vm1213_vm10, %v3978_v59 }
0x1a5c   :  { %9361 = vmatmul.mubr.msk.f32.gmra.mrb[70].mxu1 %vm1213_vm10, %v3979_v61 }
0x1a5d   :  { %9363 = vmatprep.mubr.msk.f32.mxu1 %vm1213_vm10, %v3980_v63 }
0x1a60   :  { %9364 = vmatmul.mubr.msk.f32.gmra.mrb[72].mxu1 %vm1213_vm10, %v3981_v0 }
0x1a61   :  { %9366 = vmatprep.mubr.msk.f32.mxu1 %vm1213_vm10, %v3982_v1 }
0x1a64   :  { %9367 = vmatmul.mubr.msk.f32.gmra.mrb[74].mxu1 %vm1213_vm10, %v3983_v3 }
0x1a65   :  { %9371 = vmatprep.mubr.msk.f32.mxu1 %vm1213_vm10, %v4197_v4 }
0x1a68   :  { %9372 = vmatmul.mubr.msk.f32.vlgmr.msra.gmra.mrb[60].mxu1 %vm1213_vm10, %v4198_v5 }
0x1a69   :  { %9374 = vmatprep.mubr.msk.f32.mxu1 %vm1213_vm10, %v4199_v6 }
0x1a6c   :  { %9375 = vmatmul.mubr.msk.f32.gmra.mrb[62].mxu1 %vm1213_vm10, %v4200_v7 }
0x1a6d   :  { %9377 = vmatprep.mubr.msk.f32.mxu1 %vm1213_vm10, %v4201_v8 }
0x1a70   :  { %9378 = vmatmul.mubr.msk.f32.gmra.mrb[64].mxu1 %vm1213_vm10, %v4202_v9 }
0x1a71   :  { %9380 = vmatprep.mubr.msk.f32.mxu1 %vm1213_vm10, %v4203_v10 }
0x1a74   :  { %9381 = vmatmul.mubr.msk.f32.gmra.mrb[66].mxu1 %vm1213_vm10, %v4204_v11 }
0x1a75   :  { %9383 = vmatprep.mubr.msk.f32.mxu1 %vm1213_vm10, %v4205_v12 }
0x1a78   :  { %9384 = vmatmul.mubr.msk.f32.gmra.mrb[68].mxu1 %vm1213_vm10, %v4206_v13 }
0x1a79   :  { %9386 = vmatprep.mubr.msk.f32.mxu1 %vm1213_vm10, %v4207_v30 }
0x1a7c   :  { %9387 = vmatmul.mubr.msk.f32.gmra.mrb[70].mxu1 %vm1213_vm10, %v4208_v25 }
0x1a7d   :  { %9389 = vmatprep.mubr.msk.f32.mxu1 %vm1213_vm10, %v4209_v15 }
0x1a80   :  { %9390 = vmatmul.mubr.msk.f32.gmra.mrb[72].mxu1 %vm1213_vm10, %v4210_v16 }
0x1a81   :  { %9392 = vmatprep.mubr.msk.f32.mxu1 %vm1213_vm10, %v4211_v18 }
0x1a84   :  { %9393 = vmatmul.mubr.msk.f32.gmra.mrb[74].mxu1 %vm1213_vm10, %v4212_v19 }
0x1aff   :  { %v9243_v14 = vpop.f32.mrb[60].mxu0 }
0x1b00   :  { %v3281_v58 = vadd.f32 %v9243_v14, %v11186_v20  ;;  %v3178_v21 = vpop.f32.mrb[61].mxu0 }
0x1b01   :  { %v3280_v22 = vadd.f32 %v11186_v20, %v3178_v21 }
0x1b02   :  { %3297 = vst.msk [vmem:[#allocation6 + $0x8] sm:$0xff] %vm1213_vm10, %v3281_v58 }
0x1b03   :  { %3296 = vst.msk [vmem:[#allocation6] sm:$0xff] %vm1213_vm10, %v3280_v22  ;;  %v9246_v23 = vpop.f32.mrb[62].mxu0 }
0x1b04   :  { %v3283_v26 = vadd.f32 %v9246_v23, %v11186_v20  ;;  %v3188_v27 = vpop.f32.mrb[63].mxu0 }
0x1b05   :  { %v3282_v28 = vadd.f32 %v11186_v20, %v3188_v27 }
0x1b06   :  { %3299 = vst.msk [vmem:[#allocation6 + $0x18] sm:$0xff] %vm1213_vm10, %v3283_v26 }
0x1b07   :  { %3298 = vst.msk [vmem:[#allocation6 + $0x10] sm:$0xff] %vm1213_vm10, %v3282_v28  ;;  %v9249_v29 = vpop.f32.mrb[64].mxu0 }
0x1b08   :  { %v3285_v39 = vadd.f32 %v9249_v29, %v11186_v20  ;;  %v3198_v31 = vpop.f32.mrb[65].mxu0 }
0x1b09   :  { %v3284_v32 = vadd.f32 %v11186_v20, %v3198_v31  ;;  %v11198_v33 = vld [vmem:[#allocation6 + $0x8] sm:$0xff] }
0x1b0a   :  { %v11200_v34 = vld [vmem:[#allocation6] sm:$0xff]  ;;  %3301 = vst.msk [vmem:[#allocation6 + $0x28] sm:$0xff] %vm1213_vm10, %v3285_v39  ;;  %v4499_v40 = vsel %vm1213_vm10, %v11198_v33, 0.0 }
0x1b0b   :  { %3300 = vst.msk [vmem:[#allocation6 + $0x20] sm:$0xff] %vm1213_vm10, %v3284_v32  ;;  %v9252_v35 = vpop.f32.mrb[66].mxu0  ;;  %v4498_v36 = vsel %vm1213_vm10, %v11200_v34, 0.0 }
0x1b0c   :  { %v3287_v37 = vadd.f32 %v9252_v35, %v11186_v20  ;;  %v3208_v38 = vpop.f32.mrb[67].mxu0  ;;  %v4500_v44 = vadd.f32 %v4499_v40, %v4498_v36 }
0x1b0d   :  { %v3286_v41 = vadd.f32 %v11186_v20, %v3208_v38  ;;  %v11218_v48 = vld [vmem:[#allocation6 + $0x18] sm:$0xff] }
0x1b0e   :  { %v11210_v42 = vld [vmem:[#allocation6 + $0x10] sm:$0xff]  ;;  %3303 = vst.msk [vmem:[#allocation6 + $0x38] sm:$0xff] %vm1213_vm10, %v3287_v37  ;;  %v4503_v53 = vsel %vm1213_vm10, %v11218_v48, 0.0 }
0x1b0f   :  { %v4501_v43 = vsel %vm1213_vm10, %v11210_v42, 0.0  ;;  %3302 = vst.msk [vmem:[#allocation6 + $0x30] sm:$0xff] %vm1213_vm10, %v3286_v41  ;;  %v9255_v24 = vpop.f32.mrb[68].mxu0 }
0x1b10   :  { %v3289_v45 = vadd.f32 %v9255_v24, %v11186_v20  ;;  %v3218_v46 = vpop.f32.mrb[69].mxu0  ;;  %v4502_v49 = vadd.f32 %v4501_v43, %v4500_v44 }
0x1b11   :  { %v3288_v47 = vadd.f32 %v11186_v20, %v3218_v46  ;;  %v11234_v63 = vld [vmem:[#allocation6 + $0x28] sm:$0xff] }
0x1b12   :  { %3305 = vst.msk [vmem:[#allocation6 + $0x48] sm:$0xff] %vm1213_vm10, %v3289_v45  ;;  %v11222_v51 = vld [vmem:[#allocation6 + $0x20] sm:$0xff]  ;;  %v4504_v17 = vadd.f32 %v4503_v53, %v4502_v49  ;;  %v4507_v6 = vsel %vm1213_vm10, %v11234_v63, 0.0 }
0x1b13   :  { %3304 = vst.msk [vmem:[#allocation6 + $0x40] sm:$0xff] %vm1213_vm10, %v3288_v47  ;;  %v9258_v50 = vpop.f32.mrb[70].mxu0  ;;  %v4505_v55 = vsel %vm1213_vm10, %v11222_v51, 0.0 }
0x1b14   :  { %v3291_v52 = vadd.f32 %v9258_v50, %v11186_v20  ;;  %v3228_v2 = vpop.f32.mrb[71].mxu0  ;;  %v4506_v0 = vadd.f32 %v4505_v55, %v4504_v17 }
0x1b15   :  { %v3290_v54 = vadd.f32 %v11186_v20, %v3228_v2  ;;  %v11248_v10 = vld [vmem:[#allocation6 + $0x38] sm:$0xff] }
0x1b16   :  { %3307 = vst.msk [vmem:[#allocation6 + $0x58] sm:$0xff] %vm1213_vm10, %v3291_v52  ;;  %v11238_v3 = vld [vmem:[#allocation6 + $0x30] sm:$0xff]  ;;  %v4508_v8 = vadd.f32 %v4507_v6, %v4506_v0  ;;  %v4511_v13 = vsel %vm1213_vm10, %v11248_v10, 0.0 }
0x1b17   :  { %3306 = vst.msk [vmem:[#allocation6 + $0x50] sm:$0xff] %vm1213_vm10, %v3290_v54  ;;  %v9261_v56 = vpop.f32.mrb[72].mxu0  ;;  %v4509_v9 = vsel %vm1213_vm10, %v11238_v3, 0.0 }
0x1b18   :  { %v3293_v57 = vadd.f32 %v9261_v56, %v11186_v20  ;;  %v3238_v59 = vpop.f32.mrb[73].mxu0  ;;  %v4510_v11 = vadd.f32 %v4509_v9, %v4508_v8 }
0x1b19   :  { %v3292_v61 = vadd.f32 %v11186_v20, %v3238_v59  ;;  %v11256_v15 = vld [vmem:[#allocation6 + $0x48] sm:$0xff] }
0x1b1a   :  { %3309 = vst.msk [vmem:[#allocation6 + $0x68] sm:$0xff] %vm1213_vm10, %v3293_v57  ;;  %v11250_v12 = vld [vmem:[#allocation6 + $0x40] sm:$0xff]  ;;  %v4512_v30 = vadd.f32 %v4511_v13, %v4510_v11  ;;  %v4515_v19 = vsel %vm1213_vm10, %v11256_v15, 0.0 }
0x1b1b   :  { %3308 = vst.msk [vmem:[#allocation6 + $0x60] sm:$0xff] %vm1213_vm10, %v3292_v61  ;;  %v9264_v1 = vpop.f32.mrb[74].mxu0  ;;  %v4513_v25 = vsel %vm1213_vm10, %v11250_v12, 0.0 }
0x1b1c   :  { %v3295_v4 = vadd.f32 %v9264_v1, %v11186_v20  ;;  %v3248_v5 = vpop.f32.mrb[75].mxu0  ;;  %v4514_v16 = vadd.f32 %v4513_v25, %v4512_v30 }
0x1b1d   :  { %v3294_v7 = vadd.f32 %v11186_v20, %v3248_v5  ;;  %v11264_v21 = vld [vmem:[#allocation6 + $0x58] sm:$0xff] }
0x1b1e   :  { %3312 = vst.msk [vmem:[#allocation6 + $0x78] sm:$0xf] %vm3311_vm12, %v3295_v4  ;;  %v11258_v18 = vld [vmem:[#allocation6 + $0x50] sm:$0xff]  ;;  %v4516_v14 = vadd.f32 %v4515_v19, %v4514_v16  ;;  %v4519_v26 = vsel %vm1213_vm10, %v11264_v21, 0.0 }
0x1b1f   :  { %3310 = vst.msk [vmem:[#allocation6 + $0x70] sm:$0xff] %vm1213_vm10, %v3294_v7  ;;  %v4517_v58 = vsel %vm1213_vm10, %v11258_v18, 0.0 }
0x1b20   :  { %v4518_v22 = vadd.f32 %v4517_v58, %v4516_v14 }
0x1b21   :  { %v11272_v29 = vld [vmem:[#allocation6 + $0x68] sm:$0xff] }
0x1b22   :  { %v11266_v23 = vld [vmem:[#allocation6 + $0x60] sm:$0xff]  ;;  %v4520_v27 = vadd.f32 %v4519_v26, %v4518_v22  ;;  %v4523_v38 = vsel %vm1213_vm10, %v11272_v29, 0.0 }
0x1b23   :  { %v4521_v28 = vsel %vm1213_vm10, %v11266_v23, 0.0 }
0x1b24   :  { %v4522_v39 = vadd.f32 %v4521_v28, %v4520_v27 }
0x1b25   :  { %v11286_v46 = vld [vmem:[#allocation6 + $0x78] sm:$0xf] }
0x1b26   :  { %v11274_v32 = vld [vmem:[#allocation6 + $0x70] sm:$0xff]  ;;  %v4524_v36 = vadd.f32 %v4523_v38, %v4522_v39  ;;  %v4527_v2 = vsel %vm3311_vm12, %v11286_v46, 0.0 }
0x1b27   :  { %v4525_v41 = vsel %vm1213_vm10, %v11274_v32, 0.0 }
0x1b28   :  { %v4526_v47 = vadd.f32 %v4525_v41, %v4524_v36 }
0x1b2a   :  { %v4528_v55 = vadd.f32 %v4527_v2, %v4526_v47 }
0x1b3b   :  { %v9373_v31 = vpop.f32.mrb[60].mxu1 }
0x1b3c   :  { %v4434_v35 = vadd.f32 %v9373_v31, %v11186_v20  ;;  %v4331_v37 = vpop.f32.mrb[61].mxu1 }
0x1b3d   :  { %v4433_v40 = vadd.f32 %v11186_v20, %v4331_v37 }
0x1b3e   :  { %4451 = vst.msk [vmem:[#allocation6 + $0x88] sm:$0xff] %vm1213_vm10, %v4434_v35 }
0x1b3f   :  { %4450 = vst.msk [vmem:[#allocation6 + $0x80] sm:$0xff] %vm1213_vm10, %v4433_v40  ;;  %v9376_v43 = vpop.f32.mrb[62].mxu1 }
0x1b40   :  { %v4436_v24 = vadd.f32 %v9376_v43, %v11186_v20  ;;  %v4341_v44 = vpop.f32.mrb[63].mxu1 }
0x1b41   :  { %v4435_v45 = vadd.f32 %v11186_v20, %v4341_v44 }
0x1b42   :  { %4453 = vst.msk [vmem:[#allocation6 + $0x98] sm:$0xff] %vm1213_vm10, %v4436_v24 }
0x1b43   :  { %4452 = vst.msk [vmem:[#allocation6 + $0x90] sm:$0xff] %vm1213_vm10, %v4435_v45  ;;  %v9379_v49 = vpop.f32.mrb[64].mxu1 }
0x1b44   :  { %v4438_v50 = vadd.f32 %v9379_v49, %v11186_v20  ;;  %v4351_v52 = vpop.f32.mrb[65].mxu1 }
0x1b45   :  { %v4437_v53 = vadd.f32 %v11186_v20, %v4351_v52  ;;  %v11294_v54 = vld [vmem:[#allocation6 + $0x88] sm:$0xff] }
0x1b46   :  { %v11296_v17 = vld [vmem:[#allocation6 + $0x80] sm:$0xff]  ;;  %4455 = vst.msk [vmem:[#allocation6 + $0xa8] sm:$0xff] %vm1213_vm10, %v4438_v50  ;;  %v4531_v1 = vsel %vm1213_vm10, %v11294_v54, 0.0 }
0x1b47   :  { %v4529_v56 = vsel %vm1213_vm10, %v11296_v17, 0.0  ;;  %4454 = vst.msk [vmem:[#allocation6 + $0xa0] sm:$0xff] %vm1213_vm10, %v4437_v53  ;;  %v9382_v57 = vpop.f32.mrb[66].mxu1 }
0x1b48   :  { %v4530_v59 = vadd.f32 %v4529_v56, %v4528_v55  ;;  %v4440_v61 = vadd.f32 %v9382_v57, %v11186_v20  ;;  %v4361_v0 = vpop.f32.mrb[67].mxu1 }
0x1b49   :  { %v4439_v4 = vadd.f32 %v11186_v20, %v4361_v0  ;;  %v11306_v5 = vld [vmem:[#allocation6 + $0x98] sm:$0xff] }
0x1b4a   :  { %v11308_v6 = vld [vmem:[#allocation6 + $0x90] sm:$0xff]  ;;  %v4532_v7 = vadd.f32 %v4531_v1, %v4530_v59  ;;  %4457 = vst.msk [vmem:[#allocation6 + $0xb8] sm:$0xff] %vm1213_vm10, %v4440_v61  ;;  %v4535_v25 = vsel %vm1213_vm10, %v11306_v5, 0.0 }
0x1b4b   :  { %v4533_v8 = vsel %vm1213_vm10, %v11308_v6, 0.0  ;;  %4456 = vst.msk [vmem:[#allocation6 + $0xb0] sm:$0xff] %vm1213_vm10, %v4439_v4  ;;  %v9385_v9 = vpop.f32.mrb[68].mxu1 }
0x1b4c   :  { %v4534_v11 = vadd.f32 %v4533_v8, %v4532_v7  ;;  %v4442_v13 = vadd.f32 %v9385_v9, %v11186_v20  ;;  %v4371_v30 = vpop.f32.mrb[69].mxu1 }
0x1b4d   :  { %v4441_v16 = vadd.f32 %v11186_v20, %v4371_v30  ;;  %v11318_v19 = vld [vmem:[#allocation6 + $0xa8] sm:$0xff] }
0x1b4e   :  { %v11320_v14 = vld [vmem:[#allocation6 + $0xa0] sm:$0xff]  ;;  %v4536_v58 = vadd.f32 %v4535_v25, %v4534_v11  ;;  %4459 = vst.msk [vmem:[#allocation6 + $0xc8] sm:$0xff] %vm1213_vm10, %v4442_v13  ;;  %v4539_v31 = vsel %vm1213_vm10, %v11318_v19, 0.0 }
0x1b4f   :  { %v4537_v22 = vsel %vm1213_vm10, %v11320_v14, 0.0  ;;  %4458 = vst.msk [vmem:[#allocation6 + $0xc0] sm:$0xff] %vm1213_vm10, %v4441_v16  ;;  %v9388_v26 = vpop.f32.mrb[70].mxu1 }
0x1b50   :  { %v4538_v27 = vadd.f32 %v4537_v22, %v4536_v58  ;;  %v4444_v28 = vadd.f32 %v9388_v26, %v11186_v20  ;;  %v4381_v39 = vpop.f32.mrb[71].mxu1 }
0x1b51   :  { %v4443_v35 = vadd.f32 %v11186_v20, %v4381_v39  ;;  %v11330_v37 = vld [vmem:[#allocation6 + $0xb8] sm:$0xff] }
0x1b52   :  { %v11332_v38 = vld [vmem:[#allocation6 + $0xb0] sm:$0xff]  ;;  %v4540_v40 = vadd.f32 %v4539_v31, %v4538_v27  ;;  %4461 = vst.msk [vmem:[#allocation6 + $0xd8] sm:$0xff] %vm1213_vm10, %v4444_v28  ;;  %v4543_v45 = vsel %vm1213_vm10, %v11330_v37, 0.0 }
0x1b53   :  { %v4541_v36 = vsel %vm1213_vm10, %v11332_v38, 0.0  ;;  %4460 = vst.msk [vmem:[#allocation6 + $0xd0] sm:$0xff] %vm1213_vm10, %v4443_v35  ;;  %v9391_v41 = vpop.f32.mrb[72].mxu1 }
0x1b54   :  { %v4542_v43 = vadd.f32 %v4541_v36, %v4540_v40  ;;  %v4446_v24 = vadd.f32 %v9391_v41, %v11186_v20  ;;  %v4391_v44 = vpop.f32.mrb[73].mxu1 }
0x1b55   :  { %v4445_v47 = vadd.f32 %v11186_v20, %v4391_v44  ;;  %v11342_v49 = vld [vmem:[#allocation6 + $0xc8] sm:$0xff] }
0x1b56   :  { %v11344_v50 = vld [vmem:[#allocation6 + $0xc0] sm:$0xff]  ;;  %v4544_v52 = vadd.f32 %v4543_v45, %v4542_v43  ;;  %4463 = vst.msk [vmem:[#allocation6 + $0xe8] sm:$0xff] %vm1213_vm10, %v4446_v24  ;;  %v4547_v59 = vsel %vm1213_vm10, %v11342_v49, 0.0 }
0x1b57   :  { %v4545_v2 = vsel %vm1213_vm10, %v11344_v50, 0.0  ;;  %4462 = vst.msk [vmem:[#allocation6 + $0xe0] sm:$0xff] %vm1213_vm10, %v4445_v47  ;;  %v9394_v53 = vpop.f32.mrb[74].mxu1 }
0x1b58   :  { %v4546_v55 = vadd.f32 %v4545_v2, %v4544_v52  ;;  %v4448_v56 = vadd.f32 %v9394_v53, %v11186_v20  ;;  %v4401_v57 = vpop.f32.mrb[75].mxu1  ;;  %v8167_v52 = vld [vmem:[%s12635_s16 + $0x8] sm:$0x3f] }
0x1b59   :  { %v4447_v61 = vadd.f32 %v11186_v20, %v4401_v57  ;;  %v11354_v0 = vld [vmem:[#allocation6 + $0xd8] sm:$0xff]  ;;  %9395 = vmatprep.subr.msk.mxu0 %vm2238_vm11, %v8167_v52 }
0x1b5a   :  { %v11356_v1 = vld [vmem:[#allocation6 + $0xd0] sm:$0xff]  ;;  %v4548_v4 = vadd.f32 %v4547_v59, %v4546_v55  ;;  %4465 = vst.msk [vmem:[#allocation6 + $0xf8] sm:$0xf] %vm3311_vm12, %v4448_v56  ;;  %v4551_v9 = vsel %vm1213_vm10, %v11354_v0, 0.0  ;;  %9396 = vmatpush3.msk.msra.mxu0 %vm2238_vm11, %v8167_v52 }
0x1b5b   :  { %v4549_v7 = vsel %vm1213_vm10, %v11356_v1, 0.0  ;;  %4464 = vst.msk [vmem:[#allocation6 + $0xf0] sm:$0xff] %vm1213_vm10, %v4447_v61 }
0x1b5c   :  { %v4550_v8 = vadd.f32 %v4549_v7, %v4548_v4 }
0x1b5d   :  { %v11364_v11 = vld [vmem:[#allocation6 + $0xe8] sm:$0xff] }
0x1b5e   :  { %v11366_v13 = vld [vmem:[#allocation6 + $0xe0] sm:$0xff]  ;;  %v4552_v20 = vadd.f32 %v4551_v9, %v4550_v8  ;;  %v4555_v16 = vsel %vm1213_vm10, %v11364_v11, 0.0 }
0x1b5f   :  { %v4553_v30 = vsel %vm1213_vm10, %v11366_v13, 0.0 }
0x1b60   :  { %v4554_v25 = vadd.f32 %v4553_v30, %v4552_v20 }
0x1b61   :  { %v11372_v58 = vld [vmem:[#allocation6 + $0xf8] sm:$0xf] }
0x1b62   :  { %v11374_v22 = vld [vmem:[#allocation6 + $0xf0] sm:$0xff]  ;;  %v4556_v26 = vadd.f32 %v4555_v16, %v4554_v25  ;;  %v4559_v39 = vsel %vm3311_vm12, %v11372_v58, 0.0 }
0x1b63   :  { %v4557_v27 = vsel %vm1213_vm10, %v11374_v22, 0.0 }
0x1b64   :  { %v4558_v28 = vadd.f32 %v4557_v27, %v4556_v26 }
0x1b66   :  { %v4560_v31 = vadd.f32 %v4559_v39, %v4558_v28 }
0x1b68   :  { %v4561_v35 = vrot.slane %v4560_v31, 4 }
0x1b6a   :  { %v4562_v40 = vadd.f32 %v4561_v35, %v4560_v31 }
0x1b6c   :  { %v4563_v36 = vrot.slane %v4562_v40, 2 }
0x1b6e   :  { %v4564_v41 = vadd.f32 %v4563_v36, %v4562_v40 }
0x1b70   :  { %v4565_v43 = vrot.slane %v4564_v41, 1 }
0x1b72   :  { %v4566_v24 = vadd.f32 %v4565_v43, %v4564_v41 }
0x1b74   :  { %v11380_v44 = vmul.f32 0.004032258, %v4566_v24 }
0x1b76   :  { %v11384_v45 = vsub.f32 %v11200_v34, %v11380_v44  ;;  %v11388_v47 = vsub.f32 %v11198_v33, %v11380_v44  ;;  %v11396_v2 = vsub.f32 %v11210_v42, %v11380_v44  ;;  %v8257_v34 = vld [vmem:[%s12635_s16 + $0x8] sm:$0x3f]  ;;  %v11405_v33 = vsub.f32 %v11218_v48, %v11380_v44  ;;  %v11421_v48 = vld [vmem:[%s12635_s16] sm:$0x3f] }
0x1b77   :  { %9525 = vmatprep.subr.msk.mxu1 %vm2238_vm11, %v8257_v34  ;;  %v11414_v42 = vsub.f32 %v11222_v51, %v11380_v44  ;;  %v11425_v57 = vsub.f32 %v11234_v63, %v11380_v44  ;;  %9421 = vmatprep.subr.msk.mxu0 %vm2238_vm11, %v11421_v48  ;;  %v11435_v7 = vsub.f32 %v11238_v3, %v11380_v44 }
0x1b78   :  { %v4601_v53 = vmul.f32 %v11384_v45, %v11384_v45  ;;  %v4602_v55 = vmul.f32 %v11388_v47, %v11388_v47  ;;  %9526 = vmatpush3.msk.msra.mxu1 %vm2238_vm11, %v8257_v34  ;;  %v4603_v56 = vmul.f32 %v11396_v2, %v11396_v2  ;;  %v4604_v59 = vmul.f32 %v11405_v33, %v11405_v33 }
0x1b79   :  { %v4605_v8 = vmul.f32 %v11414_v42, %v11414_v42  ;;  %v11442_v20 = vsub.f32 %v11248_v10, %v11380_v44  ;;  %v4606_v30 = vmul.f32 %v11425_v57, %v11425_v57  ;;  %v11449_v3 = vsub.f32 %v11250_v12, %v11380_v44 }
0x1b7a   :  { %v4633_v61 = vsel %vm1213_vm10, %v4601_v53, 0.0  ;;  %v4634_v51 = vsel %vm1213_vm10, %v4602_v55, 0.0  ;;  %v4636_v63 = vsel %vm1213_vm10, %v4603_v56, 0.0  ;;  %v4638_v25 = vsel %vm1213_vm10, %v4604_v59, 0.0 }
0x1b7b   :  { %v4635_v4 = vadd.f32 %v4634_v51, %v4633_v61  ;;  %v4607_v26 = vmul.f32 %v11435_v7, %v11435_v7  ;;  %v4640_v27 = vsel %vm1213_vm10, %v4605_v8, 0.0  ;;  %v11456_v10 = vsub.f32 %v11256_v15, %v11380_v44 }
0x1b7c   :  { %v4608_v39 = vmul.f32 %v11442_v20, %v11442_v20  ;;  %v4642_v31 = vsel %vm1213_vm10, %v4606_v30, 0.0  ;;  %v11463_v12 = vsub.f32 %v11258_v18, %v11380_v44  ;;  %v4609_v40 = vmul.f32 %v11449_v3, %v11449_v3 }
0x1b7d   :  { %v4637_v9 = vadd.f32 %v4636_v63, %v4635_v4  ;;  %v4644_v36 = vsel %vm1213_vm10, %v4607_v26, 0.0  ;;  %v11470_v15 = vsub.f32 %v11264_v21, %v11380_v44  ;;  %v4610_v43 = vmul.f32 %v11456_v10, %v11456_v10 }
0x1b7e   :  { %v4646_v24 = vsel %vm1213_vm10, %v4608_v39, 0.0  ;;  %v11477_v18 = vsub.f32 %v11266_v23, %v11380_v44  ;;  %v4611_v34 = vmul.f32 %v11463_v12, %v11463_v12  ;;  %v4648_v53 = vsel %vm1213_vm10, %v4609_v40, 0.0 }
0x1b7f   :  { %v4639_v16 = vadd.f32 %v4638_v25, %v4637_v9  ;;  %v11484_v21 = vsub.f32 %v11272_v29, %v11380_v44  ;;  %v4612_v56 = vmul.f32 %v11470_v15, %v11470_v15  ;;  %v4650_v59 = vsel %vm1213_vm10, %v4610_v43, 0.0 }
0x1b80   :  { %v11491_v23 = vsub.f32 %v11274_v32, %v11380_v44  ;;  %v4613_v51 = vmul.f32 %v11477_v18, %v11477_v18  ;;  %v4652_v4 = vsel %vm1213_vm10, %v4611_v34, 0.0  ;;  %v11498_v29 = vsub.f32 %v11286_v46, %v11380_v44 }
0x1b81   :  { %v4641_v28 = vadd.f32 %v4640_v27, %v4639_v16  ;;  %v4614_v63 = vmul.f32 %v11484_v21, %v11484_v21  ;;  %v4654_v9 = vsel %vm1213_vm10, %v4612_v56, 0.0  ;;  %v11505_v32 = vsub.f32 %v11296_v17, %v11380_v44 }
0x1b82   :  { %v4615_v25 = vmul.f32 %v11491_v23, %v11491_v23  ;;  %v4656_v16 = vsel %vm1213_vm10, %v4613_v51, 0.0  ;;  %v11512_v46 = vsub.f32 %v11294_v54, %v11380_v44  ;;  %v4616_v27 = vmul.f32 %v11498_v29, %v11498_v29 }
0x1b83   :  { %v4643_v35 = vadd.f32 %v4642_v31, %v4641_v28  ;;  %v4658_v28 = vsel %vm1213_vm10, %v4614_v63, 0.0  ;;  %v11519_v17 = vsub.f32 %v11308_v6, %v11380_v44  ;;  %v4617_v31 = vmul.f32 %v11505_v32, %v11505_v32  ;;  %v11534_v6 = vld [vmem:[%s12635_s16] sm:$0x3f] }
0x1b84   :  { %v11526_v54 = vsub.f32 %v11306_v5, %v11380_v44  ;;  %9551 = vmatprep.subr.msk.mxu1 %vm2238_vm11, %v11534_v6 }
0x1b85   :  { %v4645_v41 = vadd.f32 %v4644_v36, %v4643_v35  ;;  %v4660_v35 = vsel %vm1213_vm10, %v4615_v25, 0.0  ;;  %v4618_v36 = vmul.f32 %v11512_v46, %v11512_v46  ;;  %v4664_v5 = vsel %vm1213_vm10, %v4617_v31, 0.0 }
0x1b87   :  { %v4647_v52 = vadd.f32 %v4646_v24, %v4645_v41  ;;  %v4662_v41 = vsel %vm3311_vm12, %v4616_v27, 0.0  ;;  %v11538_v24 = vsub.f32 %v11320_v14, %v11380_v44  ;;  %v4666_v56 = vsel %vm1213_vm10, %v4618_v36, 0.0 }
0x1b89   :  { %v4649_v55 = vadd.f32 %v4648_v53, %v4647_v52  ;;  %v4619_v52 = vmul.f32 %v11519_v17, %v11519_v17  ;;  %v11547_v53 = vsub.f32 %v11318_v19, %v11380_v44  ;;  %v11561_v19 = vsub.f32 %v11330_v37, %v11380_v44 }
0x1b8a   :  { %v11575_v37 = vsub.f32 %v11342_v49, %v11380_v44  ;;  %v11589_v49 = vsub.f32 %v11354_v0, %v11380_v44  ;;  %v11603_v0 = vsub.f32 %v11364_v11, %v11380_v44 }
0x1b8b   :  { %v4651_v61 = vadd.f32 %v4650_v59, %v4649_v55  ;;  %v4620_v55 = vmul.f32 %v11526_v54, %v11526_v54  ;;  %v11554_v59 = vsub.f32 %v11332_v38, %v11380_v44  ;;  %v4668_v51 = vsel %vm1213_vm10, %v4619_v52, 0.0 }
0x1b8c   :  { %v11568_v38 = vsub.f32 %v11344_v50, %v11380_v44  ;;  %v11582_v50 = vsub.f32 %v11356_v1, %v11380_v44  ;;  %v11596_v1 = vsub.f32 %v11366_v13, %v11380_v44  ;;  %v4599_v13 = vsub.f32 %v11374_v22, %v11380_v44 }
0x1b8d   :  { %v4653_v8 = vadd.f32 %v4652_v4, %v4651_v61  ;;  %v4621_v61 = vmul.f32 %v11538_v24, %v11538_v24  ;;  %v4670_v63 = vsel %vm1213_vm10, %v4620_v55, 0.0  ;;  %v4630_v11 = vmul.f32 %v11603_v0, %v11603_v0 }
0x1b8f   :  { %v4655_v30 = vadd.f32 %v4654_v9, %v4653_v8  ;;  %v4622_v8 = vmul.f32 %v11547_v53, %v11547_v53  ;;  %v4672_v25 = vsel %vm1213_vm10, %v4621_v61, 0.0 }
0x1b91   :  { %v4657_v26 = vadd.f32 %v4656_v16, %v4655_v30  ;;  %v4623_v30 = vmul.f32 %v11554_v59, %v11554_v59  ;;  %v4674_v27 = vsel %vm1213_vm10, %v4622_v8, 0.0 }
0x1b93   :  { %v4659_v39 = vadd.f32 %v4658_v28, %v4657_v26  ;;  %v4624_v26 = vmul.f32 %v11561_v19, %v11561_v19  ;;  %v4676_v31 = vsel %vm1213_vm10, %v4623_v30, 0.0 }
0x1b95   :  { %v4661_v40 = vadd.f32 %v4660_v35, %v4659_v39  ;;  %v4625_v39 = vmul.f32 %v11568_v38, %v11568_v38  ;;  %v4678_v36 = vsel %vm1213_vm10, %v4624_v26, 0.0 }
0x1b97   :  { %v4663_v43 = vadd.f32 %v4662_v41, %v4661_v40  ;;  %v4626_v40 = vmul.f32 %v11575_v37, %v11575_v37  ;;  %v4680_v52 = vsel %vm1213_vm10, %v4625_v39, 0.0 }
0x1b99   :  { %v4665_v34 = vadd.f32 %v4664_v5, %v4663_v43  ;;  %v4627_v43 = vmul.f32 %v11582_v50, %v11582_v50  ;;  %v4682_v55 = vsel %vm1213_vm10, %v4626_v40, 0.0 }
0x1b9b   :  { %v4667_v14 = vadd.f32 %v4666_v56, %v4665_v34  ;;  %v4628_v34 = vmul.f32 %v11589_v49, %v11589_v49  ;;  %v4684_v61 = vsel %vm1213_vm10, %v4627_v43, 0.0 }
0x1b9d   :  { %v4669_v4 = vadd.f32 %v4668_v51, %v4667_v14  ;;  %v4629_v14 = vmul.f32 %v11596_v1, %v11596_v1  ;;  %v4686_v8 = vsel %vm1213_vm10, %v4628_v34, 0.0  ;;  %v11625_v34 = vld [vmem:[%s12633_s14] ss:$0 sm:$0xff] }
0x1b9f   :  { %v4671_v9 = vadd.f32 %v4670_v63, %v4669_v4  ;;  %v4600_v4 = vsub.f32 %v11372_v58, %v11380_v44  ;;  %v4688_v30 = vsel %vm1213_vm10, %v4629_v14, 0.0 }
0x1ba1   :  { %v4673_v16 = vadd.f32 %v4672_v25, %v4671_v9  ;;  %v4631_v9 = vmul.f32 %v4599_v13, %v4599_v13  ;;  %v4632_v22 = vmul.f32 %v4600_v4, %v4600_v4 }
0x1ba3   :  { %v4675_v28 = vadd.f32 %v4674_v27, %v4673_v16  ;;  %v4690_v16 = vsel %vm1213_vm10, %v4630_v11, 0.0  ;;  %v4692_v27 = vsel %vm1213_vm10, %v4631_v9, 0.0  ;;  %v4694_v39 = vsel %vm3311_vm12, %v4632_v22, 0.0 }
0x1ba5   :  { %v4677_v35 = vadd.f32 %v4676_v31, %v4675_v28 }
0x1ba7   :  { %v4679_v41 = vadd.f32 %v4678_v36, %v4677_v35 }
0x1ba9   :  { %v4681_v5 = vadd.f32 %v4680_v52, %v4679_v41 }
0x1bab   :  { %v4683_v56 = vadd.f32 %v4682_v55, %v4681_v5 }
0x1bad   :  { %v4685_v51 = vadd.f32 %v4684_v61, %v4683_v56 }
0x1baf   :  { %v4687_v63 = vadd.f32 %v4686_v8, %v4685_v51  ;;  %v11633_v51 = vld [vmem:[%s12634_s15] ss:$0 sm:$0xff] }
0x1bb1   :  { %v4689_v25 = vadd.f32 %v4688_v30, %v4687_v63 }
0x1bb3   :  { %v4691_v26 = vadd.f32 %v4690_v16, %v4689_v25 }
0x1bb5   :  { %v4693_v28 = vadd.f32 %v4692_v27, %v4691_v26 }
0x1bb7   :  { %v4695_v58 = vadd.f32 %v4694_v39, %v4693_v28 }
0x1bb9   :  { %v4696_v44 = vrot.slane %v4695_v58, 4 }
0x1bbb   :  { %v4697_v31 = vadd.f32 %v4696_v44, %v4695_v58 }
0x1bbd   :  { %v4698_v35 = vrot.slane %v4697_v31, 2 }
0x1bbf   :  { %v4699_v40 = vadd.f32 %v4698_v35, %v4697_v31 }
0x1bc1   :  { %v4700_v36 = vrot.slane %v4699_v40, 1 }
0x1bc3   :  { %v4701_v41 = vadd.f32 %v4700_v36, %v4699_v40 }
0x1bc5   :  { %v4702_v43 = vmul.f32 0.004032258, %v4701_v41 }
0x1bc7   :  { %v4703_v52 = vadd.f32 1e-05, %v4702_v43 }
0x1bc9   :  { %10195 = vrsqrt.f32 %v4703_v52 }
0x1bd3   :  { %v10196_v5 = vpop.eup %10195 }
0x1bd4   :  { %v4735_v55 = vmul.f32 %v10196_v5, %v4599_v13  ;;  %v4705_v56 = vmul.f32 %v10196_v5, %v11384_v45  ;;  %v4706_v14 = vmul.f32 %v10196_v5, %v11388_v47  ;;  %v4707_v61 = vmul.f32 %v10196_v5, %v11396_v2 }
0x1bd5   :  { %v4708_v11 = vmul.f32 %v10196_v5, %v11405_v33  ;;  %v4709_v8 = vmul.f32 %v10196_v5, %v11414_v42  ;;  %v4710_v63 = vmul.f32 %v10196_v5, %v11425_v57  ;;  %v4711_v9 = vmul.f32 %v10196_v5, %v11435_v7 }
0x1bd6   :  { %v4774_v13 = vmul.f32 %v11625_v34, %v4735_v55  ;;  %v4712_v45 = vmul.f32 %v10196_v5, %v11442_v20  ;;  %v4713_v47 = vmul.f32 %v10196_v5, %v11449_v3  ;;  %v4714_v2 = vmul.f32 %v10196_v5, %v11456_v10 }
0x1bd7   :  { %v4715_v30 = vmul.f32 %v10196_v5, %v11463_v12  ;;  %v4716_v25 = vmul.f32 %v10196_v5, %v11470_v15  ;;  %v4717_v33 = vmul.f32 %v10196_v5, %v11477_v18  ;;  %v4718_v42 = vmul.f32 %v10196_v5, %v11484_v21 }
0x1bd8   :  { %v4813_v57 = vadd.f32 %v11633_v51, %v4774_v13  ;;  %v4719_v7 = vmul.f32 %v10196_v5, %v11491_v23  ;;  %v4720_v22 = vmul.f32 %v10196_v5, %v11498_v29  ;;  %v4721_v20 = vmul.f32 %v10196_v5, %v11505_v32 }
0x1bd9   :  { %v4722_v3 = vmul.f32 %v10196_v5, %v11512_v46  ;;  %v4723_v10 = vmul.f32 %v10196_v5, %v11519_v17  ;;  %v4724_v12 = vmul.f32 %v10196_v5, %v11526_v54  ;;  %v4725_v15 = vmul.f32 %v10196_v5, %v11538_v24 }
0x1bda   :  { %v4845_v16 = vmax.f32 %v4813_v57, 0.0  ;;  %v4726_v18 = vmul.f32 %v10196_v5, %v11547_v53  ;;  %v4727_v21 = vmul.f32 %v10196_v5, %v11554_v59  ;;  %v4728_v26 = vmul.f32 %v10196_v5, %v11561_v19 }
0x1bdb   :  { %v4729_v23 = vmul.f32 %v10196_v5, %v11568_v38  ;;  %v4730_v29 = vmul.f32 %v10196_v5, %v11575_v37  ;;  %v4731_v32 = vmul.f32 %v10196_v5, %v11582_v50  ;;  %v4732_v46 = vmul.f32 %v10196_v5, %v11589_v49 }
0x1bdc   :  { %v4733_v17 = vmul.f32 %v10196_v5, %v11596_v1  ;;  %v4734_v54 = vmul.f32 %v10196_v5, %v11603_v0  ;;  %v4736_v24 = vmul.f32 %v10196_v5, %v4600_v4  ;;  %4912 = vst.msk [vmem:[#allocation7 + $0xfc] sm:$0xff] %vm1213_vm10, %v4845_v16  ;;  %v4744_v53 = vmul.f32 %v11625_v34, %v4705_v56 }
0x1bdd   :  { %v4745_v59 = vmul.f32 %v11625_v34, %v4706_v14  ;;  %v4746_v19 = vmul.f32 %v11625_v34, %v4707_v61  ;;  %v4747_v38 = vmul.f32 %v11625_v34, %v4708_v11  ;;  %v4748_v37 = vmul.f32 %v11625_v34, %v4709_v8 }
0x1bde   :  { %v4749_v50 = vmul.f32 %v11625_v34, %v4710_v63  ;;  %v4750_v49 = vmul.f32 %v11625_v34, %v4711_v9  ;;  %v4751_v1 = vmul.f32 %v11625_v34, %v4712_v45  ;;  %v4752_v0 = vmul.f32 %v11625_v34, %v4713_v47 }
0x1bdf   :  { %v4753_v4 = vmul.f32 %v11625_v34, %v4714_v2  ;;  %v4754_v27 = vmul.f32 %v11625_v34, %v4715_v30  ;;  %v4755_v28 = vmul.f32 %v11625_v34, %v4716_v25  ;;  %v4756_v39 = vmul.f32 %v11625_v34, %v4717_v33 }
0x1be0   :  { %v4757_v58 = vmul.f32 %v11625_v34, %v4718_v42  ;;  %v4758_v44 = vmul.f32 %v11625_v34, %v4719_v7  ;;  %v11681_v31 = vmul.f32 %v11625_v34, %v4720_v22  ;;  %v4760_v35 = vmul.f32 %v11625_v34, %v4721_v20 }
0x1be1   :  { %v4761_v40 = vmul.f32 %v11625_v34, %v4722_v3  ;;  %v4762_v36 = vmul.f32 %v11625_v34, %v4723_v10  ;;  %v4763_v41 = vmul.f32 %v11625_v34, %v4724_v12  ;;  %v4764_v43 = vmul.f32 %v11625_v34, %v4725_v15 }
0x1be2   :  { %v4765_v52 = vmul.f32 %v11625_v34, %v4726_v18  ;;  %v4766_v5 = vmul.f32 %v11625_v34, %v4727_v21  ;;  %v4767_v55 = vmul.f32 %v11625_v34, %v4728_v26  ;;  %v4768_v56 = vmul.f32 %v11625_v34, %v4729_v23 }
0x1be3   :  { %v4769_v14 = vmul.f32 %v11625_v34, %v4730_v29  ;;  %v4770_v61 = vmul.f32 %v11625_v34, %v4731_v32  ;;  %v4771_v11 = vmul.f32 %v11625_v34, %v4732_v46  ;;  %v4772_v8 = vmul.f32 %v11625_v34, %v4733_v17 }
0x1be4   :  { %v4773_v63 = vmul.f32 %v11625_v34, %v4734_v54  ;;  %v11698_v9 = vmul.f32 %v11625_v34, %v4736_v24  ;;  %v4783_v13 = vadd.f32 %v11633_v51, %v4744_v53  ;;  %v4784_v45 = vadd.f32 %v11633_v51, %v4745_v59 }
0x1be5   :  { %v4785_v47 = vadd.f32 %v11633_v51, %v4746_v19  ;;  %v4786_v2 = vadd.f32 %v11633_v51, %v4747_v38  ;;  %v4787_v30 = vadd.f32 %v11633_v51, %v4748_v37  ;;  %v4788_v25 = vadd.f32 %v11633_v51, %v4749_v50 }
0x1be6   :  { %v4789_v33 = vadd.f32 %v11633_v51, %v4750_v49  ;;  %v4790_v42 = vadd.f32 %v11633_v51, %v4751_v1  ;;  %v4791_v57 = vadd.f32 %v11633_v51, %v4752_v0  ;;  %v4792_v34 = vadd.f32 %v11633_v51, %v4753_v4 }
0x1be7   :  { %v4793_v7 = vadd.f32 %v11633_v51, %v4754_v27  ;;  %v4794_v22 = vadd.f32 %v11633_v51, %v4755_v28  ;;  %v4795_v20 = vadd.f32 %v11633_v51, %v4756_v39  ;;  %v4796_v3 = vadd.f32 %v11633_v51, %v4757_v58 }
0x1be8   :  { %v4797_v10 = vadd.f32 %v11633_v51, %v4758_v44  ;;  %v4799_v12 = vadd.f32 %v11633_v51, %v4760_v35  ;;  %v4800_v15 = vadd.f32 %v11633_v51, %v4761_v40  ;;  %v4801_v16 = vadd.f32 %v11633_v51, %v4762_v36 }
0x1be9   :  { %v4802_v18 = vadd.f32 %v11633_v51, %v4763_v41  ;;  %v4803_v21 = vadd.f32 %v11633_v51, %v4764_v43  ;;  %v4804_v26 = vadd.f32 %v11633_v51, %v4765_v52  ;;  %v4805_v23 = vadd.f32 %v11633_v51, %v4766_v5 }
0x1bea   :  { %v4806_v29 = vadd.f32 %v11633_v51, %v4767_v55  ;;  %v4807_v32 = vadd.f32 %v11633_v51, %v4768_v56  ;;  %v4808_v46 = vadd.f32 %v11633_v51, %v4769_v14  ;;  %v4809_v17 = vadd.f32 %v11633_v51, %v4770_v61 }
0x1beb   :  { %v4810_v54 = vadd.f32 %v11633_v51, %v4771_v11  ;;  %v4811_v24 = vadd.f32 %v11633_v51, %v4772_v8  ;;  %v4812_v53 = vadd.f32 %v11633_v51, %v4773_v63  ;;  %v4815_v59 = vmax.f32 %v4783_v13, 0.0 }
0x1bec   :  { %v4816_v19 = vmax.f32 %v4784_v45, 0.0  ;;  %v4817_v38 = vmax.f32 %v4785_v47, 0.0  ;;  %v4818_v37 = vmax.f32 %v4786_v2, 0.0  ;;  %v4819_v50 = vmax.f32 %v4787_v30, 0.0 }
0x1bed   :  { %v4820_v49 = vmax.f32 %v4788_v25, 0.0  ;;  %v4821_v1 = vmax.f32 %v4789_v33, 0.0  ;;  %v4822_v0 = vmax.f32 %v4790_v42, 0.0  ;;  %v4823_v4 = vmax.f32 %v4791_v57, 0.0  ;;  %4881 = vst.msk [vmem:[#allocation7 + $0x4] sm:$0xff] %vm1213_vm10, %v4815_v59 }
0x1bee   :  { %v4824_v27 = vmax.f32 %v4792_v34, 0.0  ;;  %v4825_v28 = vmax.f32 %v4793_v7, 0.0  ;;  %v4826_v39 = vmax.f32 %v4794_v22, 0.0  ;;  %v4827_v58 = vmax.f32 %v4795_v20, 0.0  ;;  %4882 = vst.msk [vmem:[#allocation7 + $0xc] sm:$0xff] %vm1213_vm10, %v4816_v19  ;;  %4883 = vst.msk [vmem:[#allocation7 + $0x14] sm:$0xff] %vm1213_vm10, %v4817_v38 }
0x1bef   :  { %4884 = vst.msk [vmem:[#allocation7 + $0x1c] sm:$0xff] %vm1213_vm10, %v4818_v37  ;;  %4885 = vst.msk [vmem:[#allocation7 + $0x24] sm:$0xff] %vm1213_vm10, %v4819_v50  ;;  %v4828_v44 = vmax.f32 %v4796_v3, 0.0  ;;  %v4829_v35 = vmax.f32 %v4797_v10, 0.0  ;;  %v4831_v40 = vmax.f32 %v4799_v12, 0.0  ;;  %v4832_v36 = vmax.f32 %v4800_v15, 0.0 }
0x1bf0   :  { %4886 = vst.msk [vmem:[#allocation7 + $0x2c] sm:$0xff] %vm1213_vm10, %v4820_v49  ;;  %4887 = vst.msk [vmem:[#allocation7 + $0x34] sm:$0xff] %vm1213_vm10, %v4821_v1  ;;  %v4833_v41 = vmax.f32 %v4801_v16, 0.0  ;;  %v4834_v43 = vmax.f32 %v4802_v18, 0.0  ;;  %v4835_v52 = vmax.f32 %v4803_v21, 0.0  ;;  %v4836_v5 = vmax.f32 %v4804_v26, 0.0 }
0x1bf1   :  { %4888 = vst.msk [vmem:[#allocation7 + $0x3c] sm:$0xff] %vm1213_vm10, %v4822_v0  ;;  %4889 = vst.msk [vmem:[#allocation7 + $0x44] sm:$0xff] %vm1213_vm10, %v4823_v4  ;;  %v4837_v55 = vmax.f32 %v4805_v23, 0.0  ;;  %v4838_v56 = vmax.f32 %v4806_v29, 0.0  ;;  %v4839_v14 = vmax.f32 %v4807_v32, 0.0  ;;  %v4840_v61 = vmax.f32 %v4808_v46, 0.0 }
0x1bf2   :  { %4890 = vst.msk [vmem:[#allocation7 + $0x4c] sm:$0xff] %vm1213_vm10, %v4824_v27  ;;  %4891 = vst.msk [vmem:[#allocation7 + $0x54] sm:$0xff] %vm1213_vm10, %v4825_v28  ;;  %v4841_v11 = vmax.f32 %v4809_v17, 0.0  ;;  %v4842_v8 = vmax.f32 %v4810_v54, 0.0  ;;  %v4843_v63 = vmax.f32 %v4811_v24, 0.0  ;;  %v4844_v13 = vmax.f32 %v4812_v53, 0.0 }
0x1bf3   :  { %4892 = vst.msk [vmem:[#allocation7 + $0x5c] sm:$0xff] %vm1213_vm10, %v4826_v39  ;;  %4893 = vst.msk [vmem:[#allocation7 + $0x64] sm:$0xff] %vm1213_vm10, %v4827_v58  ;;  %v4798_v45 = vadd.f32 %v11633_v51, %v11681_v31  ;;  %v4814_v47 = vadd.f32 %v11633_v51, %v11698_v9  ;;  %v11766_v31 = vld [vmem:[%s12635_s16 + $0x10] sm:$0x3f]  ;;  %v11819_v27 = vld [vmem:[%s12635_s16 + $0x18] sm:$0x3f] }
0x1bf4   :  { %4894 = vst.msk [vmem:[#allocation7 + $0x6c] sm:$0xff] %vm1213_vm10, %v4828_v44  ;;  %4895 = vst.msk [vmem:[#allocation7 + $0x74] sm:$0xff] %vm1213_vm10, %v4829_v35  ;;  %v4931_v2 = vld [vmem:[#allocation7 + $0x3] sm:$0xff] }
0x1bf5   :  { %4898 = vst.msk [vmem:[#allocation7 + $0x8c] sm:$0xff] %vm1213_vm10, %v4831_v40  ;;  %4899 = vst.msk [vmem:[#allocation7 + $0x94] sm:$0xff] %vm1213_vm10, %v4832_v36  ;;  %9397 = vmatprep.mubr.msk.f32.mxu0 %vm1213_vm10, %v4931_v2  ;;  %v4932_v30 = vld [vmem:[#allocation7 + $0xb] sm:$0xff]  ;;  %v4830_v25 = vmax.f32 %v4798_v45, 0.0  ;;  %v4846_v33 = vmax.f32 %v4814_v47, 0.0  ;;  %v4933_v51 = vld [vmem:[#allocation7 + $0x13] sm:$0xff] }
0x1bf6   :  { %4900 = vst.msk [vmem:[#allocation7 + $0x9c] sm:$0xff] %vm1213_vm10, %v4833_v41  ;;  %4901 = vst.msk [vmem:[#allocation7 + $0xa4] sm:$0xff] %vm1213_vm10, %v4834_v43  ;;  %9398 = vmatmul.mubr.msk.f32.vlgmr.msra.gmra.mrb[76].mxu0 %vm1213_vm10, %v4932_v30  ;;  %v4934_v57 = vld [vmem:[#allocation7 + $0x1b] sm:$0xff]  ;;  %v4935_v7 = vld [vmem:[#allocation7 + $0x23] sm:$0xff] }
0x1bf7   :  { %4902 = vst.msk [vmem:[#allocation7 + $0xac] sm:$0xff] %vm1213_vm10, %v4835_v52  ;;  %4903 = vst.msk [vmem:[#allocation7 + $0xb4] sm:$0xff] %vm1213_vm10, %v4836_v5  ;;  %9400 = vmatprep.mubr.msk.f32.mxu0 %vm1213_vm10, %v4933_v51  ;;  %9422 = vmatpush3.msk.msra.mxu0 %vm2238_vm11, %v11421_v48  ;;  %v11782_v48 = vld [vmem:[%s12635_s16 + $0x10] sm:$0x3f]  ;;  %v4936_v20 = vld [vmem:[#allocation7 + $0x2b] sm:$0xff] }
0x1bf8   :  { %4904 = vst.msk [vmem:[#allocation7 + $0xbc] sm:$0xff] %vm1213_vm10, %v4837_v55  ;;  %4905 = vst.msk [vmem:[#allocation7 + $0xc4] sm:$0xff] %vm1213_vm10, %v4838_v56  ;;  %9447 = vmatprep.subr.msk.mxu0 %vm2238_vm11, %v11766_v31  ;;  %v4937_v10 = vld [vmem:[#allocation7 + $0x33] sm:$0xff]  ;;  %v4938_v15 = vld [vmem:[#allocation7 + $0x3b] sm:$0xff] }
0x1bf9   :  { %4906 = vst.msk [vmem:[#allocation7 + $0xcc] sm:$0xff] %vm1213_vm10, %v4839_v14  ;;  %4907 = vst.msk [vmem:[#allocation7 + $0xd4] sm:$0xff] %vm1213_vm10, %v4840_v61  ;;  %v4939_v16 = vld [vmem:[#allocation7 + $0x43] sm:$0xff]  ;;  %v4940_v21 = vld [vmem:[#allocation7 + $0x4b] sm:$0xff] }
0x1bfa   :  { %4908 = vst.msk [vmem:[#allocation7 + $0xdc] sm:$0xff] %vm1213_vm10, %v4841_v11  ;;  %4909 = vst.msk [vmem:[#allocation7 + $0xe4] sm:$0xff] %vm1213_vm10, %v4842_v8  ;;  %9401 = vmatmul.mubr.msk.f32.gmra.mrb[78].mxu0 %vm1213_vm10, %v4934_v57  ;;  %v4941_v23 = vld [vmem:[#allocation7 + $0x53] sm:$0xff]  ;;  %v4942_v32 = vld [vmem:[#allocation7 + $0x5b] sm:$0xff] }
0x1bfb   :  { %4910 = vst.msk [vmem:[#allocation7 + $0xec] sm:$0xff] %vm1213_vm10, %v4843_v63  ;;  %4911 = vst.msk [vmem:[#allocation7 + $0xf4] sm:$0xff] %vm1213_vm10, %v4844_v13  ;;  %9403 = vmatprep.mubr.msk.f32.mxu0 %vm1213_vm10, %v4935_v7  ;;  %v4943_v17 = vld [vmem:[#allocation7 + $0x63] sm:$0xff]  ;;  %v4944_v24 = vld [vmem:[#allocation7 + $0x6b] sm:$0xff] }
0x1bfc   :  { %4896 = vst.msk [vmem:[#allocation7 + $0x7c] sm:$0xf] %vm3311_vm12, %v4830_v25  ;;  %4913 = vst.msk [vmem:[#allocation7 + $0x104] sm:$0xf] %vm3311_vm12, %v4846_v33  ;;  %v6087_v9 = vld [vmem:[#allocation7 + $0x8b] sm:$0xff]  ;;  %v6088_v42 = vld [vmem:[#allocation7 + $0x93] sm:$0xff] }
0x1bfd   :  { %9527 = vmatprep.mubr.msk.f32.mxu1 %vm1213_vm10, %v6087_v9  ;;  %v6089_v34 = vld [vmem:[#allocation7 + $0x9b] sm:$0xff]  ;;  %v6090_v22 = vld [vmem:[#allocation7 + $0xa3] sm:$0xff]  ;;  %v4945_v59 = vld [vmem:[#allocation7 + $0x73] sm:$0xff] }
0x1bfe   :  { %9528 = vmatmul.mubr.msk.f32.vlgmr.msra.gmra.mrb[76].mxu1 %vm1213_vm10, %v6088_v42  ;;  %v6091_v3 = vld [vmem:[#allocation7 + $0xab] sm:$0xff]  ;;  %9404 = vmatmul.mubr.msk.f32.gmra.mrb[80].mxu0 %vm1213_vm10, %v4936_v20  ;;  %v6092_v12 = vld [vmem:[#allocation7 + $0xb3] sm:$0xff]  ;;  %v4917_v39 = vld [vmem:[#allocation7 + $0x1c] sm:$0xff] }
0x1bff   :  { %9530 = vmatprep.mubr.msk.f32.mxu1 %vm1213_vm10, %v6089_v34  ;;  %9552 = vmatpush3.msk.msra.mxu1 %vm2238_vm11, %v11534_v6  ;;  %v6093_v6 = vld [vmem:[#allocation7 + $0xbb] sm:$0xff]  ;;  %v6094_v18 = vld [vmem:[#allocation7 + $0xc3] sm:$0xff]  ;;  %v4915_v1 = vld [vmem:[#allocation7 + $0xc] sm:$0xff] }
0x1c00   :  { %9577 = vmatprep.subr.msk.mxu1 %vm2238_vm11, %v11782_v48  ;;  %9406 = vmatprep.mubr.msk.f32.mxu0 %vm1213_vm10, %v4937_v10  ;;  %v6095_v26 = vld [vmem:[#allocation7 + $0xcb] sm:$0xff]  ;;  %v6096_v29 = vld [vmem:[#allocation7 + $0xd3] sm:$0xff]  ;;  %v6072_v58 = vld [vmem:[#allocation7 + $0x9c] sm:$0xff] }
0x1c01   :  { %v6097_v46 = vld [vmem:[#allocation7 + $0xdb] sm:$0xff]  ;;  %v6098_v54 = vld [vmem:[#allocation7 + $0xe3] sm:$0xff]  ;;  %v6070_v0 = vld [vmem:[#allocation7 + $0x8c] sm:$0xff] }
0x1c02   :  { %9531 = vmatmul.mubr.msk.f32.gmra.mrb[78].mxu1 %vm1213_vm10, %v6090_v22  ;;  %9407 = vmatmul.mubr.msk.f32.gmra.mrb[82].mxu0 %vm1213_vm10, %v4938_v15  ;;  %v6099_v53 = vld [vmem:[#allocation7 + $0xeb] sm:$0xff]  ;;  %v6100_v19 = vld [vmem:[#allocation7 + $0xf3] sm:$0xff]  ;;  %v6101_v37 = vld [vmem:[#allocation7 + $0xfb] sm:$0xff] }
0x1c03   :  { %9533 = vmatprep.mubr.msk.f32.mxu1 %vm1213_vm10, %v6091_v3  ;;  %9409 = vmatprep.mubr.msk.f32.mxu0 %vm1213_vm10, %v4939_v16  ;;  %v4946_v38 = vld [vmem:[#allocation7 + $0x7b] sm:$0xff]  ;;  %v4914_v50 = vld [vmem:[#allocation7 + $0x4] sm:$0xff]  ;;  %v4919_v36 = vld [vmem:[#allocation7 + $0x2c] sm:$0xff] }
0x1c04   :  { %v6102_v49 = vld [vmem:[#allocation7 + $0x103] sm:$0xff]  ;;  %v4916_v4 = vld [vmem:[#allocation7 + $0x14] sm:$0xff]  ;;  %v6074_v41 = vld [vmem:[#allocation7 + $0xac] sm:$0xff] }
0x1c05   :  { %v6071_v28 = vld [vmem:[#allocation7 + $0x94] sm:$0xff]  ;;  %v4918_v44 = vld [vmem:[#allocation7 + $0x24] sm:$0xff]  ;;  %v4921_v5 = vld [vmem:[#allocation7 + $0x3c] sm:$0xff] }
0x1c06   :  { %9534 = vmatmul.mubr.msk.f32.gmra.mrb[80].mxu1 %vm1213_vm10, %v6092_v12  ;;  %9410 = vmatmul.mubr.msk.f32.gmra.mrb[84].mxu0 %vm1213_vm10, %v4940_v21  ;;  %v11832_v35 = vld [vmem:[%s12635_s16 + $0x18] sm:$0x3f]  ;;  %v4920_v43 = vld [vmem:[#allocation7 + $0x34] sm:$0xff]  ;;  %v6076_v55 = vld [vmem:[#allocation7 + $0xbc] sm:$0xff] }
0x1c07   :  { %9536 = vmatprep.mubr.msk.f32.mxu1 %vm1213_vm10, %v6093_v6  ;;  %9412 = vmatprep.mubr.msk.f32.mxu0 %vm1213_vm10, %v4941_v23  ;;  %v6073_v40 = vld [vmem:[#allocation7 + $0xa4] sm:$0xff]  ;;  %v6075_v52 = vld [vmem:[#allocation7 + $0xb4] sm:$0xff]  ;;  %v4923_v61 = vld [vmem:[#allocation7 + $0x4c] sm:$0xff] }
0x1c08   :  { %v4922_v56 = vld [vmem:[#allocation7 + $0x44] sm:$0xff]  ;;  %v6078_v11 = vld [vmem:[#allocation7 + $0xcc] sm:$0xff]  ;;  %v4924_v8 = vld [vmem:[#allocation7 + $0x54] sm:$0xff] }
0x1c09   :  { %v6077_v14 = vld [vmem:[#allocation7 + $0xc4] sm:$0xff]  ;;  %v6079_v63 = vld [vmem:[#allocation7 + $0xd4] sm:$0xff]  ;;  %v4925_v13 = vld [vmem:[#allocation7 + $0x5c] sm:$0xff] }
0x1c0a   :  { %9537 = vmatmul.mubr.msk.f32.gmra.mrb[82].mxu1 %vm1213_vm10, %v6094_v18  ;;  %9413 = vmatmul.mubr.msk.f32.gmra.mrb[86].mxu0 %vm1213_vm10, %v4942_v32  ;;  %v6080_v45 = vld [vmem:[#allocation7 + $0xdc] sm:$0xff]  ;;  %v4926_v47 = vld [vmem:[#allocation7 + $0x64] sm:$0xff]  ;;  %v4927_v30 = vld [vmem:[#allocation7 + $0x6c] sm:$0xff] }
0x1c0b   :  { %9539 = vmatprep.mubr.msk.f32.mxu1 %vm1213_vm10, %v6095_v26  ;;  %9415 = vmatprep.mubr.msk.f32.mxu0 %vm1213_vm10, %v4943_v17  ;;  %v6081_v2 = vld [vmem:[#allocation7 + $0xe4] sm:$0xff]  ;;  %v6082_v25 = vld [vmem:[#allocation7 + $0xec] sm:$0xff]  ;;  %v4928_v33 = vld [vmem:[#allocation7 + $0x74] sm:$0xff] }
0x1c0c   :  { %v4929_v51 = vld [vmem:[#allocation7 + $0x7c] sm:$0xff]  ;;  %v6085_v57 = vld [vmem:[#allocation7 + $0x104] sm:$0xff]  ;;  %v11869_v22 = vld [vmem:[%s12635_s16 + $0x20] sm:$0x3f] }
0x1c0d   :  { %v6084_v9 = vld [vmem:[#allocation7 + $0xfc] sm:$0xff]  ;;  %v5342_v34 = vld [vmem:[#allocation7 + $0xa] sm:$0xff]  ;;  %v6497_v20 = vld [vmem:[#allocation7 + $0x92] sm:$0xff] }
0x1c0e   :  { %9540 = vmatmul.mubr.msk.f32.gmra.mrb[84].mxu1 %vm1213_vm10, %v6096_v29  ;;  %9416 = vmatmul.mubr.msk.f32.gmra.mrb[88].mxu0 %vm1213_vm10, %v4944_v24  ;;  %v5341_v42 = vld [vmem:[#allocation7 + $0x2] sm:$0xff]  ;;  %v6496_v7 = vld [vmem:[#allocation7 + $0x8a] sm:$0xff]  ;;  %v5344_v3 = vld [vmem:[#allocation7 + $0x1a] sm:$0xff] }
0x1c0f   :  { %9542 = vmatprep.mubr.msk.f32.mxu1 %vm1213_vm10, %v6097_v46  ;;  %9418 = vmatprep.mubr.msk.f32.mxu0 %vm1213_vm10, %v4945_v59  ;;  %v6498_v10 = vld [vmem:[#allocation7 + $0x9a] sm:$0xff]  ;;  %v5345_v12 = vld [vmem:[#allocation7 + $0x22] sm:$0xff]  ;;  %v11882_v15 = vld [vmem:[%s12635_s16 + $0x20] sm:$0x3f] }
0x1c10   :  { %v6499_v6 = vld [vmem:[#allocation7 + $0xa2] sm:$0xff]  ;;  %v5346_v16 = vld [vmem:[#allocation7 + $0x2a] sm:$0xff]  ;;  %v5347_v21 = vld [vmem:[#allocation7 + $0x32] sm:$0xff] }
0x1c11   :  { %v6500_v18 = vld [vmem:[#allocation7 + $0xaa] sm:$0xff]  ;;  %v6501_v26 = vld [vmem:[#allocation7 + $0xb2] sm:$0xff]  ;;  %v5348_v23 = vld [vmem:[#allocation7 + $0x3a] sm:$0xff] }
0x1c12   :  { %9543 = vmatmul.mubr.msk.f32.gmra.mrb[86].mxu1 %vm1213_vm10, %v6098_v54  ;;  %9419 = vmatmul.mubr.msk.f32.gmra.mrb[90].mxu0 %vm1213_vm10, %v4946_v38  ;;  %v6502_v29 = vld [vmem:[#allocation7 + $0xba] sm:$0xff]  ;;  %v5349_v32 = vld [vmem:[#allocation7 + $0x42] sm:$0xff]  ;;  %v5350_v17 = vld [vmem:[#allocation7 + $0x4a] sm:$0xff] }
0x1c13   :  { %9545 = vmatprep.mubr.msk.f32.mxu1 %vm1213_vm10, %v6099_v53  ;;  %9423 = vmatprep.mubr.msk.f32.mxu0 %vm1213_vm10, %v4914_v50  ;;  %v6503_v46 = vld [vmem:[#allocation7 + $0xc2] sm:$0xff]  ;;  %v6504_v54 = vld [vmem:[#allocation7 + $0xca] sm:$0xff]  ;;  %v5351_v24 = vld [vmem:[#allocation7 + $0x52] sm:$0xff] }
0x1c14   :  { %v6505_v53 = vld [vmem:[#allocation7 + $0xd2] sm:$0xff]  ;;  %v5352_v59 = vld [vmem:[#allocation7 + $0x5a] sm:$0xff]  ;;  %v5353_v38 = vld [vmem:[#allocation7 + $0x62] sm:$0xff] }
0x1c15   :  { %v5354_v50 = vld [vmem:[#allocation7 + $0x6a] sm:$0xff] }
0x1c16   :  { %9546 = vmatmul.mubr.msk.f32.gmra.mrb[88].mxu1 %vm1213_vm10, %v6100_v19  ;;  %9424 = vmatmul.mubr.msk.f32.vlgmr.msra.gmra.mrb[76].mxu0 %vm1213_vm10, %v4915_v1  ;;  %v6506_v19 = vld [vmem:[#allocation7 + $0xda] sm:$0xff]  ;;  %v5355_v1 = vld [vmem:[#allocation7 + $0x72] sm:$0xff] }
0x1c17   :  { %9548 = vmatprep.mubr.msk.f32.mxu1 %vm1213_vm10, %v6101_v37  ;;  %9426 = vmatprep.mubr.msk.f32.mxu0 %vm1213_vm10, %v4916_v4  ;;  %v6507_v37 = vld [vmem:[#allocation7 + $0xe2] sm:$0xff]  ;;  %v5356_v4 = vld [vmem:[#allocation7 + $0x7a] sm:$0xff] }
0x1c18   :  { %9448 = vmatpush3.msk.msra.mxu0 %vm2238_vm11, %v11766_v31  ;;  %v6083_v31 = vld [vmem:[#allocation7 + $0xf4] sm:$0xff] }
0x1c19   :  { %9473 = vmatprep.subr.msk.mxu0 %vm2238_vm11, %v11819_v27 }
0x1c1a   :  { %9549 = vmatmul.mubr.msk.f32.gmra.mrb[90].mxu1 %vm1213_vm10, %v6102_v49  ;;  %9427 = vmatmul.mubr.msk.f32.gmra.mrb[78].mxu0 %vm1213_vm10, %v4917_v39  ;;  %v6508_v49 = vld [vmem:[#allocation7 + $0xea] sm:$0xff]  ;;  %v6511_v39 = vld [vmem:[#allocation7 + $0x102] sm:$0xff] }
0x1c1b   :  { %9553 = vmatprep.mubr.msk.f32.mxu1 %vm1213_vm10, %v6070_v0  ;;  %9429 = vmatprep.mubr.msk.f32.mxu0 %vm1213_vm10, %v4918_v44  ;;  %v6509_v0 = vld [vmem:[#allocation7 + $0xf2] sm:$0xff]  ;;  %v6725_v44 = vld [vmem:[#allocation7 + $0x89] sm:$0xff] }
0x1c1e   :  { %9554 = vmatmul.mubr.msk.f32.vlgmr.msra.gmra.mrb[76].mxu1 %vm1213_vm10, %v6071_v28  ;;  %9430 = vmatmul.mubr.msk.f32.gmra.mrb[80].mxu0 %vm1213_vm10, %v4919_v36  ;;  %v5571_v28 = vld [vmem:[#allocation7 + $0x1] sm:$0xff]  ;;  %v5574_v36 = vld [vmem:[#allocation7 + $0x19] sm:$0xff] }
0x1c1f   :  { %9556 = vmatprep.mubr.msk.f32.mxu1 %vm1213_vm10, %v6072_v58  ;;  %9578 = vmatpush3.msk.msra.mxu1 %vm2238_vm11, %v11782_v48  ;;  %v5343_v48 = vld [vmem:[#allocation7 + $0x12] sm:$0xff]  ;;  %v5572_v58 = vld [vmem:[#allocation7 + $0x9] sm:$0xff] }
0x1c20   :  { %9603 = vmatprep.subr.msk.mxu1 %vm2238_vm11, %v11832_v35  ;;  %9432 = vmatprep.mubr.msk.f32.mxu0 %vm1213_vm10, %v4920_v43  ;;  %v5575_v43 = vld [vmem:[#allocation7 + $0x21] sm:$0xff] }
0x1c22   :  { %9557 = vmatmul.mubr.msk.f32.gmra.mrb[78].mxu1 %vm1213_vm10, %v6073_v40  ;;  %9433 = vmatmul.mubr.msk.f32.gmra.mrb[82].mxu0 %vm1213_vm10, %v4921_v5  ;;  %v6726_v40 = vld [vmem:[#allocation7 + $0x91] sm:$0xff]  ;;  %v5576_v5 = vld [vmem:[#allocation7 + $0x29] sm:$0xff] }
0x1c23   :  { %9559 = vmatprep.mubr.msk.f32.mxu1 %vm1213_vm10, %v6074_v41  ;;  %9435 = vmatprep.mubr.msk.f32.mxu0 %vm1213_vm10, %v4922_v56  ;;  %v6727_v41 = vld [vmem:[#allocation7 + $0x99] sm:$0xff]  ;;  %v5577_v56 = vld [vmem:[#allocation7 + $0x31] sm:$0xff] }
0x1c26   :  { %9560 = vmatmul.mubr.msk.f32.gmra.mrb[80].mxu1 %vm1213_vm10, %v6075_v52  ;;  %9436 = vmatmul.mubr.msk.f32.gmra.mrb[84].mxu0 %vm1213_vm10, %v4923_v61  ;;  %v6728_v52 = vld [vmem:[#allocation7 + $0xa1] sm:$0xff]  ;;  %v5578_v61 = vld [vmem:[#allocation7 + $0x39] sm:$0xff] }
0x1c27   :  { %9562 = vmatprep.mubr.msk.f32.mxu1 %vm1213_vm10, %v6076_v55  ;;  %9438 = vmatprep.mubr.msk.f32.mxu0 %vm1213_vm10, %v4924_v8  ;;  %v6729_v55 = vld [vmem:[#allocation7 + $0xa9] sm:$0xff]  ;;  %v5579_v8 = vld [vmem:[#allocation7 + $0x41] sm:$0xff] }
0x1c2a   :  { %9563 = vmatmul.mubr.msk.f32.gmra.mrb[82].mxu1 %vm1213_vm10, %v6077_v14  ;;  %9439 = vmatmul.mubr.msk.f32.gmra.mrb[86].mxu0 %vm1213_vm10, %v4925_v13  ;;  %v6730_v14 = vld [vmem:[#allocation7 + $0xb1] sm:$0xff]  ;;  %v5580_v13 = vld [vmem:[#allocation7 + $0x49] sm:$0xff] }
0x1c2b   :  { %9565 = vmatprep.mubr.msk.f32.mxu1 %vm1213_vm10, %v6078_v11  ;;  %9441 = vmatprep.mubr.msk.f32.mxu0 %vm1213_vm10, %v4926_v47  ;;  %v6731_v11 = vld [vmem:[#allocation7 + $0xb9] sm:$0xff]  ;;  %v5581_v47 = vld [vmem:[#allocation7 + $0x51] sm:$0xff] }
0x1c2e   :  { %9566 = vmatmul.mubr.msk.f32.gmra.mrb[84].mxu1 %vm1213_vm10, %v6079_v63  ;;  %9442 = vmatmul.mubr.msk.f32.gmra.mrb[88].mxu0 %vm1213_vm10, %v4927_v30  ;;  %v6732_v63 = vld [vmem:[#allocation7 + $0xc1] sm:$0xff]  ;;  %v5582_v30 = vld [vmem:[#allocation7 + $0x59] sm:$0xff] }
0x1c2f   :  { %9568 = vmatprep.mubr.msk.f32.mxu1 %vm1213_vm10, %v6080_v45  ;;  %9444 = vmatprep.mubr.msk.f32.mxu0 %vm1213_vm10, %v4928_v33  ;;  %v6733_v45 = vld [vmem:[#allocation7 + $0xc9] sm:$0xff]  ;;  %v5583_v33 = vld [vmem:[#allocation7 + $0x61] sm:$0xff] }
0x1c32   :  { %9569 = vmatmul.mubr.msk.f32.gmra.mrb[86].mxu1 %vm1213_vm10, %v6081_v2  ;;  %9445 = vmatmul.mubr.msk.f32.gmra.mrb[90].mxu0 %vm1213_vm10, %v4929_v51  ;;  %v6734_v2 = vld [vmem:[#allocation7 + $0xd1] sm:$0xff]  ;;  %v5584_v51 = vld [vmem:[#allocation7 + $0x69] sm:$0xff] }
0x1c33   :  { %9571 = vmatprep.mubr.msk.f32.mxu1 %vm1213_vm10, %v6082_v25  ;;  %9449 = vmatprep.mubr.msk.f32.mxu0 %vm1213_vm10, %v5341_v42  ;;  %v6735_v25 = vld [vmem:[#allocation7 + $0xd9] sm:$0xff]  ;;  %v5585_v42 = vld [vmem:[#allocation7 + $0x71] sm:$0xff] }
0x1c36   :  { %9572 = vmatmul.mubr.msk.f32.gmra.mrb[88].mxu1 %vm1213_vm10, %v6083_v31  ;;  %9450 = vmatmul.mubr.msk.f32.vlgmr.msra.gmra.mrb[76].mxu0 %vm1213_vm10, %v5342_v34  ;;  %v6736_v31 = vld [vmem:[#allocation7 + $0xe1] sm:$0xff]  ;;  %v5586_v34 = vld [vmem:[#allocation7 + $0x79] sm:$0xff] }
0x1c37   :  { %9574 = vmatprep.mubr.msk.f32.mxu1 %vm1213_vm10, %v6084_v9  ;;  %9452 = vmatprep.mubr.msk.f32.mxu0 %vm1213_vm10, %v5343_v48  ;;  %v6737_v9 = vld [vmem:[#allocation7 + $0xe9] sm:$0xff]  ;;  %v5801_v48 = vld [vmem:[#allocation7] sm:$0xff] }
0x1c38   :  { %9474 = vmatpush3.msk.msra.mxu0 %vm2238_vm11, %v11819_v27  ;;  %v6510_v27 = vld [vmem:[#allocation7 + $0xfa] sm:$0xff] }
0x1c39   :  { %9499 = vmatprep.subr.msk.mxu0 %vm2238_vm11, %v11869_v22 }
0x1c3a   :  { %9575 = vmatmul.mubr.msk.f32.gmra.mrb[90].mxu1 %vm1213_vm10, %v6085_v57  ;;  %9453 = vmatmul.mubr.msk.f32.gmra.mrb[78].mxu0 %vm1213_vm10, %v5344_v3  ;;  %v6738_v57 = vld [vmem:[#allocation7 + $0xf1] sm:$0xff]  ;;  %v6954_v3 = vld [vmem:[#allocation7 + $0x88] sm:$0xff] }
0x1c3b   :  { %9579 = vmatprep.mubr.msk.f32.mxu1 %vm1213_vm10, %v6496_v7  ;;  %9455 = vmatprep.mubr.msk.f32.mxu0 %vm1213_vm10, %v5345_v12  ;;  %v6739_v7 = vld [vmem:[#allocation7 + $0xf9] sm:$0xff]  ;;  %v6955_v12 = vld [vmem:[#allocation7 + $0x90] sm:$0xff] }
0x1c3e   :  { %9580 = vmatmul.mubr.msk.f32.vlgmr.msra.gmra.mrb[76].mxu1 %vm1213_vm10, %v6497_v20  ;;  %9456 = vmatmul.mubr.msk.f32.gmra.mrb[80].mxu0 %vm1213_vm10, %v5346_v16  ;;  %v5802_v20 = vld [vmem:[#allocation7 + $0x8] sm:$0xff]  ;;  %v5805_v16 = vld [vmem:[#allocation7 + $0x20] sm:$0xff] }
0x1c3f   :  { %9582 = vmatprep.mubr.msk.f32.mxu1 %vm1213_vm10, %v6498_v10  ;;  %9604 = vmatpush3.msk.msra.mxu1 %vm2238_vm11, %v11832_v35  ;;  %v5573_v35 = vld [vmem:[#allocation7 + $0x11] sm:$0xff] }
0x1c40   :  { %9629 = vmatprep.subr.msk.mxu1 %vm2238_vm11, %v11882_v15  ;;  %9458 = vmatprep.mubr.msk.f32.mxu0 %vm1213_vm10, %v5347_v21  ;;  %v5803_v10 = vld [vmem:[#allocation7 + $0x10] sm:$0xff]  ;;  %v5806_v21 = vld [vmem:[#allocation7 + $0x28] sm:$0xff] }
0x1c42   :  { %9583 = vmatmul.mubr.msk.f32.gmra.mrb[78].mxu1 %vm1213_vm10, %v6499_v6  ;;  %9459 = vmatmul.mubr.msk.f32.gmra.mrb[82].mxu0 %vm1213_vm10, %v5348_v23  ;;  %v6956_v6 = vld [vmem:[#allocation7 + $0x98] sm:$0xff]  ;;  %v5807_v23 = vld [vmem:[#allocation7 + $0x30] sm:$0xff] }
0x1c43   :  { %9585 = vmatprep.mubr.msk.f32.mxu1 %vm1213_vm10, %v6500_v18  ;;  %9461 = vmatprep.mubr.msk.f32.mxu0 %vm1213_vm10, %v5349_v32  ;;  %v6957_v18 = vld [vmem:[#allocation7 + $0xa0] sm:$0xff]  ;;  %v5808_v32 = vld [vmem:[#allocation7 + $0x38] sm:$0xff] }
0x1c46   :  { %9586 = vmatmul.mubr.msk.f32.gmra.mrb[80].mxu1 %vm1213_vm10, %v6501_v26  ;;  %9462 = vmatmul.mubr.msk.f32.gmra.mrb[84].mxu0 %vm1213_vm10, %v5350_v17  ;;  %v6958_v26 = vld [vmem:[#allocation7 + $0xa8] sm:$0xff]  ;;  %v5809_v17 = vld [vmem:[#allocation7 + $0x40] sm:$0xff] }
0x1c47   :  { %9588 = vmatprep.mubr.msk.f32.mxu1 %vm1213_vm10, %v6502_v29  ;;  %9464 = vmatprep.mubr.msk.f32.mxu0 %vm1213_vm10, %v5351_v24  ;;  %v6959_v29 = vld [vmem:[#allocation7 + $0xb0] sm:$0xff]  ;;  %v5810_v24 = vld [vmem:[#allocation7 + $0x48] sm:$0xff] }
0x1c4a   :  { %9589 = vmatmul.mubr.msk.f32.gmra.mrb[82].mxu1 %vm1213_vm10, %v6503_v46  ;;  %9465 = vmatmul.mubr.msk.f32.gmra.mrb[86].mxu0 %vm1213_vm10, %v5352_v59  ;;  %v6960_v46 = vld [vmem:[#allocation7 + $0xb8] sm:$0xff]  ;;  %v5811_v59 = vld [vmem:[#allocation7 + $0x50] sm:$0xff] }
0x1c4b   :  { %9591 = vmatprep.mubr.msk.f32.mxu1 %vm1213_vm10, %v6504_v54  ;;  %9467 = vmatprep.mubr.msk.f32.mxu0 %vm1213_vm10, %v5353_v38  ;;  %v6961_v54 = vld [vmem:[#allocation7 + $0xc0] sm:$0xff]  ;;  %v5812_v38 = vld [vmem:[#allocation7 + $0x58] sm:$0xff] }
0x1c4e   :  { %9592 = vmatmul.mubr.msk.f32.gmra.mrb[84].mxu1 %vm1213_vm10, %v6505_v53  ;;  %9468 = vmatmul.mubr.msk.f32.gmra.mrb[88].mxu0 %vm1213_vm10, %v5354_v50  ;;  %v6962_v53 = vld [vmem:[#allocation7 + $0xc8] sm:$0xff]  ;;  %v5813_v50 = vld [vmem:[#allocation7 + $0x60] sm:$0xff] }
0x1c4f   :  { %9594 = vmatprep.mubr.msk.f32.mxu1 %vm1213_vm10, %v6506_v19  ;;  %9470 = vmatprep.mubr.msk.f32.mxu0 %vm1213_vm10, %v5355_v1  ;;  %v6963_v19 = vld [vmem:[#allocation7 + $0xd0] sm:$0xff]  ;;  %v5814_v1 = vld [vmem:[#allocation7 + $0x68] sm:$0xff] }
0x1c52   :  { %9595 = vmatmul.mubr.msk.f32.gmra.mrb[86].mxu1 %vm1213_vm10, %v6507_v37  ;;  %9471 = vmatmul.mubr.msk.f32.gmra.mrb[90].mxu0 %vm1213_vm10, %v5356_v4  ;;  %v6964_v37 = vld [vmem:[#allocation7 + $0xd8] sm:$0xff]  ;;  %v5815_v4 = vld [vmem:[#allocation7 + $0x70] sm:$0xff] }
0x1c53   :  { %9597 = vmatprep.mubr.msk.f32.mxu1 %vm1213_vm10, %v6508_v49  ;;  %9475 = vmatprep.mubr.msk.f32.mxu0 %vm1213_vm10, %v5571_v28  ;;  %v6965_v49 = vld [vmem:[#allocation7 + $0xe0] sm:$0xff]  ;;  %v5816_v28 = vld [vmem:[#allocation7 + $0x78] sm:$0xff] }
0x1c56   :  { %9598 = vmatmul.mubr.msk.f32.gmra.mrb[88].mxu1 %vm1213_vm10, %v6509_v0  ;;  %9476 = vmatmul.mubr.msk.f32.vlgmr.msra.gmra.mrb[76].mxu0 %vm1213_vm10, %v5572_v58  ;;  %v6966_v0 = vld [vmem:[#allocation7 + $0xe8] sm:$0xff]  ;;  %v6969_v58 = vld [vmem:[#allocation7 + $0x100] sm:$0xff] }
0x1c57   :  { %9600 = vmatprep.mubr.msk.f32.mxu1 %vm1213_vm10, %v6510_v27  ;;  %9478 = vmatprep.mubr.msk.f32.mxu0 %vm1213_vm10, %v5573_v35  ;;  %v6967_v27 = vld [vmem:[#allocation7 + $0xf0] sm:$0xff] }
0x1c58   :  { %9500 = vmatpush3.msk.msra.mxu0 %vm2238_vm11, %v11869_v22  ;;  %v6740_v22 = vld [vmem:[#allocation7 + $0x101] sm:$0xff] }
0x1c59   :  { %9791 = vmatprep.subr.bf16.mxu0 %v10214_v60 }
0x1c5a   :  { %9601 = vmatmul.mubr.msk.f32.gmra.mrb[90].mxu1 %vm1213_vm10, %v6511_v39  ;;  %9479 = vmatmul.mubr.msk.f32.gmra.mrb[78].mxu0 %vm1213_vm10, %v5574_v36  ;;  %v6968_v39 = vld [vmem:[#allocation7 + $0xf8] sm:$0xff] }
0x1c5b   :  { %9605 = vmatprep.mubr.msk.f32.mxu1 %vm1213_vm10, %v6725_v44  ;;  %9481 = vmatprep.mubr.msk.f32.mxu0 %vm1213_vm10, %v5575_v43  ;;  %v11991_v44 = vld [vmem:[%s12636_s17] ss:$0 sm:$0xff] }
0x1c5e   :  { %9606 = vmatmul.mubr.msk.f32.vlgmr.msra.gmra.mrb[76].mxu1 %vm1213_vm10, %v6726_v40  ;;  %9482 = vmatmul.mubr.msk.f32.gmra.mrb[80].mxu0 %vm1213_vm10, %v5576_v5 }
0x1c5f   :  { %9608 = vmatprep.mubr.msk.f32.mxu1 %vm1213_vm10, %v6727_v41  ;;  %9630 = vmatpush3.msk.msra.mxu1 %vm2238_vm11, %v11882_v15  ;;  %v5804_v15 = vld [vmem:[#allocation7 + $0x18] sm:$0xff] }
0x1c60   :  { %9823 = vmatprep.subr.bf16.mxu1 %v10214_v60  ;;  %9484 = vmatprep.mubr.msk.f32.mxu0 %vm1213_vm10, %v5577_v56 }
0x1c62   :  { %9609 = vmatmul.mubr.msk.f32.gmra.mrb[78].mxu1 %vm1213_vm10, %v6728_v52  ;;  %9485 = vmatmul.mubr.msk.f32.gmra.mrb[82].mxu0 %vm1213_vm10, %v5578_v61 }
0x1c63   :  { %9611 = vmatprep.mubr.msk.f32.mxu1 %vm1213_vm10, %v6729_v55  ;;  %9487 = vmatprep.mubr.msk.f32.mxu0 %vm1213_vm10, %v5579_v8 }
0x1c66   :  { %9612 = vmatmul.mubr.msk.f32.gmra.mrb[80].mxu1 %vm1213_vm10, %v6730_v14  ;;  %9488 = vmatmul.mubr.msk.f32.gmra.mrb[84].mxu0 %vm1213_vm10, %v5580_v13 }
0x1c67   :  { %9614 = vmatprep.mubr.msk.f32.mxu1 %vm1213_vm10, %v6731_v11  ;;  %9490 = vmatprep.mubr.msk.f32.mxu0 %vm1213_vm10, %v5581_v47 }
0x1c6a   :  { %9615 = vmatmul.mubr.msk.f32.gmra.mrb[82].mxu1 %vm1213_vm10, %v6732_v63  ;;  %9491 = vmatmul.mubr.msk.f32.gmra.mrb[86].mxu0 %vm1213_vm10, %v5582_v30 }
0x1c6b   :  { %9617 = vmatprep.mubr.msk.f32.mxu1 %vm1213_vm10, %v6733_v45  ;;  %9493 = vmatprep.mubr.msk.f32.mxu0 %vm1213_vm10, %v5583_v33 }
0x1c6e   :  { %9618 = vmatmul.mubr.msk.f32.gmra.mrb[84].mxu1 %vm1213_vm10, %v6734_v2  ;;  %9494 = vmatmul.mubr.msk.f32.gmra.mrb[88].mxu0 %vm1213_vm10, %v5584_v51 }
0x1c6f   :  { %9620 = vmatprep.mubr.msk.f32.mxu1 %vm1213_vm10, %v6735_v25  ;;  %9496 = vmatprep.mubr.msk.f32.mxu0 %vm1213_vm10, %v5585_v42 }
0x1c72   :  { %9621 = vmatmul.mubr.msk.f32.gmra.mrb[86].mxu1 %vm1213_vm10, %v6736_v31  ;;  %9497 = vmatmul.mubr.msk.f32.gmra.mrb[90].mxu0 %vm1213_vm10, %v5586_v34 }
0x1c73   :  { %9623 = vmatprep.mubr.msk.f32.mxu1 %vm1213_vm10, %v6737_v9  ;;  %9501 = vmatprep.mubr.msk.f32.mxu0 %vm1213_vm10, %v5801_v48 }
0x1c76   :  { %9624 = vmatmul.mubr.msk.f32.gmra.mrb[88].mxu1 %vm1213_vm10, %v6738_v57  ;;  %9502 = vmatmul.mubr.msk.f32.vlgmr.msra.gmra.mrb[76].mxu0 %vm1213_vm10, %v5802_v20 }
0x1c77   :  { %9626 = vmatprep.mubr.msk.f32.mxu1 %vm1213_vm10, %v6739_v7  ;;  %9504 = vmatprep.mubr.msk.f32.mxu0 %vm1213_vm10, %v5803_v10 }
0x1c7a   :  { %9627 = vmatmul.mubr.msk.f32.gmra.mrb[90].mxu1 %vm1213_vm10, %v6740_v22  ;;  %9505 = vmatmul.mubr.msk.f32.gmra.mrb[78].mxu0 %vm1213_vm10, %v5804_v15 }
0x1c7b   :  { %9631 = vmatprep.mubr.msk.f32.mxu1 %vm1213_vm10, %v6954_v3  ;;  %9507 = vmatprep.mubr.msk.f32.mxu0 %vm1213_vm10, %v5805_v16 }
0x1c7e   :  { %9632 = vmatmul.mubr.msk.f32.vlgmr.msra.gmra.mrb[76].mxu1 %vm1213_vm10, %v6955_v12  ;;  %9508 = vmatmul.mubr.msk.f32.gmra.mrb[80].mxu0 %vm1213_vm10, %v5806_v21 }
0x1c7f   :  { %9634 = vmatprep.mubr.msk.f32.mxu1 %vm1213_vm10, %v6956_v6  ;;  %9510 = vmatprep.mubr.msk.f32.mxu0 %vm1213_vm10, %v5807_v23 }
0x1c82   :  { %9635 = vmatmul.mubr.msk.f32.gmra.mrb[78].mxu1 %vm1213_vm10, %v6957_v18  ;;  %9511 = vmatmul.mubr.msk.f32.gmra.mrb[82].mxu0 %vm1213_vm10, %v5808_v32 }
0x1c83   :  { %9637 = vmatprep.mubr.msk.f32.mxu1 %vm1213_vm10, %v6958_v26  ;;  %9513 = vmatprep.mubr.msk.f32.mxu0 %vm1213_vm10, %v5809_v17 }
0x1c86   :  { %9638 = vmatmul.mubr.msk.f32.gmra.mrb[80].mxu1 %vm1213_vm10, %v6959_v29  ;;  %9514 = vmatmul.mubr.msk.f32.gmra.mrb[84].mxu0 %vm1213_vm10, %v5810_v24 }
0x1c87   :  { %9640 = vmatprep.mubr.msk.f32.mxu1 %vm1213_vm10, %v6960_v46  ;;  %9516 = vmatprep.mubr.msk.f32.mxu0 %vm1213_vm10, %v5811_v59 }
0x1c8a   :  { %9641 = vmatmul.mubr.msk.f32.gmra.mrb[82].mxu1 %vm1213_vm10, %v6961_v54  ;;  %9517 = vmatmul.mubr.msk.f32.gmra.mrb[86].mxu0 %vm1213_vm10, %v5812_v38 }
0x1c8b   :  { %9643 = vmatprep.mubr.msk.f32.mxu1 %vm1213_vm10, %v6962_v53  ;;  %9519 = vmatprep.mubr.msk.f32.mxu0 %vm1213_vm10, %v5813_v50 }
0x1c8e   :  { %9644 = vmatmul.mubr.msk.f32.gmra.mrb[84].mxu1 %vm1213_vm10, %v6963_v19  ;;  %9520 = vmatmul.mubr.msk.f32.gmra.mrb[88].mxu0 %vm1213_vm10, %v5814_v1 }
0x1c8f   :  { %9646 = vmatprep.mubr.msk.f32.mxu1 %vm1213_vm10, %v6964_v37  ;;  %9522 = vmatprep.mubr.msk.f32.mxu0 %vm1213_vm10, %v5815_v4 }
0x1c92   :  { %9647 = vmatmul.mubr.msk.f32.gmra.mrb[86].mxu1 %vm1213_vm10, %v6965_v49  ;;  %9523 = vmatmul.mubr.msk.f32.gmra.mrb[90].mxu0 %vm1213_vm10, %v5816_v28 }
0x1c93   :  { %9649 = vmatprep.mubr.msk.f32.mxu1 %vm1213_vm10, %v6966_v0  ;;  %9687 = vmatprep.mubr.msk.f32.mxu0 %vm10215_vm9, %v10216_v62 }
0x1c96   :  { %9650 = vmatmul.mubr.msk.f32.gmra.mrb[88].mxu1 %vm1213_vm10, %v6967_v27 }
0x1c97   :  { %9652 = vmatprep.mubr.msk.f32.mxu1 %vm1213_vm10, %v6968_v39 }
0x1c9a   :  { %9653 = vmatmul.mubr.msk.f32.gmra.mrb[90].mxu1 %vm1213_vm10, %v6969_v58 }
0x1c9b   :  { %9722 = vmatprep.mubr.msk.f32.mxu1 %vm10215_vm9, %v10216_v62 }
0x1d49   :  { %v9503_v35 = vpop.f32.mrb[76].mxu0 }
0x1d4a   :  { %v6039_v40 = vadd.f32 %v9503_v35, %v11991_v44  ;;  %v5936_v36 = vpop.f32.mrb[77].mxu0 }
0x1d4b   :  { %v6038_v41 = vadd.f32 %v11991_v44, %v5936_v36 }
0x1d4c   :  { %6055 = vst.msk [vmem:[#allocation8 + $0x8] sm:$0xff] %vm1213_vm10, %v6039_v40 }
0x1d4d   :  { %6054 = vst.msk [vmem:[#allocation8] sm:$0xff] %vm1213_vm10, %v6038_v41  ;;  %v9506_v52 = vpop.f32.mrb[78].mxu0 }
0x1d4e   :  { %v6041_v55 = vadd.f32 %v9506_v52, %v11991_v44  ;;  %v5946_v56 = vpop.f32.mrb[79].mxu0 }
0x1d4f   :  { %v6040_v61 = vadd.f32 %v11991_v44, %v5946_v56 }
0x1d50   :  { %6057 = vst.msk [vmem:[#allocation8 + $0x18] sm:$0xff] %vm1213_vm10, %v6041_v55 }
0x1d51   :  { %v9633_v43 = vpop.f32.mrb[76].mxu1  ;;  %6056 = vst.msk [vmem:[#allocation8 + $0x10] sm:$0xff] %vm1213_vm10, %v6040_v61  ;;  %v9509_v8 = vpop.f32.mrb[80].mxu0 }
0x1d52   :  { %v7191_v5 = vadd.f32 %v9633_v43, %v11991_v44  ;;  %v7088_v62 = vpop.f32.mrb[77].mxu1  ;;  %v6043_v45 = vadd.f32 %v9509_v8, %v11991_v44  ;;  %v5956_v47 = vpop.f32.mrb[81].mxu0 }
0x1d53   :  { %v7190_v14 = vadd.f32 %v11991_v44, %v7088_v62  ;;  %v6042_v30 = vadd.f32 %v11991_v44, %v5956_v47  ;;  %v12009_v25 = vld [vmem:[#allocation8 + $0x8] sm:$0xff] }
0x1d54   :  { %7208 = vst.msk [vmem:[#allocation8 + $0x88] sm:$0xff] %vm1213_vm10, %v7191_v5  ;;  %6059 = vst.msk [vmem:[#allocation8 + $0x28] sm:$0xff] %vm1213_vm10, %v6043_v45  ;;  %v12013_v33 = vld [vmem:[#allocation8] sm:$0xff]  ;;  %v7256_v42 = vsel %vm1213_vm10, %v12009_v25, 0.0 }
0x1d55   :  { %7207 = vst.msk [vmem:[#allocation8 + $0x80] sm:$0xff] %vm1213_vm10, %v7190_v14  ;;  %v9636_v11 = vpop.f32.mrb[78].mxu1  ;;  %6058 = vst.msk [vmem:[#allocation8 + $0x20] sm:$0xff] %vm1213_vm10, %v6042_v30  ;;  %v9512_v51 = vpop.f32.mrb[82].mxu0  ;;  %v7255_v9 = vsel %vm1213_vm10, %v12013_v33, 0.0 }
0x1d56   :  { %v7193_v63 = vadd.f32 %v9636_v11, %v11991_v44  ;;  %v7098_v13 = vpop.f32.mrb[79].mxu1  ;;  %v6045_v7 = vadd.f32 %v9512_v51, %v11991_v44  ;;  %v5966_v48 = vpop.f32.mrb[83].mxu0  ;;  %v7257_v12 = vadd.f32 %v7256_v42, %v7255_v9 }
0x1d57   :  { %v7192_v2 = vadd.f32 %v11991_v44, %v7098_v13  ;;  %v6044_v20 = vadd.f32 %v11991_v44, %v5966_v48  ;;  %v12029_v10 = vld [vmem:[#allocation8 + $0x18] sm:$0xff] }
0x1d58   :  { %7210 = vst.msk [vmem:[#allocation8 + $0x98] sm:$0xff] %vm1213_vm10, %v7193_v63  ;;  %6061 = vst.msk [vmem:[#allocation8 + $0x38] sm:$0xff] %vm1213_vm10, %v6045_v7  ;;  %v12027_v3 = vld [vmem:[#allocation8 + $0x10] sm:$0xff]  ;;  %v7260_v17 = vsel %vm1213_vm10, %v12029_v10, 0.0 }
0x1d59   :  { %7209 = vst.msk [vmem:[#allocation8 + $0x90] sm:$0xff] %vm1213_vm10, %v7192_v2  ;;  %v9639_v31 = vpop.f32.mrb[80].mxu1  ;;  %6060 = vst.msk [vmem:[#allocation8 + $0x30] sm:$0xff] %vm1213_vm10, %v6044_v20  ;;  %v9515_v6 = vpop.f32.mrb[84].mxu0  ;;  %v7258_v16 = vsel %vm1213_vm10, %v12027_v3, 0.0 }
0x1d5a   :  { %v7195_v57 = vadd.f32 %v9639_v31, %v11991_v44  ;;  %v7108_v34 = vpop.f32.mrb[81].mxu1  ;;  %v6047_v26 = vadd.f32 %v9515_v6, %v11991_v44  ;;  %v5976_v23 = vpop.f32.mrb[85].mxu0  ;;  %v7259_v29 = vadd.f32 %v7258_v16, %v7257_v12 }
0x1d5b   :  { %v7194_v22 = vadd.f32 %v11991_v44, %v7108_v34  ;;  %v6046_v46 = vadd.f32 %v11991_v44, %v5976_v23  ;;  %v12045_v24 = vld [vmem:[#allocation8 + $0x28] sm:$0xff] }
0x1d5c   :  { %7212 = vst.msk [vmem:[#allocation8 + $0xa8] sm:$0xff] %vm1213_vm10, %v7195_v57  ;;  %6063 = vst.msk [vmem:[#allocation8 + $0x48] sm:$0xff] %vm1213_vm10, %v6047_v26  ;;  %v12043_v54 = vld [vmem:[#allocation8 + $0x20] sm:$0xff]  ;;  %v7261_v53 = vadd.f32 %v7260_v17, %v7259_v29  ;;  %v7264_v28 = vsel %vm1213_vm10, %v12045_v24, 0.0 }
0x1d5d   :  { %7211 = vst.msk [vmem:[#allocation8 + $0xa0] sm:$0xff] %vm1213_vm10, %v7194_v22  ;;  %v9642_v15 = vpop.f32.mrb[82].mxu1  ;;  %6062 = vst.msk [vmem:[#allocation8 + $0x40] sm:$0xff] %vm1213_vm10, %v6046_v46  ;;  %v9518_v19 = vpop.f32.mrb[86].mxu0  ;;  %v7262_v38 = vsel %vm1213_vm10, %v12043_v54, 0.0 }
0x1d5e   :  { %v7197_v18 = vadd.f32 %v9642_v15, %v11991_v44  ;;  %v7118_v21 = vpop.f32.mrb[83].mxu1  ;;  %v6049_v49 = vadd.f32 %v9518_v19, %v11991_v44  ;;  %v5986_v1 = vpop.f32.mrb[87].mxu0  ;;  %v7263_v0 = vadd.f32 %v7262_v38, %v7261_v53  ;;  %v12119_v38 = vld [vmem:[#allocation8 + $0x80] sm:$0xff] }
0x1d5f   :  { %v7196_v32 = vadd.f32 %v11991_v44, %v7118_v21  ;;  %v6048_v27 = vadd.f32 %v11991_v44, %v5986_v1  ;;  %v12057_v39 = vld [vmem:[#allocation8 + $0x38] sm:$0xff] }
0x1d60   :  { %7214 = vst.msk [vmem:[#allocation8 + $0xb8] sm:$0xff] %vm1213_vm10, %v7197_v18  ;;  %v12059_v58 = vld [vmem:[#allocation8 + $0x30] sm:$0xff]  ;;  %6065 = vst.msk [vmem:[#allocation8 + $0x58] sm:$0xff] %vm1213_vm10, %v6049_v49  ;;  %v7265_v35 = vadd.f32 %v7264_v28, %v7263_v0  ;;  %v7268_v56 = vsel %vm1213_vm10, %v12057_v39, 0.0  ;;  %v12123_v49 = vld [vmem:[#allocation8 + $0x88] sm:$0xff]  ;;  %v7286_v0 = vsel %vm1213_vm10, %v12119_v38, 0.0 }
0x1d61   :  { %7213 = vst.msk [vmem:[#allocation8 + $0xb0] sm:$0xff] %vm1213_vm10, %v7196_v32  ;;  %v9645_v59 = vpop.f32.mrb[84].mxu1  ;;  %6064 = vst.msk [vmem:[#allocation8 + $0x50] sm:$0xff] %vm1213_vm10, %v6048_v27  ;;  %v9521_v36 = vpop.f32.mrb[88].mxu0  ;;  %v7266_v41 = vsel %vm1213_vm10, %v12059_v58, 0.0  ;;  %v7288_v28 = vsel %vm1213_vm10, %v12123_v49, 0.0 }
0x1d62   :  { %v7199_v37 = vadd.f32 %v9645_v59, %v11991_v44  ;;  %v7128_v50 = vpop.f32.mrb[85].mxu1  ;;  %v6051_v5 = vadd.f32 %v9521_v36, %v11991_v44  ;;  %v5996_v62 = vpop.f32.mrb[89].mxu0  ;;  %v7267_v55 = vadd.f32 %v7266_v41, %v7265_v35  ;;  %v12131_v35 = vld [vmem:[#allocation8 + $0x98] sm:$0xff] }
0x1d63   :  { %v7198_v4 = vadd.f32 %v11991_v44, %v7128_v50  ;;  %v6050_v61 = vadd.f32 %v11991_v44, %v5996_v62  ;;  %v12073_v11 = vld [vmem:[#allocation8 + $0x48] sm:$0xff] }
0x1d64   :  { %7216 = vst.msk [vmem:[#allocation8 + $0xc8] sm:$0xff] %vm1213_vm10, %v7199_v37  ;;  %v12075_v8 = vld [vmem:[#allocation8 + $0x40] sm:$0xff]  ;;  %6067 = vst.msk [vmem:[#allocation8 + $0x68] sm:$0xff] %vm1213_vm10, %v6051_v5  ;;  %v7269_v63 = vadd.f32 %v7268_v56, %v7267_v55  ;;  %v7272_v42 = vsel %vm1213_vm10, %v12073_v11, 0.0  ;;  %v12139_v5 = vld [vmem:[#allocation8 + $0xa8] sm:$0xff] }
0x1d65   :  { %7215 = vst.msk [vmem:[#allocation8 + $0xc0] sm:$0xff] %vm1213_vm10, %v7198_v4  ;;  %v9648_v40 = vpop.f32.mrb[86].mxu1  ;;  %v7270_v13 = vsel %vm1213_vm10, %v12075_v8, 0.0  ;;  %6066 = vst.msk [vmem:[#allocation8 + $0x60] sm:$0xff] %vm1213_vm10, %v6050_v61  ;;  %v9524_v47 = vpop.f32.mrb[90].mxu0  ;;  %v12127_v4 = vld [vmem:[#allocation8 + $0x90] sm:$0xff] }
0x1d66   :  { %v7201_v43 = vadd.f32 %v9648_v40, %v11991_v44  ;;  %v7138_v52 = vpop.f32.mrb[87].mxu1  ;;  %v6053_v31 = vadd.f32 %v9524_v47, %v11991_v44  ;;  %v6006_v51 = vpop.f32.mrb[91].mxu0  ;;  %v7271_v9 = vadd.f32 %v7270_v13, %v7269_v63  ;;  %v7290_v36 = vsel %vm1213_vm10, %v12127_v4, 0.0  ;;  %v12135_v41 = vld [vmem:[#allocation8 + $0xa0] sm:$0xff] }
0x1d67   :  { %v7200_v14 = vadd.f32 %v11991_v44, %v7138_v52  ;;  %v6052_v34 = vadd.f32 %v11991_v44, %v6006_v51  ;;  %v12089_v7 = vld [vmem:[#allocation8 + $0x58] sm:$0xff]  ;;  %v7292_v52 = vsel %vm1213_vm10, %v12131_v35, 0.0  ;;  %v7294_v55 = vsel %vm1213_vm10, %v12135_v41, 0.0 }
0x1d68   :  { %7218 = vst.msk [vmem:[#allocation8 + $0xd8] sm:$0xff] %vm1213_vm10, %v7201_v43  ;;  %v12091_v48 = vld [vmem:[#allocation8 + $0x50] sm:$0xff]  ;;  %6069 = vst.msk [vmem:[#allocation8 + $0x78] sm:$0xff] %vm1213_vm10, %v6053_v31  ;;  %v7273_v22 = vadd.f32 %v7272_v42, %v7271_v9  ;;  %v7276_v18 = vsel %vm1213_vm10, %v12089_v7, 0.0  ;;  %v7296_v61 = vsel %vm1213_vm10, %v12139_v5, 0.0  ;;  %v12147_v63 = vld [vmem:[#allocation8 + $0xb8] sm:$0xff] }
0x1d69   :  { %7217 = vst.msk [vmem:[#allocation8 + $0xd0] sm:$0xff] %vm1213_vm10, %v7200_v14  ;;  %v9651_v45 = vpop.f32.mrb[88].mxu1  ;;  %v7274_v20 = vsel %vm1213_vm10, %v12091_v48, 0.0  ;;  %6068 = vst.msk [vmem:[#allocation8 + $0x70] sm:$0xff] %vm1213_vm10, %v6052_v34  ;;  %v12143_v56 = vld [vmem:[#allocation8 + $0xb0] sm:$0xff] }
0x1d6a   :  { %v7203_v2 = vadd.f32 %v9651_v45, %v11991_v44  ;;  %v7148_v30 = vpop.f32.mrb[89].mxu1  ;;  %v7275_v16 = vadd.f32 %v7274_v20, %v7273_v22  ;;  %v7298_v45 = vsel %vm1213_vm10, %v12143_v56, 0.0 }
0x1d6b   :  { %v7202_v57 = vadd.f32 %v11991_v44, %v7148_v30  ;;  %v12103_v26 = vld [vmem:[#allocation8 + $0x68] sm:$0xff]  ;;  %v7300_v30 = vsel %vm1213_vm10, %v12147_v63, 0.0 }
0x1d6c   :  { %7220 = vst.msk [vmem:[#allocation8 + $0xe8] sm:$0xff] %vm1213_vm10, %v7203_v2  ;;  %v12105_v23 = vld [vmem:[#allocation8 + $0x60] sm:$0xff]  ;;  %v7277_v29 = vadd.f32 %v7276_v18, %v7275_v16  ;;  %v7280_v17 = vsel %vm1213_vm10, %v12103_v26, 0.0  ;;  %v12155_v31 = vld [vmem:[#allocation8 + $0xc8] sm:$0xff] }
0x1d6d   :  { %7219 = vst.msk [vmem:[#allocation8 + $0xe0] sm:$0xff] %vm1213_vm10, %v7202_v57  ;;  %v9654_v12 = vpop.f32.mrb[90].mxu1  ;;  %v7278_v32 = vsel %vm1213_vm10, %v12105_v23, 0.0  ;;  %v12151_v47 = vld [vmem:[#allocation8 + $0xc0] sm:$0xff]  ;;  %v7304_v34 = vsel %vm1213_vm10, %v12155_v31, 0.0 }
0x1d6e   :  { %v7205_v15 = vadd.f32 %v9654_v12, %v11991_v44  ;;  %v7158_v6 = vpop.f32.mrb[91].mxu1  ;;  %v7279_v46 = vadd.f32 %v7278_v32, %v7277_v29  ;;  %v7302_v9 = vsel %vm1213_vm10, %v12151_v47, 0.0 }
0x1d6f   :  { %v7204_v21 = vadd.f32 %v11991_v44, %v7158_v6  ;;  %v12113_v53 = vld [vmem:[#allocation8 + $0x78] sm:$0xff] }
0x1d70   :  { %7222 = vst.msk [vmem:[#allocation8 + $0xf8] sm:$0xff] %vm1213_vm10, %v7205_v15  ;;  %v12115_v59 = vld [vmem:[#allocation8 + $0x70] sm:$0xff]  ;;  %v7281_v44 = vadd.f32 %v7280_v17, %v7279_v46  ;;  %v7284_v50 = vsel %vm1213_vm10, %v12113_v53, 0.0  ;;  %v12163_v22 = vld [vmem:[#allocation8 + $0xd8] sm:$0xff] }
0x1d71   :  { %7221 = vst.msk [vmem:[#allocation8 + $0xf0] sm:$0xff] %vm1213_vm10, %v7204_v21  ;;  %v7282_v19 = vsel %vm1213_vm10, %v12115_v59, 0.0  ;;  %v12159_v42 = vld [vmem:[#allocation8 + $0xd0] sm:$0xff]  ;;  %v7308_v16 = vsel %vm1213_vm10, %v12163_v22, 0.0 }
0x1d72   :  { %v7283_v37 = vadd.f32 %v7282_v19, %v7281_v44  ;;  %v7306_v12 = vsel %vm1213_vm10, %v12159_v42, 0.0 }
0x1d73   :  { %v12171_v18 = vld [vmem:[#allocation8 + $0xe8] sm:$0xff] }
0x1d74   :  { %v7285_v1 = vadd.f32 %v7284_v50, %v7283_v37  ;;  %v12167_v15 = vld [vmem:[#allocation8 + $0xe0] sm:$0xff]  ;;  %v7312_v46 = vsel %vm1213_vm10, %v12171_v18, 0.0 }
0x1d75   :  { %v7310_v29 = vsel %vm1213_vm10, %v12167_v15, 0.0 }
0x1d76   :  { %v7287_v27 = vadd.f32 %v7286_v0, %v7285_v1 }
0x1d77   :  { %v12181_v37 = vld [vmem:[#allocation8 + $0xf8] sm:$0xff] }
0x1d78   :  { %v7289_v40 = vadd.f32 %v7288_v28, %v7287_v27  ;;  %v12177_v17 = vld [vmem:[#allocation8 + $0xf0] sm:$0xff]  ;;  %v7316_v1 = vsel %vm1213_vm10, %v12181_v37, 0.0 }
0x1d79   :  { %v7314_v19 = vsel %vm1213_vm10, %v12177_v17, 0.0 }
0x1d7a   :  { %v7291_v43 = vadd.f32 %v7290_v36, %v7289_v40 }
0x1d7c   :  { %v7293_v62 = vadd.f32 %v7292_v52, %v7291_v43 }
0x1d7e   :  { %v7295_v14 = vadd.f32 %v7294_v55, %v7293_v62 }
0x1d80   :  { %v7297_v13 = vadd.f32 %v7296_v61, %v7295_v14 }
0x1d82   :  { %v7299_v2 = vadd.f32 %v7298_v45, %v7297_v13 }
0x1d84   :  { %v7301_v51 = vadd.f32 %v7300_v30, %v7299_v2 }
0x1d86   :  { %v7303_v57 = vadd.f32 %v7302_v9, %v7301_v51 }
0x1d88   :  { %v7305_v20 = vadd.f32 %v7304_v34, %v7303_v57 }
0x1d8a   :  { %v7307_v6 = vadd.f32 %v7306_v12, %v7305_v20 }
0x1d8c   :  { %v7309_v21 = vadd.f32 %v7308_v16, %v7307_v6 }
0x1d8e   :  { %v7311_v32 = vadd.f32 %v7310_v29, %v7309_v21 }
0x1d90   :  { %v7313_v44 = vadd.f32 %v7312_v46, %v7311_v32 }
0x1d92   :  { %v7315_v50 = vadd.f32 %v7314_v19, %v7313_v44 }
0x1d94   :  { %v7317_v0 = vadd.f32 %v7316_v1, %v7315_v50 }
0x1d96   :  { %v7318_v27 = vrot.slane %v7317_v0, 4 }
0x1d98   :  { %v7319_v28 = vadd.f32 %v7318_v27, %v7317_v0 }
0x1d9a   :  { %v7320_v40 = vrot.slane %v7319_v28, 2 }
0x1d9c   :  { %v7321_v36 = vadd.f32 %v7320_v40, %v7319_v28 }
0x1d9e   :  { %v7322_v43 = vrot.slane %v7321_v36, 1 }
0x1da0   :  { %v7323_v52 = vadd.f32 %v7322_v43, %v7321_v36 }
0x1da2   :  { %v12185_v62 = vmul.f32 0.00390625, %v7323_v52 }
0x1da4   :  { %v12189_v55 = vsub.f32 %v12013_v33, %v12185_v62  ;;  %v12193_v14 = vsub.f32 %v12009_v25, %v12185_v62  ;;  %v12197_v61 = vsub.f32 %v12027_v3, %v12185_v62  ;;  %v12201_v13 = vsub.f32 %v12029_v10, %v12185_v62 }
0x1da5   :  { %v12205_v45 = vsub.f32 %v12043_v54, %v12185_v62  ;;  %v12215_v3 = vsub.f32 %v12045_v24, %v12185_v62  ;;  %v12223_v9 = vsub.f32 %v12059_v58, %v12185_v62  ;;  %v12230_v24 = vsub.f32 %v12057_v39, %v12185_v62 }
0x1da6   :  { %v7358_v33 = vmul.f32 %v12189_v55, %v12189_v55  ;;  %v7359_v2 = vmul.f32 %v12193_v14, %v12193_v14  ;;  %v7360_v25 = vmul.f32 %v12197_v61, %v12197_v61  ;;  %v7361_v10 = vmul.f32 %v12201_v13, %v12201_v13 }
0x1da7   :  { %v7362_v57 = vmul.f32 %v12205_v45, %v12205_v45  ;;  %v7363_v12 = vmul.f32 %v12215_v3, %v12215_v3  ;;  %v12237_v58 = vsub.f32 %v12075_v8, %v12185_v62  ;;  %v7364_v21 = vmul.f32 %v12223_v9, %v12223_v9 }
0x1da8   :  { %v7390_v30 = vsel %vm1213_vm10, %v7358_v33, 0.0  ;;  %v7391_v54 = vsel %vm1213_vm10, %v7359_v2, 0.0  ;;  %v7393_v34 = vsel %vm1213_vm10, %v7360_v25, 0.0  ;;  %v7395_v6 = vsel %vm1213_vm10, %v7361_v10, 0.0 }
0x1da9   :  { %v7392_v51 = vadd.f32 %v7391_v54, %v7390_v30  ;;  %v7397_v29 = vsel %vm1213_vm10, %v7362_v57, 0.0  ;;  %v12244_v39 = vsub.f32 %v12073_v11, %v12185_v62  ;;  %v7365_v46 = vmul.f32 %v12230_v24, %v12230_v24 }
0x1daa   :  { %v7399_v44 = vsel %vm1213_vm10, %v7363_v12, 0.0  ;;  %v12251_v8 = vsub.f32 %v12091_v48, %v12185_v62  ;;  %v7366_v50 = vmul.f32 %v12237_v58, %v12237_v58  ;;  %v7401_v1 = vsel %vm1213_vm10, %v7364_v21, 0.0 }
0x1dab   :  { %v7394_v20 = vadd.f32 %v7393_v34, %v7392_v51  ;;  %v12258_v11 = vsub.f32 %v12089_v7, %v12185_v62  ;;  %v7367_v27 = vmul.f32 %v12244_v39, %v12244_v39  ;;  %v7403_v28 = vsel %vm1213_vm10, %v7365_v46, 0.0 }
0x1dac   :  { %v12265_v48 = vsub.f32 %v12105_v23, %v12185_v62  ;;  %v7368_v36 = vmul.f32 %v12251_v8, %v12251_v8  ;;  %v7405_v43 = vsel %vm1213_vm10, %v7366_v50, 0.0  ;;  %v12272_v7 = vsub.f32 %v12103_v26, %v12185_v62 }
0x1dad   :  { %v7396_v16 = vadd.f32 %v7395_v6, %v7394_v20  ;;  %v7369_v33 = vmul.f32 %v12258_v11, %v12258_v11  ;;  %v7407_v2 = vsel %vm1213_vm10, %v7367_v27, 0.0  ;;  %v12279_v23 = vsub.f32 %v12115_v59, %v12185_v62 }
0x1dae   :  { %v7370_v10 = vmul.f32 %v12265_v48, %v12265_v48  ;;  %v7409_v30 = vsel %vm1213_vm10, %v7368_v36, 0.0  ;;  %v12286_v26 = vsub.f32 %v12113_v53, %v12185_v62  ;;  %v7371_v51 = vmul.f32 %v12272_v7, %v12272_v7 }
0x1daf   :  { %v7398_v32 = vadd.f32 %v7397_v29, %v7396_v16  ;;  %v7411_v57 = vsel %vm1213_vm10, %v7369_v33, 0.0  ;;  %v12293_v59 = vsub.f32 %v12119_v38, %v12185_v62  ;;  %v7372_v20 = vmul.f32 %v12279_v23, %v12279_v23 }
0x1db0   :  { %v7413_v12 = vsel %vm1213_vm10, %v7370_v10, 0.0  ;;  %v12300_v53 = vsub.f32 %v12123_v49, %v12185_v62  ;;  %v7373_v16 = vmul.f32 %v12286_v26, %v12286_v26  ;;  %v7415_v21 = vsel %vm1213_vm10, %v7371_v51, 0.0 }
0x1db1   :  { %v7400_v19 = vadd.f32 %v7399_v44, %v7398_v32  ;;  %v12307_v38 = vsub.f32 %v12127_v4, %v12185_v62  ;;  %v7374_v32 = vmul.f32 %v12293_v59, %v12293_v59  ;;  %v7417_v46 = vsel %vm1213_vm10, %v7372_v20, 0.0 }
0x1db2   :  { %v12314_v49 = vsub.f32 %v12131_v35, %v12185_v62  ;;  %v7419_v50 = vsel %vm1213_vm10, %v7373_v16, 0.0  ;;  %v12321_v4 = vsub.f32 %v12135_v41, %v12185_v62  ;;  %v12328_v35 = vsub.f32 %v12139_v5, %v12185_v62  ;;  %v7605_v5 = vld [vmem:[%s12640_s21] sm:$0x3f] }
0x1db3   :  { %v7402_v0 = vadd.f32 %v7401_v1, %v7400_v19  ;;  %v7375_v19 = vmul.f32 %v12300_v53, %v12300_v53  ;;  %v7421_v27 = vsel %vm1213_vm10, %v7374_v32, 0.0  ;;  %v12335_v41 = vsub.f32 %v12143_v56, %v12185_v62 }
0x1db4   :  { %v7379_v10 = vmul.f32 %v12328_v35, %v12328_v35  ;;  %v12352_v51 = vsub.f32 %v12151_v47, %v12185_v62 }
0x1db5   :  { %v7404_v40 = vadd.f32 %v7403_v28, %v7402_v0  ;;  %v7376_v0 = vmul.f32 %v12307_v38, %v12307_v38  ;;  %v7423_v36 = vsel %vm1213_vm10, %v7375_v19, 0.0 }
0x1db6   :  { %v7431_v47 = vsel %vm1213_vm10, %v7379_v10, 0.0 }
0x1db7   :  { %v7406_v52 = vadd.f32 %v7405_v43, %v7404_v40  ;;  %v7377_v40 = vmul.f32 %v12314_v49, %v12314_v49  ;;  %v7425_v33 = vsel %vm1213_vm10, %v7376_v0, 0.0 }
0x1db9   :  { %v7408_v25 = vadd.f32 %v7407_v2, %v7406_v52  ;;  %v7378_v52 = vmul.f32 %v12321_v4, %v12321_v4  ;;  %v7427_v56 = vsel %vm1213_vm10, %v7377_v40, 0.0 }
0x1dbb   :  { %v7410_v54 = vadd.f32 %v7409_v30, %v7408_v25  ;;  %v12345_v25 = vsub.f32 %v12147_v63, %v12185_v62  ;;  %v10217_v30 = vmov 0   ;;  %v7734_v63 = vld [vmem:[%s12640_s21] sm:$0x3f] }
0x1dbc   :  { %10194 = vset.pattern.permute.xlu0 %v10217_v30 }
0x1dbd   :  { %v7412_v34 = vadd.f32 %v7411_v57, %v7410_v54  ;;  %7608 = vperm.xlu0 %10194, %v7605_v5   ;;  %v7380_v57 = vmul.f32 %v12335_v41, %v12335_v41 }
0x1dbf   :  { %v7414_v6 = vadd.f32 %v7413_v12, %v7412_v34  ;;  %v7429_v34 = vsel %vm1213_vm10, %v7378_v52, 0.0  ;;  %v12362_v12 = vsub.f32 %v12155_v31, %v12185_v62  ;;  %v7433_v32 = vsel %vm1213_vm10, %v7380_v57, 0.0 }
0x1dc0   :  { %v12376_v31 = vsub.f32 %v12163_v22, %v12185_v62  ;;  %v12390_v22 = vsub.f32 %v12171_v18, %v12185_v62  ;;  %v12404_v18 = vsub.f32 %v12181_v37, %v12185_v62 }
0x1dc1   :  { %v7416_v29 = vadd.f32 %v7415_v21, %v7414_v6  ;;  %v7381_v6 = vmul.f32 %v12345_v25, %v12345_v25  ;;  %7737 = vperm.xlu0 %10194, %v7734_v63   ;;  %v12369_v21 = vsub.f32 %v12159_v42, %v12185_v62  ;;  %v12383_v42 = vsub.f32 %v12167_v15, %v12185_v62 }
0x1dc2   :  { %v12397_v15 = vsub.f32 %v12177_v17, %v12185_v62 }
0x1dc3   :  { %v7418_v44 = vadd.f32 %v7417_v46, %v7416_v29  ;;  %v7382_v29 = vmul.f32 %v12352_v51, %v12352_v51  ;;  %v7435_v19 = vsel %vm1213_vm10, %v7381_v6, 0.0 }
0x1dc4   :  { %v7388_v17 = vmul.f32 %v12397_v15, %v12397_v15 }
0x1dc5   :  { %v7420_v1 = vadd.f32 %v7419_v50, %v7418_v44  ;;  %v7383_v44 = vmul.f32 %v12362_v12, %v12362_v12  ;;  %v7437_v0 = vsel %vm1213_vm10, %v7382_v29, 0.0 }
0x1dc6   :  { %v7449_v37 = vsel %vm1213_vm10, %v7388_v17, 0.0 }
0x1dc7   :  { %v7422_v28 = vadd.f32 %v7421_v27, %v7420_v1  ;;  %v7384_v1 = vmul.f32 %v12369_v21, %v12369_v21  ;;  %v7439_v40 = vsel %vm1213_vm10, %v7383_v44, 0.0 }
0x1dc9   :  { %v7424_v43 = vadd.f32 %v7423_v36, %v7422_v28  ;;  %v7385_v28 = vmul.f32 %v12376_v31, %v12376_v31  ;;  %v7441_v52 = vsel %vm1213_vm10, %v7384_v1, 0.0  ;;  %v12422_v1 = vld [vmem:[%s12637_s18] ss:$0 sm:$0xff] }
0x1dcb   :  { %v7426_v2 = vadd.f32 %v7425_v33, %v7424_v43  ;;  %v7386_v43 = vmul.f32 %v12383_v42, %v12383_v42  ;;  %v7443_v5 = vsel %vm1213_vm10, %v7385_v28, 0.0 }
0x1dcd   :  { %v7428_v54 = vadd.f32 %v7427_v56, %v7426_v2  ;;  %v7387_v2 = vmul.f32 %v12390_v22, %v12390_v22  ;;  %v7445_v56 = vsel %vm1213_vm10, %v7386_v43, 0.0 }
0x1dcf   :  { %v7430_v20 = vadd.f32 %v7429_v34, %v7428_v54  ;;  %v7389_v54 = vmul.f32 %v12404_v18, %v12404_v18  ;;  %v7447_v57 = vsel %vm1213_vm10, %v7387_v2, 0.0 }
0x1dd1   :  { %v7432_v16 = vadd.f32 %v7431_v47, %v7430_v20  ;;  %v7451_v63 = vsel %vm1213_vm10, %v7389_v54, 0.0 }
0x1dd3   :  { %v7434_v46 = vadd.f32 %v7433_v32, %v7432_v16 }
0x1dd5   :  { %v7436_v50 = vadd.f32 %v7435_v19, %v7434_v46 }
0x1dd7   :  { %v7438_v27 = vadd.f32 %v7437_v0, %v7436_v50 }
0x1dd9   :  { %v7440_v36 = vadd.f32 %v7439_v40, %v7438_v27 }
0x1ddb   :  { %v7442_v33 = vadd.f32 %v7441_v52, %v7440_v36  ;;  %v12435_v36 = vld [vmem:[%s12638_s19] ss:$0 sm:$0xff] }
0x1ddd   :  { %v7444_v10 = vadd.f32 %v7443_v5, %v7442_v33 }
0x1ddf   :  { %v7446_v30 = vadd.f32 %v7445_v56, %v7444_v10 }
0x1de1   :  { %v7448_v34 = vadd.f32 %v7447_v57, %v7446_v30 }
0x1de3   :  { %v7450_v62 = vadd.f32 %v7449_v37, %v7448_v34 }
0x1de5   :  { %v7452_v20 = vadd.f32 %v7451_v63, %v7450_v62 }
0x1de7   :  { %v7453_v6 = vrot.slane %v7452_v20, 4 }
0x1de9   :  { %v7454_v47 = vadd.f32 %v7453_v6, %v7452_v20 }
0x1deb   :  { %v7455_v16 = vrot.slane %v7454_v47, 2 }
0x1ded   :  { %v7456_v29 = vadd.f32 %v7455_v16, %v7454_v47 }
0x1def   :  { %v7457_v32 = vrot.slane %v7456_v29, 1 }
0x1df1   :  { %v7458_v46 = vadd.f32 %v7457_v32, %v7456_v29 }
0x1df3   :  { %v7459_v44 = vmul.f32 0.00390625, %v7458_v46 }
0x1df5   :  { %v7460_v19 = vadd.f32 1e-05, %v7459_v44 }
0x1df7   :  { %10197 = vrsqrt.f32 %v7460_v19 }
0x1e01   :  { %v12417_v50 = vpop.eup %10197 }
0x1e02   :  { %v7462_v0 = vmul.f32 %v12417_v50, %v12189_v55  ;;  %v7463_v27 = vmul.f32 %v12417_v50, %v12193_v14  ;;  %v7478_v28 = vmul.f32 %v12417_v50, %v12293_v59  ;;  %v7479_v40 = vmul.f32 %v12417_v50, %v12300_v53 }
0x1e03   :  { %v7464_v43 = vmul.f32 %v12417_v50, %v12197_v61  ;;  %v7465_v55 = vmul.f32 %v12417_v50, %v12201_v13  ;;  %v7480_v14 = vmul.f32 %v12417_v50, %v12307_v38  ;;  %v7481_v59 = vmul.f32 %v12417_v50, %v12314_v49 }
0x1e04   :  { %v7501_v52 = vmul.f32 %v12422_v1, %v7462_v0  ;;  %v7502_v53 = vmul.f32 %v12422_v1, %v7463_v27  ;;  %v7517_v33 = vmul.f32 %v12422_v1, %v7478_v28  ;;  %v7518_v2 = vmul.f32 %v12422_v1, %v7479_v40 }
0x1e05   :  { %v7503_v5 = vmul.f32 %v12422_v1, %v7464_v43  ;;  %v7504_v61 = vmul.f32 %v12422_v1, %v7465_v55  ;;  %v7519_v13 = vmul.f32 %v12422_v1, %v7480_v14  ;;  %v7520_v10 = vmul.f32 %v12422_v1, %v7481_v59 }
0x1e06   :  { %v7540_v38 = vadd.f32 %v12435_v36, %v7501_v52  ;;  %v7541_v49 = vadd.f32 %v12435_v36, %v7502_v53  ;;  %v7556_v17 = vadd.f32 %v12435_v36, %v7517_v33  ;;  %v7557_v56 = vadd.f32 %v12435_v36, %v7518_v2 }
0x1e07   :  { %v7542_v62 = vadd.f32 %v12435_v36, %v7503_v5  ;;  %v7543_v63 = vadd.f32 %v12435_v36, %v7504_v61  ;;  %v7558_v20 = vadd.f32 %v12435_v36, %v7519_v13  ;;  %v7559_v6 = vadd.f32 %v12435_v36, %v7520_v10 }
0x1e08   :  { %v7572_v30 = vmax.f32 %v7540_v38, 0.0  ;;  %v7573_v54 = vmax.f32 %v7541_v49, 0.0  ;;  %v7588_v57 = vmax.f32 %v7556_v17, 0.0  ;;  %v7589_v34 = vmax.f32 %v7557_v56, 0.0 }
0x1e09   :  { %v7466_v29 = vmul.f32 %v12417_v50, %v12205_v45  ;;  %v7467_v32 = vmul.f32 %v12417_v50, %v12215_v3  ;;  %v7482_v46 = vmul.f32 %v12417_v50, %v12321_v4  ;;  %v7483_v44 = vmul.f32 %v12417_v50, %v12328_v35 }
0x1e0a   :  { %v9792_v47 = vpack.c.bf16 %v7573_v54, %v7572_v30  ;;  %v9824_v16 = vpack.c.bf16 %v7589_v34, %v7588_v57  ;;  %v7574_v45 = vmax.f32 %v7542_v62, 0.0  ;;  %v7575_v19 = vmax.f32 %v7543_v63, 0.0 }
0x1e0b   :  { %v7505_v3 = vmul.f32 %v12422_v1, %v7466_v29  ;;  %v7506_v0 = vmul.f32 %v12422_v1, %v7467_v32  ;;  %v7590_v4 = vmax.f32 %v7558_v20, 0.0  ;;  %v7591_v27 = vmax.f32 %v7559_v6, 0.0 }
0x1e0c   :  { %9794 = vmatpush3.bf16.xpose.msk.msra.mxu0 %vm12459_vm13, %v9792_v47  ;;  %9826 = vmatpush3.bf16.xpose.msk.msra.mxu1 %vm12459_vm13, %v9824_v16  ;;  %v7521_v35 = vmul.f32 %v12422_v1, %v7482_v46  ;;  %v7522_v28 = vmul.f32 %v12422_v1, %v7483_v44  ;;  %v7468_v40 = vmul.f32 %v12417_v50, %v12223_v9 }
0x1e0d   :  { %9795 = vmatprep.subr.bf16.mxu0 %v10214_v60  ;;  %9827 = vmatprep.subr.bf16.mxu1 %v10214_v60  ;;  %v7469_v43 = vmul.f32 %v12417_v50, %v12230_v24  ;;  %v9796_v55 = vpack.c.bf16 %v7575_v19, %v7574_v45  ;;  %v7544_v14 = vadd.f32 %v12435_v36, %v7505_v3 }
0x1e0e   :  { %v7545_v59 = vadd.f32 %v12435_v36, %v7506_v0  ;;  %v7484_v52 = vmul.f32 %v12417_v50, %v12335_v41  ;;  %v9828_v53 = vpack.c.bf16 %v7591_v27, %v7590_v4  ;;  %v7560_v33 = vadd.f32 %v12435_v36, %v7521_v35 }
0x1e0f   :  { %v7561_v2 = vadd.f32 %v12435_v36, %v7522_v28  ;;  %v7485_v5 = vmul.f32 %v12417_v50, %v12345_v25  ;;  %v7507_v9 = vmul.f32 %v12422_v1, %v7468_v40  ;;  %v7508_v24 = vmul.f32 %v12422_v1, %v7469_v43 }
0x1e10   :  { %v7576_v41 = vmax.f32 %v7544_v14, 0.0  ;;  %v7577_v61 = vmax.f32 %v7545_v59, 0.0  ;;  %v7523_v13 = vmul.f32 %v12422_v1, %v7484_v52  ;;  %v7592_v10 = vmax.f32 %v7560_v33, 0.0 }
0x1e11   :  { %v7593_v25 = vmax.f32 %v7561_v2, 0.0  ;;  %v7524_v38 = vmul.f32 %v12422_v1, %v7485_v5  ;;  %v7546_v49 = vadd.f32 %v12435_v36, %v7507_v9  ;;  %v7547_v17 = vadd.f32 %v12435_v36, %v7508_v24 }
0x1e12   :  { %v9800_v56 = vpack.c.bf16 %v7577_v61, %v7576_v41  ;;  %v7562_v30 = vadd.f32 %v12435_v36, %v7523_v13  ;;  %v7470_v54 = vmul.f32 %v12417_v50, %v12237_v58  ;;  %v7471_v57 = vmul.f32 %v12417_v50, %v12244_v39 }
0x1e13   :  { %v9832_v34 = vpack.c.bf16 %v7593_v25, %v7592_v10  ;;  %v7563_v62 = vadd.f32 %v12435_v36, %v7524_v38  ;;  %v7486_v63 = vmul.f32 %v12417_v50, %v12352_v51  ;;  %v7487_v20 = vmul.f32 %v12417_v50, %v12362_v12 }
0x1e14   :  { %9798 = vmatpush3.bf16.xpose.msk.msra.mxu0 %vm12459_vm13, %v9796_v55  ;;  %9830 = vmatpush3.bf16.xpose.msk.msra.mxu1 %vm12459_vm13, %v9828_v53  ;;  %v7578_v58 = vmax.f32 %v7546_v49, 0.0  ;;  %v7579_v39 = vmax.f32 %v7547_v17, 0.0  ;;  %v7509_v6 = vmul.f32 %v12422_v1, %v7470_v54  ;;  %v7510_v47 = vmul.f32 %v12422_v1, %v7471_v57 }
0x1e15   :  { %9799 = vmatprep.subr.bf16.mxu0 %v10214_v60  ;;  %9831 = vmatprep.subr.bf16.mxu1 %v10214_v60  ;;  %v7594_v51 = vmax.f32 %v7562_v30, 0.0  ;;  %v7595_v16 = vmax.f32 %v7563_v62, 0.0  ;;  %v7525_v12 = vmul.f32 %v12422_v1, %v7486_v63  ;;  %v7526_v29 = vmul.f32 %v12422_v1, %v7487_v20 }
0x1e16   :  { %v7472_v32 = vmul.f32 %v12417_v50, %v12251_v8  ;;  %v7473_v46 = vmul.f32 %v12417_v50, %v12258_v11  ;;  %v9804_v44 = vpack.c.bf16 %v7579_v39, %v7578_v58  ;;  %v7548_v45 = vadd.f32 %v12435_v36, %v7509_v6 }
0x1e17   :  { %v7549_v19 = vadd.f32 %v12435_v36, %v7510_v47  ;;  %v7488_v3 = vmul.f32 %v12417_v50, %v12369_v21  ;;  %v9836_v0 = vpack.c.bf16 %v7595_v16, %v7594_v51  ;;  %v7564_v4 = vadd.f32 %v12435_v36, %v7525_v12 }
0x1e18   :  { %v7565_v27 = vadd.f32 %v12435_v36, %v7526_v29  ;;  %v7489_v35 = vmul.f32 %v12417_v50, %v12376_v31  ;;  %v7511_v8 = vmul.f32 %v12422_v1, %v7472_v32  ;;  %v7512_v11 = vmul.f32 %v12422_v1, %v7473_v46 }
0x1e19   :  { %v7580_v21 = vmax.f32 %v7548_v45, 0.0  ;;  %v7581_v28 = vmax.f32 %v7549_v19, 0.0  ;;  %v7527_v40 = vmul.f32 %v12422_v1, %v7488_v3  ;;  %v7596_v43 = vmax.f32 %v7564_v4, 0.0 }
0x1e1a   :  { %v7597_v31 = vmax.f32 %v7565_v27, 0.0  ;;  %v7528_v55 = vmul.f32 %v12422_v1, %v7489_v35  ;;  %v7550_v14 = vadd.f32 %v12435_v36, %v7511_v8  ;;  %v7551_v59 = vadd.f32 %v12435_v36, %v7512_v11 }
0x1e1b   :  { %v7474_v52 = vmul.f32 %v12417_v50, %v12265_v48  ;;  %v9808_v53 = vpack.c.bf16 %v7581_v28, %v7580_v21  ;;  %v7566_v33 = vadd.f32 %v12435_v36, %v7527_v40  ;;  %v7475_v2 = vmul.f32 %v12417_v50, %v12272_v7 }
0x1e1c   :  { %9802 = vmatpush3.bf16.xpose.msk.msra.mxu0 %vm12459_vm13, %v9800_v56  ;;  %9834 = vmatpush3.bf16.xpose.msk.msra.mxu1 %vm12459_vm13, %v9832_v34  ;;  %v9840_v5 = vpack.c.bf16 %v7597_v31, %v7596_v43  ;;  %v7567_v9 = vadd.f32 %v12435_v36, %v7528_v55  ;;  %v7490_v24 = vmul.f32 %v12417_v50, %v12383_v42  ;;  %v7582_v48 = vmax.f32 %v7550_v14, 0.0 }
0x1e1d   :  { %9803 = vmatprep.subr.bf16.mxu0 %v10214_v60  ;;  %9835 = vmatprep.subr.bf16.mxu1 %v10214_v60  ;;  %v7491_v41 = vmul.f32 %v12417_v50, %v12390_v22  ;;  %v7583_v61 = vmax.f32 %v7551_v59, 0.0  ;;  %v7513_v13 = vmul.f32 %v12422_v1, %v7474_v52  ;;  %v7514_v7 = vmul.f32 %v12422_v1, %v7475_v2 }
0x1e1e   :  { %v7598_v42 = vmax.f32 %v7566_v33, 0.0  ;;  %v7599_v10 = vmax.f32 %v7567_v9, 0.0  ;;  %v7529_v22 = vmul.f32 %v12422_v1, %v7490_v24  ;;  %v7476_v56 = vmul.f32 %v12417_v50, %v12279_v23 }
0x1e1f   :  { %v7530_v25 = vmul.f32 %v12422_v1, %v7491_v41  ;;  %v9812_v38 = vpack.c.bf16 %v7583_v61, %v7582_v48  ;;  %v7552_v49 = vadd.f32 %v12435_v36, %v7513_v13  ;;  %v7553_v17 = vadd.f32 %v12435_v36, %v7514_v7 }
0x1e20   :  { %v7477_v30 = vmul.f32 %v12417_v50, %v12286_v26  ;;  %v7492_v54 = vmul.f32 %v12417_v50, %v12397_v15  ;;  %v9844_v57 = vpack.c.bf16 %v7599_v10, %v7598_v42  ;;  %v7568_v34 = vadd.f32 %v12435_v36, %v7529_v22 }
0x1e21   :  { %v7569_v62 = vadd.f32 %v12435_v36, %v7530_v25  ;;  %v7493_v63 = vmul.f32 %v12417_v50, %v12404_v18  ;;  %v7584_v23 = vmax.f32 %v7552_v49, 0.0  ;;  %v7585_v26 = vmax.f32 %v7553_v17, 0.0 }
0x1e22   :  { %v7515_v15 = vmul.f32 %v12422_v1, %v7476_v56  ;;  %v7516_v20 = vmul.f32 %v12422_v1, %v7477_v30  ;;  %v7600_v58 = vmax.f32 %v7568_v34, 0.0  ;;  %v7531_v18 = vmul.f32 %v12422_v1, %v7492_v54 }
0x1e23   :  { %v7601_v39 = vmax.f32 %v7569_v62, 0.0  ;;  %v7532_v50 = vmul.f32 %v12422_v1, %v7493_v63  ;;  %v9816_v51 = vpack.c.bf16 %v7585_v26, %v7584_v23 }
0x1e24   :  { %9806 = vmatpush3.bf16.xpose.msk.msra.mxu0 %vm12459_vm13, %v9804_v44  ;;  %9838 = vmatpush3.bf16.xpose.msk.msra.mxu1 %vm12459_vm13, %v9836_v0  ;;  %v7554_v6 = vadd.f32 %v12435_v36, %v7515_v15  ;;  %v7555_v47 = vadd.f32 %v12435_v36, %v7516_v20  ;;  %v7570_v12 = vadd.f32 %v12435_v36, %v7531_v18 }
0x1e25   :  { %9807 = vmatprep.subr.bf16.mxu0 %v10214_v60  ;;  %9839 = vmatprep.subr.bf16.mxu1 %v10214_v60  ;;  %v9848_v16 = vpack.c.bf16 %v7601_v39, %v7600_v58  ;;  %v7571_v29 = vadd.f32 %v12435_v36, %v7532_v50  ;;  %v7604_v36 = vld [vmem:[%s12639_s20] sm:$0x3f] }
0x1e26   :  { %v7586_v1 = vmax.f32 %v7554_v6, 0.0  ;;  %v7587_v32 = vmax.f32 %v7555_v47, 0.0  ;;  %v7602_v46 = vmax.f32 %v7570_v12, 0.0 }
0x1e27   :  { %v7603_v44 = vmax.f32 %v7571_v29, 0.0 }
0x1e28   :  { %v9820_v45 = vpack.c.bf16 %v7587_v32, %v7586_v1 }
0x1e29   :  { %v9852_v19 = vpack.c.bf16 %v7603_v44, %v7602_v46 }
0x1e2c   :  { %9810 = vmatpush3.bf16.xpose.msk.msra.mxu0 %vm12459_vm13, %v9808_v53  ;;  %9842 = vmatpush3.bf16.xpose.msk.msra.mxu1 %vm12459_vm13, %v9840_v5 }
0x1e2d   :  { %9811 = vmatprep.subr.bf16.mxu0 %v10214_v60  ;;  %9843 = vmatprep.subr.bf16.mxu1 %v10214_v60 }
0x1e34   :  { %9814 = vmatpush3.bf16.xpose.msk.msra.mxu0 %vm12459_vm13, %v9812_v38  ;;  %9846 = vmatpush3.bf16.xpose.msk.msra.mxu1 %vm12459_vm13, %v9844_v57 }
0x1e35   :  { %9815 = vmatprep.subr.bf16.mxu0 %v10214_v60  ;;  %9847 = vmatprep.subr.bf16.mxu1 %v10214_v60 }
0x1e3c   :  { %9818 = vmatpush3.bf16.xpose.msk.msra.mxu0 %vm12459_vm13, %v9816_v51  ;;  %9850 = vmatpush3.bf16.xpose.msk.msra.mxu1 %vm12459_vm13, %v9848_v16  ;;  %v7609_v3 = vpop.permute.xlu0 %7608 }
0x1e3d   :  { %9819 = vmatprep.subr.bf16.mxu0 %v10214_v60  ;;  %9851 = vmatprep.subr.bf16.mxu1 %v10214_v60  ;;  %v7733_v60 = vld [vmem:[%s12639_s20] sm:$0x3f] }
0x1e40   :  { %v7738_v0 = vpop.permute.xlu0 %7737 }
0x1e44   :  { %9822 = vmatpush3.bf16.xpose.msk.msra.mxu0 %vm12459_vm13, %v9820_v45  ;;  %9854 = vmatpush3.bf16.xpose.msk.msra.mxu1 %vm12459_vm13, %v9852_v19 }
0x1e4b   :  { %9688 = vmatmul.mubr.msk.f32.vlgmr.msra.gmra.mrb[92].mxu0 %vm1213_vm10, %v7604_v36  ;;  %9723 = vmatmul.mubr.msk.f32.vlgmr.msra.gmra.mrb[92].mxu1 %vm1213_vm10, %v7733_v60 }
0x1f1e   :  { %v7728_v4 = vpop.f32.mrb[92].mxu0  ;;  %v7857_v27 = vpop.f32.mrb[92].mxu1 }
0x1f1f   :  { %v7729_v35 = vadd.f32 %v7728_v4, %v7609_v3  ;;  %v7858_v8 = vadd.f32 %v7857_v27, %v7738_v0  ;;  %v9689_v37 = vpop.f32.mrb[93].mxu0  ;;  %v9724_v11 = vpop.f32.mrb[93].mxu1 }
0x1f21   :  { %7732 = vst [vmem:[%s12641_s22] sm:$0x3f] %v7729_v35  ;;  %8383 = vst [vmem:[%s12641_s22 + $0x8] sm:$0x3f] %v7858_v8 }

</bundles_post_ra>
